<compile_context>
chip_gen: v7x
topology: tpu7x:2x2x1
jax: 0.10.0
libtpu: 0.0.40
codegen_flags: <defaults>
</compile_context>

<pallas_src>
import functools
import math

import jax
import jax.numpy as jnp
from jax import lax
from jax.experimental import pallas as pl
from jax.experimental.pallas import tpu as pltpu

_EPS = 1e-5


def _round_up(x, m):
    return ((x + m - 1) // m) * m


# ---------------------------------------------------------------------------
# Pallas kernels (each pallas_call runs a single full-size tile: T == 1)
# ---------------------------------------------------------------------------

def _conv_bn_kernel(a_ref, w_ref, g_ref, b_ref, o_ref, *, m_real, eps,
                    apply_tanh):
    """Fused im2col-matmul + training-mode BatchNorm (+ optional tanh).

    a_ref: (Mp, K) bf16 patches (zero-padded rows contribute nothing to the
    sums, so no masking is needed).  w_ref: (K, Np) bf16 (Np = Cout padded to
    128).  g_ref / b_ref: (1, Np) f32 gamma / beta.  Conv bias omitted: it is
    mathematically dead under the BatchNorm that follows."""
    y = jnp.dot(a_ref[...], w_ref[...], preferred_element_type=jnp.float32)
    inv_m = 1.0 / m_real
    s1 = jnp.sum(y, axis=0, keepdims=True)
    s2 = jnp.sum(y * y, axis=0, keepdims=True)
    mean = s1 * inv_m
    var = jnp.maximum(s2 * inv_m - mean * mean, 0.0)
    scale = g_ref[...] * lax.rsqrt(var + eps)
    shift = b_ref[...] - mean * scale
    out = y * scale + shift
    if apply_tanh:
        out = jnp.tanh(out)
    o_ref[...] = out


def _matmul_kernel(a_ref, w_ref, o_ref):
    """Plain lane-dense MXU matmul (bf16 in, f32 accumulate)."""
    o_ref[...] = jnp.dot(a_ref[...], w_ref[...],
                         preferred_element_type=jnp.float32)


def _bn_rows_kernel(x_ref, g_ref, b_ref, o_ref, *, eps, apply_tanh):
    """Training-mode BatchNorm on the channel-first (C, M) view: per-channel
    statistics are per-row sums; single fused pass (+ optional tanh)."""
    x = x_ref[...]
    inv_n = 1.0 / x.shape[1]
    s1 = jnp.sum(x, axis=1, keepdims=True)
    s2 = jnp.sum(x * x, axis=1, keepdims=True)
    mean = s1 * inv_n
    var = jnp.maximum(s2 * inv_n - mean * mean, 0.0)
    scale = g_ref[...] * lax.rsqrt(var + eps)          # (C, 1)
    shift = b_ref[...] - mean * scale
    y = x * scale + shift
    if apply_tanh:
        y = jnp.tanh(y)
    o_ref[...] = y


# ---------------------------------------------------------------------------
# pallas_call helper: single full-array tile, f32 output
# ---------------------------------------------------------------------------

def _full_spec(shape):
    nd = len(shape)
    return pl.BlockSpec(shape, lambda *_: (0,) * nd)


def _pallas_single(kernel, out_shape, *inputs):
    return pl.pallas_call(
        kernel,
        out_shape=jax.ShapeDtypeStruct(out_shape, jnp.float32),
        grid=(1,),
        in_specs=[_full_spec(x.shape) for x in inputs],
        out_specs=_full_spec(out_shape),
        compiler_params=pltpu.CompilerParams(
            dimension_semantics=("arbitrary",)),
    )(*inputs)


# ---------------------------------------------------------------------------
# Layer wrappers (encoder: channel-last NDHWC; decoder: channel-first (C, M))
# ---------------------------------------------------------------------------

def conv3d_bn(x, w_kn, gamma_row, beta_row, *, cout, k, stride, padding,
              apply_tanh=False):
    """Conv3d (no bias; dead under BN) + training-mode BatchNorm3d, fused into
    one Pallas kernel.  x: (N, D, H, W, Cin) channel-last."""
    N = x.shape[0]
    patches = lax.conv_general_dilated_patches(
        x, filter_shape=(k, k, k), window_strides=(stride,) * 3,
        padding=[(padding, padding)] * 3,
        dimension_numbers=("NDHWC", "DHWIO", "NDHWC"))
    _, Do, Ho, Wo, K = patches.shape          # feature dim ordered (cin, kd, kh, kw)
    M = N * Do * Ho * Wo
    Mp = _round_up(M, 8)
    a = patches.reshape(M, K).astype(jnp.bfloat16)
    if Mp > M:
        a = jnp.pad(a, ((0, Mp - M), (0, 0)))
    out = _pallas_single(
        functools.partial(_conv_bn_kernel, m_real=M, eps=_EPS,
                          apply_tanh=apply_tanh),
        (Mp, w_kn.shape[1]), a, w_kn, gamma_row, beta_row)
    return out[:M, :cout].reshape(N, Do, Ho, Wo, cout)


def maxpool3d(x, k, s):
    return lax.reduce_window(x, -jnp.inf, lax.max,
                             (1, k, k, k, 1), (1, s, s, s, 1), 'VALID')


def _col2im(cols, N, D, H, W, C, k, s, pad):
    """cols: (N*D*H*W, C*k^3), columns ordered (c, kd, kh, kw).  Overlap-adds
    the per-input-position ConvTranspose3d contributions and crops the padding.
    Block-phase decomposition kd = q*s + r (q < ceil(k/s)) -> at most ceil(k/s)
    shifted adds per spatial axis instead of a k^3 Python loop.
    Returns the channel-first view (C, N*Do*Ho*Wo) plus (Do, Ho, Wo)."""
    Q = -(-k // s)
    Do = (D - 1) * s + k - 2 * pad
    Ho = (H - 1) * s + k - 2 * pad
    Wo = (W - 1) * s + k - 2 * pad
    x = cols.reshape(N, D, H, W, C, k, k, k)
    if Q * s > k:
        x = jnp.pad(x, ((0, 0),) * 5 + ((0, Q * s - k),) * 3)
    x = x.reshape(N, D, H, W, C, Q, s, Q, s, Q, s)
    # -> (N, C, D, Qd, sd, H, Qh, sh, W, Qw, sw)
    x = x.transpose(0, 4, 1, 5, 6, 2, 7, 8, 3, 9, 10)

    def overlap_add(a, axis):
        # merge dims (axis: blocks, axis+1: Q) into one dim of size blocks+Q-1
        if Q == 1:
            return a.reshape(a.shape[:axis + 1] + a.shape[axis + 2:])
        acc = None
        for q in range(Q):
            t = lax.index_in_dim(a, q, axis=axis + 1, keepdims=False)
            cfg = [(0, 0, 0)] * t.ndim
            cfg[axis] = (q, Q - 1 - q, 0)
            t = lax.pad(t, jnp.zeros((), t.dtype), cfg)
            acc = t if acc is None else acc + t
        return acc

    x = overlap_add(x, 8)        # W axis
    x = overlap_add(x, 5)        # H axis
    x = overlap_add(x, 2)        # D axis
    x = x.reshape(N, C, (D + Q - 1) * s, (H + Q - 1) * s, (W + Q - 1) * s)
    x = x[:, :, pad:pad + Do, pad:pad + Ho, pad:pad + Wo]
    return (x.transpose(1, 0, 2, 3, 4).reshape(C, N * Do * Ho * Wo),
            (Do, Ho, Wo))


def conv_transpose3d_bn(x_cf, spatial, w_kn, gamma_col, beta_col, *, cout, k,
                        s, pad, apply_tanh=False, use_mxu=True):
    """ConvTranspose3d (no bias; dead under BN) + training-mode BatchNorm3d
    (+ optional tanh).  x_cf: (Cin, M) channel-first, M ordered (n, d, h, w);
    spatial = (N, D, H, W) of the input.  w_kn: (Cin, >=Cout*k^3), columns
    ordered (cout, kd, kh, kw).  Returns (Cout, N*Do*Ho*Wo), (Do, Ho, Wo)."""
    N, D, H, W = spatial
    M = N * D * H * W
    ncols = cout * k ** 3
    if use_mxu:
        Mp = _round_up(M, 8)
        a = x_cf.T.astype(jnp.bfloat16)
        if Mp > M:
            a = jnp.pad(a, ((0, Mp - M), (0, 0)))
        cols = _pallas_single(_matmul_kernel, (Mp, w_kn.shape[1]), a, w_kn)
        cols = cols[:M, :ncols]
    else:
        # tiny contraction (Cin=8, Cout*k^3=8): the padded-lane MXU path would
        # write 16x the real bytes, so leave this one to XLA (per review).
        cols = x_cf.T @ w_kn[:, :ncols]
    y_cf, odims = _col2im(cols, N, D, H, W, cout, k, s, pad)
    out = _pallas_single(
        functools.partial(_bn_rows_kernel, eps=_EPS, apply_tanh=apply_tanh),
        y_cf.shape, y_cf, gamma_col, beta_col)
    return out, odims


# ---------------------------------------------------------------------------
# Parameters: torch-layout xavier_normal(gain=sqrt(2)) conv weights, stored
# pre-reshaped / pre-padded / pre-cast into the exact kernel layouts.
# ---------------------------------------------------------------------------

def _xavier_normal(key, shape, gain):
    receptive = math.prod(shape[2:])
    fan_in = shape[1] * receptive
    fan_out = shape[0] * receptive
    std = gain * math.sqrt(2.0 / (fan_in + fan_out))
    return std * jax.random.normal(key, shape, dtype=jnp.float32)


def init_params(key):
    gain = math.sqrt(2.0)
    ks = jax.random.split(key, 5)

    def conv_w(k_, cout, cin, k):           # Conv3d: (Cout,Cin,k,k,k) -> (K, 128) bf16
        w = _xavier_normal(k_, (cout, cin, k, k, k), gain)
        kk = cin * k ** 3
        w2 = w.reshape(cout, kk).T
        w2 = jnp.pad(w2, ((0, 0), (0, _round_up(cout, 128) - cout)))
        return w2.astype(jnp.bfloat16)

    def deconv_w(k_, cin, cout, k, pad_lanes=True, dtype=jnp.bfloat16):
        w = _xavier_normal(k_, (cin, cout, k, k, k), gain)   # torch ConvT layout
        ncols = cout * k ** 3
        w2 = w.reshape(cin, ncols)
        if pad_lanes:
            w2 = jnp.pad(w2, ((0, 0), (0, _round_up(ncols, 128) - ncols)))
        return w2.astype(dtype)

    def bn_row(c):      # gamma/beta for the (M, Cpad=128) conv kernels
        return (jnp.pad(jnp.ones((c,), jnp.float32), (0, 128 - c)).reshape(1, 128),
                jnp.zeros((1, 128), jnp.float32))

    def bn_col(c):      # gamma/beta for the channel-first (C, M) decoder kernels
        return jnp.ones((c, 1), jnp.float32), jnp.zeros((c, 1), jnp.float32)

    p = {}
    p["e1_w"] = conv_w(ks[0], 16, 1, 3)
    p["e2_w"] = conv_w(ks[1], 16, 16, 3)
    p["d1_w"] = deconv_w(ks[2], 16, 16, 3)
    p["d2_w"] = deconv_w(ks[3], 16, 8, 5)
    p["d3_w"] = deconv_w(ks[4], 8, 1, 2, pad_lanes=False, dtype=jnp.float32)
    p["e1_g"], p["e1_b"] = bn_row(16)
    p["e2_g"], p["e2_b"] = bn_row(16)
    p["d1_g"], p["d1_b"] = bn_col(16)
    p["d2_g"], p["d2_b"] = bn_col(8)
    p["d3_g"], p["d3_b"] = bn_col(1)
    # Conv / ConvTranspose biases are intentionally not materialized: every conv
    # is followed by training-mode BatchNorm, so a per-channel constant cancels
    # exactly in (x - mean) and does not affect the forward output.
    return p


# ---------------------------------------------------------------------------
# Forward pass (mirrors CNNAutoEncoder.forward, training-mode BatchNorm)
# ---------------------------------------------------------------------------

def cnn_autoencoder_forward(x_ncdhw, params):
    N = x_ncdhw.shape[0]
    x = x_ncdhw.transpose(0, 2, 3, 4, 1)                    # NCDHW -> NDHWC
    # encoder: Conv+BN -> MaxPool -> Conv+BN -> MaxPool
    h = conv3d_bn(x, params["e1_w"], params["e1_g"], params["e1_b"],
                  cout=16, k=3, stride=3, padding=1)
    h = maxpool3d(h, 2, 2)
    h = conv3d_bn(h, params["e2_w"], params["e2_g"], params["e2_b"],
                  cout=16, k=3, stride=2, padding=1)
    enc = maxpool3d(h, 2, 1)                                 # (N,1,1,1,16)
    # decoder: (ConvT+BN) x3, last with Tanh; channel-first (C, M) activations
    d = enc.reshape(N, 16).T                                 # (16, N)
    d, sp = conv_transpose3d_bn(d, (N, 1, 1, 1), params["d1_w"],
                                params["d1_g"], params["d1_b"],
                                cout=16, k=3, s=2, pad=0)
    d, sp = conv_transpose3d_bn(d, (N,) + sp, params["d2_w"],
                                params["d2_g"], params["d2_b"],
                                cout=8, k=5, s=3, pad=1)
    d, sp = conv_transpose3d_bn(d, (N,) + sp, params["d3_w"],
                                params["d3_g"], params["d3_b"],
                                cout=1, k=2, s=2, pad=1,
                                apply_tanh=True, use_mxu=False)
    dec = d.reshape(1, N, *sp).transpose(1, 0, 2, 3, 4)      # -> NCDHW
    enc_out = enc.transpose(0, 4, 1, 2, 3)                   # (N,16,1,1,1)
    return enc_out, dec


if __name__ == "__main__":
    key = jax.random.PRNGKey(0)
    k_x, k_p = jax.random.split(key)
    # small but consistent: batch=2, 1 channel, 16^3 volume (NCDHW like torch)
    x = jax.random.normal(k_x, (2, 1, 16, 16, 16), dtype=jnp.float32)
    params = init_params(k_p)

    enc, dec = jax.jit(cnn_autoencoder_forward)(x, params)
    jax.block_until_ready((enc, dec))

    assert enc.shape == (2, 16, 1, 1, 1), enc.shape
    assert dec.shape == (2, 1, 16, 16, 16), dec.shape
    assert bool(jnp.all(jnp.isfinite(enc))) and bool(jnp.all(jnp.isfinite(dec)))
    print("KERNEL_OK")
</pallas_src>

<mosaic_0001>
module attributes {stable_mosaic.version = 11 : i64} {
  func.func @_conv_bn_kernel(%arg0: i32, %arg1: memref<432x27xbf16, #tpu.memory_space<vmem>>, %arg2: memref<27x128xbf16, #tpu.memory_space<vmem>>, %arg3: memref<1x128xf32, #tpu.memory_space<vmem>>, %arg4: memref<1x128xf32, #tpu.memory_space<vmem>>, %arg5: memref<432x128xf32, #tpu.memory_space<vmem>>) attributes {dimension_semantics = [#tpu.dimension_semantics<arbitrary>], iteration_bounds = array<i64: 1>, scalar_prefetch = 0 : i64, scratch_operands = 0 : i64, tpu.core_type = #tpu.core_type<tc>, window_params = [{pipeline_mode = #tpu.pipeline_mode<synchronous>, transform_indices = @transform_0, window_bounds = array<i64: 432, 27>}, {pipeline_mode = #tpu.pipeline_mode<synchronous>, transform_indices = @transform_1, window_bounds = array<i64: 27, 128>}, {pipeline_mode = #tpu.pipeline_mode<synchronous>, transform_indices = @transform_2, window_bounds = array<i64: 1, 128>}, {pipeline_mode = #tpu.pipeline_mode<synchronous>, transform_indices = @transform_3, window_bounds = array<i64: 1, 128>}, {pipeline_mode = #tpu.pipeline_mode<synchronous>, transform_indices = @transform_4, window_bounds = array<i64: 432, 128>}]} {
    %c0 = arith.constant 0 : index
    %c0_0 = arith.constant 0 : index
    %0 = vector.load %arg1[%c0, %c0_0] : memref<432x27xbf16, #tpu.memory_space<vmem>>, vector<432x27xbf16>
    %c0_1 = arith.constant 0 : index
    %c0_2 = arith.constant 0 : index
    %1 = vector.load %arg2[%c0_1, %c0_2] : memref<27x128xbf16, #tpu.memory_space<vmem>>, vector<27x128xbf16>
    %cst = arith.constant dense<0.000000e+00> : vector<432x128xf32>
    %2 = tpu.matmul %0, %1, %cst {dimension_numbers = #tpu.dot_dimension_numbers<[1], [0], [0], [1], [0, 0, 1, 1], [], []>} : vector<432x27xbf16>, vector<27x128xbf16>, vector<432x128xf32> -> vector<432x128xf32>
    %cst_3 = arith.constant dense<0.000000e+00> : vector<128xf32>
    %3 = vector.multi_reduction <add>, %2, %cst_3 [0] : vector<432x128xf32> to vector<128xf32>
    %4 = vector.shape_cast %3 : vector<128xf32> to vector<1x128xf32>
    %5 = arith.mulf %2, %2 : vector<432x128xf32>
    %cst_4 = arith.constant dense<0.000000e+00> : vector<128xf32>
    %6 = vector.multi_reduction <add>, %5, %cst_4 [0] : vector<432x128xf32> to vector<128xf32>
    %7 = vector.shape_cast %6 : vector<128xf32> to vector<1x128xf32>
    %cst_5 = arith.constant 0.00231481483 : f32
    %8 = vector.broadcast %cst_5 : f32 to vector<1x128xf32>
    %9 = arith.mulf %4, %8 : vector<1x128xf32>
    %cst_6 = arith.constant 0.00231481483 : f32
    %10 = vector.broadcast %cst_6 : f32 to vector<1x128xf32>
    %11 = arith.mulf %7, %10 : vector<1x128xf32>
    %12 = arith.mulf %9, %9 : vector<1x128xf32>
    %13 = arith.subf %11, %12 : vector<1x128xf32>
    %cst_7 = arith.constant 0.000000e+00 : f32
    %14 = vector.broadcast %cst_7 : f32 to vector<1x128xf32>
    %15 = arith.maximumf %13, %14 : vector<1x128xf32>
    %c0_8 = arith.constant 0 : index
    %c0_9 = arith.constant 0 : index
    %16 = vector.load %arg3[%c0_8, %c0_9] : memref<1x128xf32, #tpu.memory_space<vmem>>, vector<1x128xf32>
    %cst_10 = arith.constant 9.99999974E-6 : f32
    %17 = vector.broadcast %cst_10 : f32 to vector<1x128xf32>
    %18 = arith.addf %15, %17 : vector<1x128xf32>
    %19 = math.rsqrt %18 : vector<1x128xf32>
    %20 = arith.mulf %16, %19 : vector<1x128xf32>
    %c0_11 = arith.constant 0 : index
    %c0_12 = arith.constant 0 : index
    %21 = vector.load %arg4[%c0_11, %c0_12] : memref<1x128xf32, #tpu.memory_space<vmem>>, vector<1x128xf32>
    %22 = arith.mulf %9, %20 : vector<1x128xf32>
    %23 = arith.subf %21, %22 : vector<1x128xf32>
    %24 = vector.broadcast %20 : vector<1x128xf32> to vector<432x128xf32>
    %25 = arith.mulf %2, %24 : vector<432x128xf32>
    %26 = vector.broadcast %23 : vector<1x128xf32> to vector<432x128xf32>
    %27 = arith.addf %25, %26 : vector<432x128xf32>
    %c0_13 = arith.constant 0 : index
    %c0_14 = arith.constant 0 : index
    %28 = vector.load %arg5[%c0_13, %c0_14] : memref<432x128xf32, #tpu.memory_space<vmem>>, vector<432x128xf32>
    tpu.vector_store %arg5[%c0_13, %c0_14], %27 {strides = array<i32>} : memref<432x128xf32, #tpu.memory_space<vmem>>, vector<432x128xf32>,
    return
  }
  func.func @transform_0(%arg0: i32) -> (i32, i32) {
    %c0_i32 = arith.constant 0 : i32
    %c0_i32_0 = arith.constant 0 : i32
    %c0_i32_1 = arith.constant 0 : i32
    return %c0_i32, %c0_i32_0 : i32, i32
  }
  func.func @transform_1(%arg0: i32) -> (i32, i32) {
    %c0_i32 = arith.constant 0 : i32
    %c0_i32_0 = arith.constant 0 : i32
    %c0_i32_1 = arith.constant 0 : i32
    return %c0_i32, %c0_i32_0 : i32, i32
  }
  func.func @transform_2(%arg0: i32) -> (i32, i32) {
    %c0_i32 = arith.constant 0 : i32
    %c0_i32_0 = arith.constant 0 : i32
    %c0_i32_1 = arith.constant 0 : i32
    return %c0_i32, %c0_i32_0 : i32, i32
  }
  func.func @transform_3(%arg0: i32) -> (i32, i32) {
    %c0_i32 = arith.constant 0 : i32
    %c0_i32_0 = arith.constant 0 : i32
    %c0_i32_1 = arith.constant 0 : i32
    return %c0_i32, %c0_i32_0 : i32, i32
  }
  func.func @transform_4(%arg0: i32) -> (i32, i32) {
    %c0_i32 = arith.constant 0 : i32
    %c0_i32_0 = arith.constant 0 : i32
    %c0_i32_1 = arith.constant 0 : i32
    return %c0_i32, %c0_i32_0 : i32, i32
  }
}

module attributes {stable_mosaic.version = 11 : i64} {
  func.func @_conv_bn_kernel(%arg0: i32, %arg1: memref<16x432xbf16, #tpu.memory_space<vmem>>, %arg2: memref<432x128xbf16, #tpu.memory_space<vmem>>, %arg3: memref<1x128xf32, #tpu.memory_space<vmem>>, %arg4: memref<1x128xf32, #tpu.memory_space<vmem>>, %arg5: memref<16x128xf32, #tpu.memory_space<vmem>>) attributes {dimension_semantics = [#tpu.dimension_semantics<arbitrary>], iteration_bounds = array<i64: 1>, scalar_prefetch = 0 : i64, scratch_operands = 0 : i64, tpu.core_type = #tpu.core_type<tc>, window_params = [{pipeline_mode = #tpu.pipeline_mode<synchronous>, transform_indices = @transform_0, window_bounds = array<i64: 16, 432>}, {pipeline_mode = #tpu.pipeline_mode<synchronous>, transform_indices = @transform_1, window_bounds = array<i64: 432, 128>}, {pipeline_mode = #tpu.pipeline_mode<synchronous>, transform_indices = @transform_2, window_bounds = array<i64: 1, 128>}, {pipeline_mode = #tpu.pipeline_mode<synchronous>, transform_indices = @transform_3, window_bounds = array<i64: 1, 128>}, {pipeline_mode = #tpu.pipeline_mode<synchronous>, transform_indices = @transform_4, window_bounds = array<i64: 16, 128>}]} {
    %c0 = arith.constant 0 : index
    %c0_0 = arith.constant 0 : index
    %0 = vector.load %arg1[%c0, %c0_0] : memref<16x432xbf16, #tpu.memory_space<vmem>>, vector<16x432xbf16>
    %c0_1 = arith.constant 0 : index
    %c0_2 = arith.constant 0 : index
    %1 = vector.load %arg2[%c0_1, %c0_2] : memref<432x128xbf16, #tpu.memory_space<vmem>>, vector<432x128xbf16>
    %cst = arith.constant dense<0.000000e+00> : vector<16x128xf32>
    %2 = tpu.matmul %0, %1, %cst {dimension_numbers = #tpu.dot_dimension_numbers<[1], [0], [0], [1], [0, 0, 1, 1], [], []>} : vector<16x432xbf16>, vector<432x128xbf16>, vector<16x128xf32> -> vector<16x128xf32>
    %cst_3 = arith.constant dense<0.000000e+00> : vector<128xf32>
    %3 = vector.multi_reduction <add>, %2, %cst_3 [0] : vector<16x128xf32> to vector<128xf32>
    %4 = vector.shape_cast %3 : vector<128xf32> to vector<1x128xf32>
    %5 = arith.mulf %2, %2 : vector<16x128xf32>
    %cst_4 = arith.constant dense<0.000000e+00> : vector<128xf32>
    %6 = vector.multi_reduction <add>, %5, %cst_4 [0] : vector<16x128xf32> to vector<128xf32>
    %7 = vector.shape_cast %6 : vector<128xf32> to vector<1x128xf32>
    %cst_5 = arith.constant 6.250000e-02 : f32
    %8 = vector.broadcast %cst_5 : f32 to vector<1x128xf32>
    %9 = arith.mulf %4, %8 : vector<1x128xf32>
    %cst_6 = arith.constant 6.250000e-02 : f32
    %10 = vector.broadcast %cst_6 : f32 to vector<1x128xf32>
    %11 = arith.mulf %7, %10 : vector<1x128xf32>
    %12 = arith.mulf %9, %9 : vector<1x128xf32>
    %13 = arith.subf %11, %12 : vector<1x128xf32>
    %cst_7 = arith.constant 0.000000e+00 : f32
    %14 = vector.broadcast %cst_7 : f32 to vector<1x128xf32>
    %15 = arith.maximumf %13, %14 : vector<1x128xf32>
    %c0_8 = arith.constant 0 : index
    %c0_9 = arith.constant 0 : index
    %16 = vector.load %arg3[%c0_8, %c0_9] : memref<1x128xf32, #tpu.memory_space<vmem>>, vector<1x128xf32>
    %cst_10 = arith.constant 9.99999974E-6 : f32
    %17 = vector.broadcast %cst_10 : f32 to vector<1x128xf32>
    %18 = arith.addf %15, %17 : vector<1x128xf32>
    %19 = math.rsqrt %18 : vector<1x128xf32>
    %20 = arith.mulf %16, %19 : vector<1x128xf32>
    %c0_11 = arith.constant 0 : index
    %c0_12 = arith.constant 0 : index
    %21 = vector.load %arg4[%c0_11, %c0_12] : memref<1x128xf32, #tpu.memory_space<vmem>>, vector<1x128xf32>
    %22 = arith.mulf %9, %20 : vector<1x128xf32>
    %23 = arith.subf %21, %22 : vector<1x128xf32>
    %24 = vector.broadcast %20 : vector<1x128xf32> to vector<16x128xf32>
    %25 = arith.mulf %2, %24 : vector<16x128xf32>
    %26 = vector.broadcast %23 : vector<1x128xf32> to vector<16x128xf32>
    %27 = arith.addf %25, %26 : vector<16x128xf32>
    %c0_13 = arith.constant 0 : index
    %c0_14 = arith.constant 0 : index
    %28 = vector.load %arg5[%c0_13, %c0_14] : memref<16x128xf32, #tpu.memory_space<vmem>>, vector<16x128xf32>
    tpu.vector_store %arg5[%c0_13, %c0_14], %27 {strides = array<i32>} : memref<16x128xf32, #tpu.memory_space<vmem>>, vector<16x128xf32>,
    return
  }
  func.func @transform_0(%arg0: i32) -> (i32, i32) {
    %c0_i32 = arith.constant 0 : i32
    %c0_i32_0 = arith.constant 0 : i32
    %c0_i32_1 = arith.constant 0 : i32
    return %c0_i32, %c0_i32_0 : i32, i32
  }
  func.func @transform_1(%arg0: i32) -> (i32, i32) {
    %c0_i32 = arith.constant 0 : i32
    %c0_i32_0 = arith.constant 0 : i32
    %c0_i32_1 = arith.constant 0 : i32
    return %c0_i32, %c0_i32_0 : i32, i32
  }
  func.func @transform_2(%arg0: i32) -> (i32, i32) {
    %c0_i32 = arith.constant 0 : i32
    %c0_i32_0 = arith.constant 0 : i32
    %c0_i32_1 = arith.constant 0 : i32
    return %c0_i32, %c0_i32_0 : i32, i32
  }
  func.func @transform_3(%arg0: i32) -> (i32, i32) {
    %c0_i32 = arith.constant 0 : i32
    %c0_i32_0 = arith.constant 0 : i32
    %c0_i32_1 = arith.constant 0 : i32
    return %c0_i32, %c0_i32_0 : i32, i32
  }
  func.func @transform_4(%arg0: i32) -> (i32, i32) {
    %c0_i32 = arith.constant 0 : i32
    %c0_i32_0 = arith.constant 0 : i32
    %c0_i32_1 = arith.constant 0 : i32
    return %c0_i32, %c0_i32_0 : i32, i32
  }
}

module attributes {stable_mosaic.version = 11 : i64} {
  func.func @_matmul_kernel(%arg0: i32, %arg1: memref<8x16xbf16, #tpu.memory_space<vmem>>, %arg2: memref<16x512xbf16, #tpu.memory_space<vmem>>, %arg3: memref<8x512xf32, #tpu.memory_space<vmem>>) attributes {dimension_semantics = [#tpu.dimension_semantics<arbitrary>], iteration_bounds = array<i64: 1>, scalar_prefetch = 0 : i64, scratch_operands = 0 : i64, tpu.core_type = #tpu.core_type<tc>, window_params = [{pipeline_mode = #tpu.pipeline_mode<synchronous>, transform_indices = @transform_0, window_bounds = array<i64: 8, 16>}, {pipeline_mode = #tpu.pipeline_mode<synchronous>, transform_indices = @transform_1, window_bounds = array<i64: 16, 512>}, {pipeline_mode = #tpu.pipeline_mode<synchronous>, transform_indices = @transform_2, window_bounds = array<i64: 8, 512>}]} {
    %c0 = arith.constant 0 : index
    %c0_0 = arith.constant 0 : index
    %0 = vector.load %arg1[%c0, %c0_0] : memref<8x16xbf16, #tpu.memory_space<vmem>>, vector<8x16xbf16>
    %c0_1 = arith.constant 0 : index
    %c0_2 = arith.constant 0 : index
    %1 = vector.load %arg2[%c0_1, %c0_2] : memref<16x512xbf16, #tpu.memory_space<vmem>>, vector<16x512xbf16>
    %cst = arith.constant dense<0.000000e+00> : vector<8x512xf32>
    %2 = tpu.matmul %0, %1, %cst {dimension_numbers = #tpu.dot_dimension_numbers<[1], [0], [0], [1], [0, 0, 1, 1], [], []>} : vector<8x16xbf16>, vector<16x512xbf16>, vector<8x512xf32> -> vector<8x512xf32>
    %c0_3 = arith.constant 0 : index
    %c0_4 = arith.constant 0 : index
    %3 = vector.load %arg3[%c0_3, %c0_4] : memref<8x512xf32, #tpu.memory_space<vmem>>, vector<8x512xf32>
    tpu.vector_store %arg3[%c0_3, %c0_4], %2 {strides = array<i32>} : memref<8x512xf32, #tpu.memory_space<vmem>>, vector<8x512xf32>,
    return
  }
  func.func @transform_0(%arg0: i32) -> (i32, i32) {
    %c0_i32 = arith.constant 0 : i32
    %c0_i32_0 = arith.constant 0 : i32
    %c0_i32_1 = arith.constant 0 : i32
    return %c0_i32, %c0_i32_0 : i32, i32
  }
  func.func @transform_1(%arg0: i32) -> (i32, i32) {
    %c0_i32 = arith.constant 0 : i32
    %c0_i32_0 = arith.constant 0 : i32
    %c0_i32_1 = arith.constant 0 : i32
    return %c0_i32, %c0_i32_0 : i32, i32
  }
  func.func @transform_2(%arg0: i32) -> (i32, i32) {
    %c0_i32 = arith.constant 0 : i32
    %c0_i32_0 = arith.constant 0 : i32
    %c0_i32_1 = arith.constant 0 : i32
    return %c0_i32, %c0_i32_0 : i32, i32
  }
}

module attributes {stable_mosaic.version = 11 : i64} {
  func.func @_bn_rows_kernel(%arg0: i32, %arg1: memref<16x54xf32, #tpu.memory_space<vmem>>, %arg2: memref<16x1xf32, #tpu.memory_space<vmem>>, %arg3: memref<16x1xf32, #tpu.memory_space<vmem>>, %arg4: memref<16x54xf32, #tpu.memory_space<vmem>>) attributes {dimension_semantics = [#tpu.dimension_semantics<arbitrary>], iteration_bounds = array<i64: 1>, scalar_prefetch = 0 : i64, scratch_operands = 0 : i64, tpu.core_type = #tpu.core_type<tc>, window_params = [{pipeline_mode = #tpu.pipeline_mode<synchronous>, transform_indices = @transform_0, window_bounds = array<i64: 16, 54>}, {pipeline_mode = #tpu.pipeline_mode<synchronous>, transform_indices = @transform_1, window_bounds = array<i64: 16, 1>}, {pipeline_mode = #tpu.pipeline_mode<synchronous>, transform_indices = @transform_2, window_bounds = array<i64: 16, 1>}, {pipeline_mode = #tpu.pipeline_mode<synchronous>, transform_indices = @transform_3, window_bounds = array<i64: 16, 54>}]} {
    %c0 = arith.constant 0 : index
    %c0_0 = arith.constant 0 : index
    %0 = vector.load %arg1[%c0, %c0_0] : memref<16x54xf32, #tpu.memory_space<vmem>>, vector<16x54xf32>
    %cst = arith.constant dense<0.000000e+00> : vector<16xf32>
    %1 = vector.multi_reduction <add>, %0, %cst [1] : vector<16x54xf32> to vector<16xf32>
    %2 = vector.shape_cast %1 : vector<16xf32> to vector<16x1xf32>
    %3 = arith.mulf %0, %0 : vector<16x54xf32>
    %cst_1 = arith.constant dense<0.000000e+00> : vector<16xf32>
    %4 = vector.multi_reduction <add>, %3, %cst_1 [1] : vector<16x54xf32> to vector<16xf32>
    %5 = vector.shape_cast %4 : vector<16xf32> to vector<16x1xf32>
    %cst_2 = arith.constant 0.0185185187 : f32
    %6 = vector.broadcast %cst_2 : f32 to vector<16x1xf32>
    %7 = arith.mulf %2, %6 : vector<16x1xf32>
    %cst_3 = arith.constant 0.0185185187 : f32
    %8 = vector.broadcast %cst_3 : f32 to vector<16x1xf32>
    %9 = arith.mulf %5, %8 : vector<16x1xf32>
    %10 = arith.mulf %7, %7 : vector<16x1xf32>
    %11 = arith.subf %9, %10 : vector<16x1xf32>
    %cst_4 = arith.constant 0.000000e+00 : f32
    %12 = vector.broadcast %cst_4 : f32 to vector<16x1xf32>
    %13 = arith.maximumf %11, %12 : vector<16x1xf32>
    %c0_5 = arith.constant 0 : index
    %c0_6 = arith.constant 0 : index
    %14 = vector.load %arg2[%c0_5, %c0_6] : memref<16x1xf32, #tpu.memory_space<vmem>>, vector<16x1xf32>
    %cst_7 = arith.constant 9.99999974E-6 : f32
    %15 = vector.broadcast %cst_7 : f32 to vector<16x1xf32>
    %16 = arith.addf %13, %15 : vector<16x1xf32>
    %17 = math.rsqrt %16 : vector<16x1xf32>
    %18 = arith.mulf %14, %17 : vector<16x1xf32>
    %c0_8 = arith.constant 0 : index
    %c0_9 = arith.constant 0 : index
    %19 = vector.load %arg3[%c0_8, %c0_9] : memref<16x1xf32, #tpu.memory_space<vmem>>, vector<16x1xf32>
    %20 = arith.mulf %7, %18 : vector<16x1xf32>
    %21 = arith.subf %19, %20 : vector<16x1xf32>
    %22 = vector.broadcast %18 : vector<16x1xf32> to vector<16x54xf32>
    %23 = arith.mulf %0, %22 : vector<16x54xf32>
    %24 = vector.broadcast %21 : vector<16x1xf32> to vector<16x54xf32>
    %25 = arith.addf %23, %24 : vector<16x54xf32>
    %c0_10 = arith.constant 0 : index
    %c0_11 = arith.constant 0 : index
    %26 = vector.load %arg4[%c0_10, %c0_11] : memref<16x54xf32, #tpu.memory_space<vmem>>, vector<16x54xf32>
    tpu.vector_store %arg4[%c0_10, %c0_11], %25 {strides = array<i32>} : memref<16x54xf32, #tpu.memory_space<vmem>>, vector<16x54xf32>,
    return
  }
  func.func @transform_0(%arg0: i32) -> (i32, i32) {
    %c0_i32 = arith.constant 0 : i32
    %c0_i32_0 = arith.constant 0 : i32
    %c0_i32_1 = arith.constant 0 : i32
    return %c0_i32, %c0_i32_0 : i32, i32
  }
  func.func @transform_1(%arg0: i32) -> (i32, i32) {
    %c0_i32 = arith.constant 0 : i32
    %c0_i32_0 = arith.constant 0 : i32
    %c0_i32_1 = arith.constant 0 : i32
    return %c0_i32, %c0_i32_0 : i32, i32
  }
  func.func @transform_2(%arg0: i32) -> (i32, i32) {
    %c0_i32 = arith.constant 0 : i32
    %c0_i32_0 = arith.constant 0 : i32
    %c0_i32_1 = arith.constant 0 : i32
    return %c0_i32, %c0_i32_0 : i32, i32
  }
  func.func @transform_3(%arg0: i32) -> (i32, i32) {
    %c0_i32 = arith.constant 0 : i32
    %c0_i32_0 = arith.constant 0 : i32
    %c0_i32_1 = arith.constant 0 : i32
    return %c0_i32, %c0_i32_0 : i32, i32
  }
}

module attributes {stable_mosaic.version = 11 : i64} {
  func.func @_matmul_kernel(%arg0: i32, %arg1: memref<56x16xbf16, #tpu.memory_space<vmem>>, %arg2: memref<16x1024xbf16, #tpu.memory_space<vmem>>, %arg3: memref<56x1024xf32, #tpu.memory_space<vmem>>) attributes {dimension_semantics = [#tpu.dimension_semantics<arbitrary>], iteration_bounds = array<i64: 1>, scalar_prefetch = 0 : i64, scratch_operands = 0 : i64, tpu.core_type = #tpu.core_type<tc>, window_params = [{pipeline_mode = #tpu.pipeline_mode<synchronous>, transform_indices = @transform_0, window_bounds = array<i64: 56, 16>}, {pipeline_mode = #tpu.pipeline_mode<synchronous>, transform_indices = @transform_1, window_bounds = array<i64: 16, 1024>}, {pipeline_mode = #tpu.pipeline_mode<synchronous>, transform_indices = @transform_2, window_bounds = array<i64: 56, 1024>}]} {
    %c0 = arith.constant 0 : index
    %c0_0 = arith.constant 0 : index
    %0 = vector.load %arg1[%c0, %c0_0] : memref<56x16xbf16, #tpu.memory_space<vmem>>, vector<56x16xbf16>
    %c0_1 = arith.constant 0 : index
    %c0_2 = arith.constant 0 : index
    %1 = vector.load %arg2[%c0_1, %c0_2] : memref<16x1024xbf16, #tpu.memory_space<vmem>>, vector<16x1024xbf16>
    %cst = arith.constant dense<0.000000e+00> : vector<56x1024xf32>
    %2 = tpu.matmul %0, %1, %cst {dimension_numbers = #tpu.dot_dimension_numbers<[1], [0], [0], [1], [0, 0, 1, 1], [], []>} : vector<56x16xbf16>, vector<16x1024xbf16>, vector<56x1024xf32> -> vector<56x1024xf32>
    %c0_3 = arith.constant 0 : index
    %c0_4 = arith.constant 0 : index
    %3 = vector.load %arg3[%c0_3, %c0_4] : memref<56x1024xf32, #tpu.memory_space<vmem>>, vector<56x1024xf32>
    tpu.vector_store %arg3[%c0_3, %c0_4], %2 {strides = array<i32>} : memref<56x1024xf32, #tpu.memory_space<vmem>>, vector<56x1024xf32>,
    return
  }
  func.func @transform_0(%arg0: i32) -> (i32, i32) {
    %c0_i32 = arith.constant 0 : i32
    %c0_i32_0 = arith.constant 0 : i32
    %c0_i32_1 = arith.constant 0 : i32
    return %c0_i32, %c0_i32_0 : i32, i32
  }
  func.func @transform_1(%arg0: i32) -> (i32, i32) {
    %c0_i32 = arith.constant 0 : i32
    %c0_i32_0 = arith.constant 0 : i32
    %c0_i32_1 = arith.constant 0 : i32
    return %c0_i32, %c0_i32_0 : i32, i32
  }
  func.func @transform_2(%arg0: i32) -> (i32, i32) {
    %c0_i32 = arith.constant 0 : i32
    %c0_i32_0 = arith.constant 0 : i32
    %c0_i32_1 = arith.constant 0 : i32
    return %c0_i32, %c0_i32_0 : i32, i32
  }
}

module attributes {stable_mosaic.version = 11 : i64} {
  func.func @_bn_rows_kernel(%arg0: i32, %arg1: memref<8x1458xf32, #tpu.memory_space<vmem>>, %arg2: memref<8x1xf32, #tpu.memory_space<vmem>>, %arg3: memref<8x1xf32, #tpu.memory_space<vmem>>, %arg4: memref<8x1458xf32, #tpu.memory_space<vmem>>) attributes {dimension_semantics = [#tpu.dimension_semantics<arbitrary>], iteration_bounds = array<i64: 1>, scalar_prefetch = 0 : i64, scratch_operands = 0 : i64, tpu.core_type = #tpu.core_type<tc>, window_params = [{pipeline_mode = #tpu.pipeline_mode<synchronous>, transform_indices = @transform_0, window_bounds = array<i64: 8, 1458>}, {pipeline_mode = #tpu.pipeline_mode<synchronous>, transform_indices = @transform_1, window_bounds = array<i64: 8, 1>}, {pipeline_mode = #tpu.pipeline_mode<synchronous>, transform_indices = @transform_2, window_bounds = array<i64: 8, 1>}, {pipeline_mode = #tpu.pipeline_mode<synchronous>, transform_indices = @transform_3, window_bounds = array<i64: 8, 1458>}]} {
    %c0 = arith.constant 0 : index
    %c0_0 = arith.constant 0 : index
    %0 = vector.load %arg1[%c0, %c0_0] : memref<8x1458xf32, #tpu.memory_space<vmem>>, vector<8x1458xf32>
    %cst = arith.constant dense<0.000000e+00> : vector<8xf32>
    %1 = vector.multi_reduction <add>, %0, %cst [1] : vector<8x1458xf32> to vector<8xf32>
    %2 = vector.shape_cast %1 : vector<8xf32> to vector<8x1xf32>
    %3 = arith.mulf %0, %0 : vector<8x1458xf32>
    %cst_1 = arith.constant dense<0.000000e+00> : vector<8xf32>
    %4 = vector.multi_reduction <add>, %3, %cst_1 [1] : vector<8x1458xf32> to vector<8xf32>
    %5 = vector.shape_cast %4 : vector<8xf32> to vector<8x1xf32>
    %cst_2 = arith.constant 6.85871055E-4 : f32
    %6 = vector.broadcast %cst_2 : f32 to vector<8x1xf32>
    %7 = arith.mulf %2, %6 : vector<8x1xf32>
    %cst_3 = arith.constant 6.85871055E-4 : f32
    %8 = vector.broadcast %cst_3 : f32 to vector<8x1xf32>
    %9 = arith.mulf %5, %8 : vector<8x1xf32>
    %10 = arith.mulf %7, %7 : vector<8x1xf32>
    %11 = arith.subf %9, %10 : vector<8x1xf32>
    %cst_4 = arith.constant 0.000000e+00 : f32
    %12 = vector.broadcast %cst_4 : f32 to vector<8x1xf32>
    %13 = arith.maximumf %11, %12 : vector<8x1xf32>
    %c0_5 = arith.constant 0 : index
    %c0_6 = arith.constant 0 : index
    %14 = vector.load %arg2[%c0_5, %c0_6] : memref<8x1xf32, #tpu.memory_space<vmem>>, vector<8x1xf32>
    %cst_7 = arith.constant 9.99999974E-6 : f32
    %15 = vector.broadcast %cst_7 : f32 to vector<8x1xf32>
    %16 = arith.addf %13, %15 : vector<8x1xf32>
    %17 = math.rsqrt %16 : vector<8x1xf32>
    %18 = arith.mulf %14, %17 : vector<8x1xf32>
    %c0_8 = arith.constant 0 : index
    %c0_9 = arith.constant 0 : index
    %19 = vector.load %arg3[%c0_8, %c0_9] : memref<8x1xf32, #tpu.memory_space<vmem>>, vector<8x1xf32>
    %20 = arith.mulf %7, %18 : vector<8x1xf32>
    %21 = arith.subf %19, %20 : vector<8x1xf32>
    %22 = vector.broadcast %18 : vector<8x1xf32> to vector<8x1458xf32>
    %23 = arith.mulf %0, %22 : vector<8x1458xf32>
    %24 = vector.broadcast %21 : vector<8x1xf32> to vector<8x1458xf32>
    %25 = arith.addf %23, %24 : vector<8x1458xf32>
    %c0_10 = arith.constant 0 : index
    %c0_11 = arith.constant 0 : index
    %26 = vector.load %arg4[%c0_10, %c0_11] : memref<8x1458xf32, #tpu.memory_space<vmem>>, vector<8x1458xf32>
    tpu.vector_store %arg4[%c0_10, %c0_11], %25 {strides = array<i32>} : memref<8x1458xf32, #tpu.memory_space<vmem>>, vector<8x1458xf32>,
    return
  }
  func.func @transform_0(%arg0: i32) -> (i32, i32) {
    %c0_i32 = arith.constant 0 : i32
    %c0_i32_0 = arith.constant 0 : i32
    %c0_i32_1 = arith.constant 0 : i32
    return %c0_i32, %c0_i32_0 : i32, i32
  }
  func.func @transform_1(%arg0: i32) -> (i32, i32) {
    %c0_i32 = arith.constant 0 : i32
    %c0_i32_0 = arith.constant 0 : i32
    %c0_i32_1 = arith.constant 0 : i32
    return %c0_i32, %c0_i32_0 : i32, i32
  }
  func.func @transform_2(%arg0: i32) -> (i32, i32) {
    %c0_i32 = arith.constant 0 : i32
    %c0_i32_0 = arith.constant 0 : i32
    %c0_i32_1 = arith.constant 0 : i32
    return %c0_i32, %c0_i32_0 : i32, i32
  }
  func.func @transform_3(%arg0: i32) -> (i32, i32) {
    %c0_i32 = arith.constant 0 : i32
    %c0_i32_0 = arith.constant 0 : i32
    %c0_i32_1 = arith.constant 0 : i32
    return %c0_i32, %c0_i32_0 : i32, i32
  }
}

module attributes {stable_mosaic.version = 11 : i64} {
  func.func @_bn_rows_kernel(%arg0: i32, %arg1: memref<1x8192xf32, #tpu.memory_space<vmem>>, %arg2: memref<1x1xf32, #tpu.memory_space<vmem>>, %arg3: memref<1x1xf32, #tpu.memory_space<vmem>>, %arg4: memref<1x8192xf32, #tpu.memory_space<vmem>>) attributes {dimension_semantics = [#tpu.dimension_semantics<arbitrary>], iteration_bounds = array<i64: 1>, scalar_prefetch = 0 : i64, scratch_operands = 0 : i64, tpu.core_type = #tpu.core_type<tc>, window_params = [{pipeline_mode = #tpu.pipeline_mode<synchronous>, transform_indices = @transform_0, window_bounds = array<i64: 1, 8192>}, {pipeline_mode = #tpu.pipeline_mode<synchronous>, transform_indices = @transform_1, window_bounds = array<i64: 1, 1>}, {pipeline_mode = #tpu.pipeline_mode<synchronous>, transform_indices = @transform_2, window_bounds = array<i64: 1, 1>}, {pipeline_mode = #tpu.pipeline_mode<synchronous>, transform_indices = @transform_3, window_bounds = array<i64: 1, 8192>}]} {
    %c0 = arith.constant 0 : index
    %c0_0 = arith.constant 0 : index
    %0 = vector.load %arg1[%c0, %c0_0] : memref<1x8192xf32, #tpu.memory_space<vmem>>, vector<1x8192xf32>
    %cst = arith.constant dense<0.000000e+00> : vector<1xf32>
    %1 = vector.multi_reduction <add>, %0, %cst [1] : vector<1x8192xf32> to vector<1xf32>
    %2 = vector.shape_cast %1 : vector<1xf32> to vector<1x1xf32>
    %3 = arith.mulf %0, %0 : vector<1x8192xf32>
    %cst_1 = arith.constant dense<0.000000e+00> : vector<1xf32>
    %4 = vector.multi_reduction <add>, %3, %cst_1 [1] : vector<1x8192xf32> to vector<1xf32>
    %5 = vector.shape_cast %4 : vector<1xf32> to vector<1x1xf32>
    %cst_2 = arith.constant 1.22070313E-4 : f32
    %6 = vector.broadcast %cst_2 : f32 to vector<1x1xf32>
    %7 = arith.mulf %2, %6 : vector<1x1xf32>
    %cst_3 = arith.constant 1.22070313E-4 : f32
    %8 = vector.broadcast %cst_3 : f32 to vector<1x1xf32>
    %9 = arith.mulf %5, %8 : vector<1x1xf32>
    %10 = arith.mulf %7, %7 : vector<1x1xf32>
    %11 = arith.subf %9, %10 : vector<1x1xf32>
    %cst_4 = arith.constant 0.000000e+00 : f32
    %12 = vector.broadcast %cst_4 : f32 to vector<1x1xf32>
    %13 = arith.maximumf %11, %12 : vector<1x1xf32>
    %c0_5 = arith.constant 0 : index
    %c0_6 = arith.constant 0 : index
    %14 = vector.load %arg2[%c0_5, %c0_6] : memref<1x1xf32, #tpu.memory_space<vmem>>, vector<1x1xf32>
    %cst_7 = arith.constant 9.99999974E-6 : f32
    %15 = vector.broadcast %cst_7 : f32 to vector<1x1xf32>
    %16 = arith.addf %13, %15 : vector<1x1xf32>
    %17 = math.rsqrt %16 : vector<1x1xf32>
    %18 = arith.mulf %14, %17 : vector<1x1xf32>
    %c0_8 = arith.constant 0 : index
    %c0_9 = arith.constant 0 : index
    %19 = vector.load %arg3[%c0_8, %c0_9] : memref<1x1xf32, #tpu.memory_space<vmem>>, vector<1x1xf32>
    %20 = arith.mulf %7, %18 : vector<1x1xf32>
    %21 = arith.subf %19, %20 : vector<1x1xf32>
    %22 = vector.broadcast %18 : vector<1x1xf32> to vector<1x8192xf32>
    %23 = arith.mulf %0, %22 : vector<1x8192xf32>
    %24 = vector.broadcast %21 : vector<1x1xf32> to vector<1x8192xf32>
    %25 = arith.addf %23, %24 : vector<1x8192xf32>
    %26 = math.tanh %25 : vector<1x8192xf32>
    %c0_10 = arith.constant 0 : index
    %c0_11 = arith.constant 0 : index
    %27 = vector.load %arg4[%c0_10, %c0_11] : memref<1x8192xf32, #tpu.memory_space<vmem>>, vector<1x8192xf32>
    tpu.vector_store %arg4[%c0_10, %c0_11], %26 {strides = array<i32>} : memref<1x8192xf32, #tpu.memory_space<vmem>>, vector<1x8192xf32>,
    return
  }
  func.func @transform_0(%arg0: i32) -> (i32, i32) {
    %c0_i32 = arith.constant 0 : i32
    %c0_i32_0 = arith.constant 0 : i32
    %c0_i32_1 = arith.constant 0 : i32
    return %c0_i32, %c0_i32_0 : i32, i32
  }
  func.func @transform_1(%arg0: i32) -> (i32, i32) {
    %c0_i32 = arith.constant 0 : i32
    %c0_i32_0 = arith.constant 0 : i32
    %c0_i32_1 = arith.constant 0 : i32
    return %c0_i32, %c0_i32_0 : i32, i32
  }
  func.func @transform_2(%arg0: i32) -> (i32, i32) {
    %c0_i32 = arith.constant 0 : i32
    %c0_i32_0 = arith.constant 0 : i32
    %c0_i32_1 = arith.constant 0 : i32
    return %c0_i32, %c0_i32_0 : i32, i32
  }
  func.func @transform_3(%arg0: i32) -> (i32, i32) {
    %c0_i32 = arith.constant 0 : i32
    %c0_i32_0 = arith.constant 0 : i32
    %c0_i32_1 = arith.constant 0 : i32
    return %c0_i32, %c0_i32_0 : i32, i32
  }
}

</mosaic_0001>

<bundles_post_ra>
// kernel: cnn_autoencoder_forward.7
= control target key start
LH: loop header
LB: loop body
LE: loop exit
PB: predicated region body
PF: predicated region fallthrough
CT: control target
= control target key end

     0   :  { %vm304_vm0 = vcmask 1044480   ;;  %vm305_vm1 = vcmask 1045504   ;;  %v1157_v0 = vmov 0.0   ;;  %v1158_v2 = vmov 65535   ;;  %s2022_s1 = inlined_call_operand.vmem [shape: bf16[27,128], index: 1, kind: input, shape index: {}]   ;;  %s2023_s0 = inlined_call_operand.vmem [shape: bf16[432,27], index: 0, kind: input, shape index: {}]   ;;  %s2024_s2 = inlined_call_operand.vmem [shape: f32[1,128], index: 2, kind: input, shape index: {}]   ;;  %s2025_s3 = inlined_call_operand.vmem [shape: f32[1,128], index: 3, kind: input, shape index: {}]   ;;  %s2026_s4 = inlined_call_operand.vmem [shape: f32[432,128], index: 4, kind: output, shape index: {}]  }
   0x1   :  { %1007 = vmatprep.subr.bf16.mxu0 %v1157_v0  ;;  %v1126_v1 = vld [vmem:[%s2022_s1] sm:$0xff]   ;;  %v306_v3 = vsel %vm304_vm0, 4294967295, %v1158_v2  ;;  %1119 = vmatprep.subr.bf16.mxu1 %v1157_v0  ;;  %v1127_v4 = vld [vmem:[%s2022_s1 + $0x8] sm:$0x3f]   ;;  %vm1159_vm2 = vmmov 0   ;;  %vm222_vm3 = vcmask 220160  }
   0x2   :  { %1008 = vmatpush3.bf16.msra.mxu0 %v1126_v1  ;;  %v307_v5 = vsel %vm305_vm1, %v306_v3, 0  ;;  %1121 = vmatpush3.bf16.msra.mxu1 %v1126_v1  ;;  %v1128_v7 = vld [vmem:[%s2023_s0] sm:$0xff]   ;;  %v1136_v8 = vld [vmem:[%s2023_s0 + $0x70] sm:$0xff]   ;;  %v1129_v9 = vld [vmem:[%s2023_s0 + $0x8] sm:$0xff]  }
   0x3   :  { %1009 = vmatprep.subr.bf16.mxu0 %v1157_v0  ;;  %v309_v6 = vand.u32 %v1127_v4, %v307_v5  ;;  %1011 = vmatprep.mubr.msk.bf16.mxu0 %vm1159_vm2, %v1157_v0  ;;  %v1138_v10 = vld [vmem:[%s2023_s0 + $0x78] sm:$0xff]   ;;  %v1130_v11 = vld [vmem:[%s2023_s0 + $0x10] sm:$0xff]   ;;  %v1140_v12 = vld [vmem:[%s2023_s0 + $0x80] sm:$0xff]  }
   0x4   :  { %1120 = vmatprep.subr.bf16.mxu1 %v1157_v0  ;;  %1067 = vmatprep.mubr.msk.bf16.mxu1 %vm1159_vm2, %v1157_v0  ;;  %v1131_v13 = vld [vmem:[%s2023_s0 + $0x18] sm:$0xff]   ;;  %v1142_v14 = vld [vmem:[%s2023_s0 + $0x88] sm:$0xff]   ;;  %v1132_v15 = vld [vmem:[%s2023_s0 + $0x20] sm:$0xff]  }
   0x5   :  { %v1144_v16 = vld [vmem:[%s2023_s0 + $0x90] sm:$0xff]   ;;  %v1133_v17 = vld [vmem:[%s2023_s0 + $0x28] sm:$0xff]   ;;  %v1146_v18 = vld [vmem:[%s2023_s0 + $0x98] sm:$0xff]  }
   0x6   :  { %1010 = vmatpush3.bf16.msra.mxu0 %v309_v6  ;;  %1122 = vmatpush3.bf16.msra.mxu1 %v309_v6  ;;  %v1134_v19 = vld [vmem:[%s2023_s0 + $0x30] sm:$0xff]   ;;  %v1148_v20 = vld [vmem:[%s2023_s0 + $0xa0] sm:$0xff]   ;;  %v1135_v21 = vld [vmem:[%s2023_s0 + $0x38] sm:$0xff]  }
   0x7   :  { %v1149_v22 = vld [vmem:[%s2023_s0 + $0xa8] sm:$0xff]   ;;  %v1137_v23 = vld [vmem:[%s2023_s0 + $0x40] sm:$0xff]   ;;  %v1150_v24 = vld [vmem:[%s2023_s0 + $0xb0] sm:$0xff]  }
   0x8   :  { %v1139_v25 = vld [vmem:[%s2023_s0 + $0x48] sm:$0xff]   ;;  %v1151_v26 = vld [vmem:[%s2023_s0 + $0xb8] sm:$0xff]   ;;  %v1141_v27 = vld [vmem:[%s2023_s0 + $0x50] sm:$0xff]  }
   0x9   :  { %1012 = vmatmul.mubr.msk.bf16.vlgmr.msra.gmra.mrb[0].mxu0 %vm222_vm3, %v1128_v7  ;;  %1068 = vmatmul.mubr.msk.bf16.vlgmr.msra.gmra.mrb[0].mxu1 %vm222_vm3, %v1136_v8  ;;  %v1152_v28 = vld [vmem:[%s2023_s0 + $0xc0] sm:$0xff]   ;;  %v1143_v29 = vld [vmem:[%s2023_s0 + $0x58] sm:$0xff]   ;;  %v1153_v30 = vld [vmem:[%s2023_s0 + $0xc8] sm:$0xff]  }
   0xa   :  { %1015 = vmatprep.mubr.msk.bf16.mxu0 %vm1159_vm2, %v1157_v0  ;;  %1071 = vmatprep.mubr.msk.bf16.mxu1 %vm1159_vm2, %v1157_v0  ;;  %v1145_v31 = vld [vmem:[%s2023_s0 + $0x60] sm:$0xff]   ;;  %v1154_v32 = vld [vmem:[%s2023_s0 + $0xd0] sm:$0xff]   ;;  %v1147_v33 = vld [vmem:[%s2023_s0 + $0x68] sm:$0xff]  }
  0x11   :  { %1016 = vmatmul.mubr.msk.bf16.gmra.mrb[4].mxu0 %vm222_vm3, %v1129_v9  ;;  %1072 = vmatmul.mubr.msk.bf16.gmra.mrb[4].mxu1 %vm222_vm3, %v1138_v10 }
  0x12   :  { %1019 = vmatprep.mubr.msk.bf16.mxu0 %vm1159_vm2, %v1157_v0  ;;  %1075 = vmatprep.mubr.msk.bf16.mxu1 %vm1159_vm2, %v1157_v0 }
  0x19   :  { %1020 = vmatmul.mubr.msk.bf16.gmra.mrb[8].mxu0 %vm222_vm3, %v1130_v11  ;;  %1076 = vmatmul.mubr.msk.bf16.gmra.mrb[8].mxu1 %vm222_vm3, %v1140_v12 }
  0x1a   :  { %1023 = vmatprep.mubr.msk.bf16.mxu0 %vm1159_vm2, %v1157_v0  ;;  %1079 = vmatprep.mubr.msk.bf16.mxu1 %vm1159_vm2, %v1157_v0 }
  0x21   :  { %1024 = vmatmul.mubr.msk.bf16.gmra.mrb[12].mxu0 %vm222_vm3, %v1131_v13  ;;  %1080 = vmatmul.mubr.msk.bf16.gmra.mrb[12].mxu1 %vm222_vm3, %v1142_v14 }
  0x22   :  { %1027 = vmatprep.mubr.msk.bf16.mxu0 %vm1159_vm2, %v1157_v0  ;;  %1083 = vmatprep.mubr.msk.bf16.mxu1 %vm1159_vm2, %v1157_v0 }
  0x29   :  { %1028 = vmatmul.mubr.msk.bf16.gmra.mrb[16].mxu0 %vm222_vm3, %v1132_v15  ;;  %1084 = vmatmul.mubr.msk.bf16.gmra.mrb[16].mxu1 %vm222_vm3, %v1144_v16 }
  0x2a   :  { %1031 = vmatprep.mubr.msk.bf16.mxu0 %vm1159_vm2, %v1157_v0  ;;  %1087 = vmatprep.mubr.msk.bf16.mxu1 %vm1159_vm2, %v1157_v0 }
  0x31   :  { %1032 = vmatmul.mubr.msk.bf16.gmra.mrb[20].mxu0 %vm222_vm3, %v1133_v17  ;;  %1088 = vmatmul.mubr.msk.bf16.gmra.mrb[20].mxu1 %vm222_vm3, %v1146_v18 }
  0x32   :  { %1035 = vmatprep.mubr.msk.bf16.mxu0 %vm1159_vm2, %v1157_v0  ;;  %1091 = vmatprep.mubr.msk.bf16.mxu1 %vm1159_vm2, %v1157_v0 }
  0x39   :  { %1036 = vmatmul.mubr.msk.bf16.gmra.mrb[24].mxu0 %vm222_vm3, %v1134_v19  ;;  %1092 = vmatmul.mubr.msk.bf16.gmra.mrb[24].mxu1 %vm222_vm3, %v1148_v20 }
  0x3a   :  { %1039 = vmatprep.mubr.msk.bf16.mxu0 %vm1159_vm2, %v1157_v0  ;;  %1095 = vmatprep.mubr.msk.bf16.mxu1 %vm1159_vm2, %v1157_v0 }
  0x41   :  { %1040 = vmatmul.mubr.msk.bf16.gmra.mrb[28].mxu0 %vm222_vm3, %v1135_v21  ;;  %1096 = vmatmul.mubr.msk.bf16.gmra.mrb[28].mxu1 %vm222_vm3, %v1149_v22 }
  0x42   :  { %1043 = vmatprep.mubr.msk.bf16.mxu0 %vm1159_vm2, %v1157_v0  ;;  %1099 = vmatprep.mubr.msk.bf16.mxu1 %vm1159_vm2, %v1157_v0 }
  0x49   :  { %1044 = vmatmul.mubr.msk.bf16.gmra.mrb[32].mxu0 %vm222_vm3, %v1137_v23  ;;  %1100 = vmatmul.mubr.msk.bf16.gmra.mrb[32].mxu1 %vm222_vm3, %v1150_v24 }
  0x4a   :  { %1047 = vmatprep.mubr.msk.bf16.mxu0 %vm1159_vm2, %v1157_v0  ;;  %1103 = vmatprep.mubr.msk.bf16.mxu1 %vm1159_vm2, %v1157_v0 }
  0x51   :  { %1048 = vmatmul.mubr.msk.bf16.gmra.mrb[36].mxu0 %vm222_vm3, %v1139_v25  ;;  %1104 = vmatmul.mubr.msk.bf16.gmra.mrb[36].mxu1 %vm222_vm3, %v1151_v26 }
  0x52   :  { %1051 = vmatprep.mubr.msk.bf16.mxu0 %vm1159_vm2, %v1157_v0  ;;  %1107 = vmatprep.mubr.msk.bf16.mxu1 %vm1159_vm2, %v1157_v0 }
  0x59   :  { %1052 = vmatmul.mubr.msk.bf16.gmra.mrb[40].mxu0 %vm222_vm3, %v1141_v27  ;;  %1108 = vmatmul.mubr.msk.bf16.gmra.mrb[40].mxu1 %vm222_vm3, %v1152_v28 }
  0x5a   :  { %1055 = vmatprep.mubr.msk.bf16.mxu0 %vm1159_vm2, %v1157_v0  ;;  %1111 = vmatprep.mubr.msk.bf16.mxu1 %vm1159_vm2, %v1157_v0 }
  0x61   :  { %1056 = vmatmul.mubr.msk.bf16.gmra.mrb[44].mxu0 %vm222_vm3, %v1143_v29  ;;  %1112 = vmatmul.mubr.msk.bf16.gmra.mrb[44].mxu1 %vm222_vm3, %v1153_v30 }
  0x62   :  { %1059 = vmatprep.mubr.msk.bf16.mxu0 %vm1159_vm2, %v1157_v0  ;;  %1115 = vmatprep.mubr.msk.bf16.mxu1 %vm1159_vm2, %v1157_v0 }
  0x69   :  { %1060 = vmatmul.mubr.msk.bf16.gmra.mrb[48].mxu0 %vm222_vm3, %v1145_v31  ;;  %1116 = vmatmul.mubr.msk.bf16.gmra.mrb[48].mxu1 %vm222_vm3, %v1154_v32 }
  0x6a   :  { %1063 = vmatprep.mubr.msk.bf16.mxu0 %vm1159_vm2, %v1157_v0 }
  0x71   :  { %1064 = vmatmul.mubr.msk.bf16.gmra.mrb[52].mxu0 %vm222_vm3, %v1147_v33 }
  0xdc   :  { %v1357_v34 = vpop.f32.mrb[0].mxu0  ;;  %v1367_v41 = vpop.f32.mrb[0].mxu1 }
  0xdd   :  { %v1013_v35 = vpop.f32.mrb[1].mxu0  ;;  %v619_v37 = vmul.f32 %v1357_v34, %v1357_v34  ;;  %v1069_v43 = vpop.f32.mrb[1].mxu1 }
  0xde   :  { %v1359_v36 = vpop.f32.mrb[2].mxu0  ;;  %v1369_v44 = vpop.f32.mrb[2].mxu1 }
  0xdf   :  { %v560_v38 = vadd.f32 %v1359_v36, %v1357_v34  ;;  %v620_v39 = vmul.f32 %v1359_v36, %v1359_v36  ;;  %v1014_v40 = vpop.f32.mrb[3].mxu0  ;;  %v1070_v45 = vpop.f32.mrb[3].mxu1 }
  0xe1   :  { %v673_v42 = vadd.f32 %v620_v39, %v619_v37 }
  0xe4   :  { %v1371_v46 = vpop.f32.mrb[4].mxu0  ;;  %v1381_v55 = vpop.f32.mrb[4].mxu1 }
  0xe5   :  { %v561_v47 = vadd.f32 %v560_v38, %v1371_v46  ;;  %v621_v48 = vmul.f32 %v1371_v46, %v1371_v46  ;;  %v1017_v49 = vpop.f32.mrb[5].mxu0  ;;  %v1073_v57 = vpop.f32.mrb[5].mxu1 }
  0xe6   :  { %v1376_v50 = vpop.f32.mrb[6].mxu0  ;;  %v1383_v58 = vpop.f32.mrb[6].mxu1 }
  0xe7   :  { %v674_v51 = vadd.f32 %v673_v42, %v621_v48  ;;  %v562_v52 = vadd.f32 %v561_v47, %v1376_v50  ;;  %v622_v53 = vmul.f32 %v1376_v50, %v1376_v50  ;;  %v1018_v54 = vpop.f32.mrb[7].mxu0  ;;  %v1074_v59 = vpop.f32.mrb[7].mxu1 }
  0xe9   :  { %v675_v56 = vadd.f32 %v674_v51, %v622_v53 }
  0xec   :  { %v1385_v60 = vpop.f32.mrb[8].mxu0  ;;  %v1395_v5 = vpop.f32.mrb[8].mxu1 }
  0xed   :  { %v563_v61 = vadd.f32 %v562_v52, %v1385_v60  ;;  %v623_v62 = vmul.f32 %v1385_v60, %v1385_v60  ;;  %v1021_v63 = vpop.f32.mrb[9].mxu0  ;;  %v1077_v7 = vpop.f32.mrb[9].mxu1 }
  0xee   :  { %v1390_v0 = vpop.f32.mrb[10].mxu0  ;;  %v1397_v8 = vpop.f32.mrb[10].mxu1 }
  0xef   :  { %v676_v1 = vadd.f32 %v675_v56, %v623_v62  ;;  %v564_v2 = vadd.f32 %v563_v61, %v1390_v0  ;;  %v624_v3 = vmul.f32 %v1390_v0, %v1390_v0  ;;  %v1022_v4 = vpop.f32.mrb[11].mxu0  ;;  %v1078_v9 = vpop.f32.mrb[11].mxu1 }
  0xf1   :  { %v677_v6 = vadd.f32 %v676_v1, %v624_v3 }
  0xf4   :  { %v1399_v10 = vpop.f32.mrb[12].mxu0  ;;  %v1409_v19 = vpop.f32.mrb[12].mxu1 }
  0xf5   :  { %v565_v11 = vadd.f32 %v564_v2, %v1399_v10  ;;  %v625_v12 = vmul.f32 %v1399_v10, %v1399_v10  ;;  %v1025_v13 = vpop.f32.mrb[13].mxu0  ;;  %v1081_v21 = vpop.f32.mrb[13].mxu1 }
  0xf6   :  { %v1404_v14 = vpop.f32.mrb[14].mxu0  ;;  %v1411_v22 = vpop.f32.mrb[14].mxu1 }
  0xf7   :  { %v678_v15 = vadd.f32 %v677_v6, %v625_v12  ;;  %v566_v16 = vadd.f32 %v565_v11, %v1404_v14  ;;  %v626_v17 = vmul.f32 %v1404_v14, %v1404_v14  ;;  %v1026_v18 = vpop.f32.mrb[15].mxu0  ;;  %v1082_v23 = vpop.f32.mrb[15].mxu1 }
  0xf9   :  { %v679_v20 = vadd.f32 %v678_v15, %v626_v17 }
  0xfc   :  { %v1413_v24 = vpop.f32.mrb[16].mxu0  ;;  %v1423_v33 = vpop.f32.mrb[16].mxu1 }
  0xfd   :  { %v567_v25 = vadd.f32 %v566_v16, %v1413_v24  ;;  %v627_v26 = vmul.f32 %v1413_v24, %v1413_v24  ;;  %v1029_v27 = vpop.f32.mrb[17].mxu0  ;;  %v1085_v37 = vpop.f32.mrb[17].mxu1 }
  0xfe   :  { %v1418_v28 = vpop.f32.mrb[18].mxu0  ;;  %v1425_v38 = vpop.f32.mrb[18].mxu1 }
  0xff   :  { %v680_v29 = vadd.f32 %v679_v20, %v627_v26  ;;  %v568_v30 = vadd.f32 %v567_v25, %v1418_v28  ;;  %v628_v31 = vmul.f32 %v1418_v28, %v1418_v28  ;;  %v1030_v32 = vpop.f32.mrb[19].mxu0  ;;  %v1086_v39 = vpop.f32.mrb[19].mxu1 }
 0x101   :  { %v681_v35 = vadd.f32 %v680_v29, %v628_v31 }
 0x104   :  { %v1427_v40 = vpop.f32.mrb[20].mxu0  ;;  %v1437_v53 = vpop.f32.mrb[20].mxu1 }
 0x105   :  { %v569_v42 = vadd.f32 %v568_v30, %v1427_v40  ;;  %v629_v43 = vmul.f32 %v1427_v40, %v1427_v40  ;;  %v1033_v45 = vpop.f32.mrb[21].mxu0  ;;  %v1089_v56 = vpop.f32.mrb[21].mxu1 }
 0x106   :  { %v1432_v47 = vpop.f32.mrb[22].mxu0  ;;  %v1439_v57 = vpop.f32.mrb[22].mxu1 }
 0x107   :  { %v682_v48 = vadd.f32 %v681_v35, %v629_v43  ;;  %v570_v49 = vadd.f32 %v569_v42, %v1432_v47  ;;  %v630_v51 = vmul.f32 %v1432_v47, %v1432_v47  ;;  %v1034_v52 = vpop.f32.mrb[23].mxu0  ;;  %v1090_v59 = vpop.f32.mrb[23].mxu1 }
 0x109   :  { %v683_v54 = vadd.f32 %v682_v48, %v630_v51 }
 0x10c   :  { %v1441_v61 = vpop.f32.mrb[24].mxu0  ;;  %v1451_v9 = vpop.f32.mrb[24].mxu1 }
 0x10d   :  { %v571_v62 = vadd.f32 %v570_v49, %v1441_v61  ;;  %v631_v63 = vmul.f32 %v1441_v61, %v1441_v61  ;;  %v1037_v1 = vpop.f32.mrb[25].mxu0  ;;  %v1093_v12 = vpop.f32.mrb[25].mxu1 }
 0x10e   :  { %v1446_v2 = vpop.f32.mrb[26].mxu0  ;;  %v1453_v13 = vpop.f32.mrb[26].mxu1 }
 0x10f   :  { %v684_v3 = vadd.f32 %v683_v54, %v631_v63  ;;  %v572_v4 = vadd.f32 %v571_v62, %v1446_v2  ;;  %v632_v6 = vmul.f32 %v1446_v2, %v1446_v2  ;;  %v1038_v7 = vpop.f32.mrb[27].mxu0  ;;  %v1094_v15 = vpop.f32.mrb[27].mxu1 }
 0x111   :  { %v685_v11 = vadd.f32 %v684_v3, %v632_v6 }
 0x114   :  { %v1455_v16 = vpop.f32.mrb[28].mxu0  ;;  %v1465_v29 = vpop.f32.mrb[28].mxu1 }
 0x115   :  { %v573_v17 = vadd.f32 %v572_v4, %v1455_v16  ;;  %v633_v18 = vmul.f32 %v1455_v16, %v1455_v16  ;;  %v1041_v20 = vpop.f32.mrb[29].mxu0  ;;  %v1097_v31 = vpop.f32.mrb[29].mxu1 }
 0x116   :  { %v1460_v21 = vpop.f32.mrb[30].mxu0  ;;  %v1467_v32 = vpop.f32.mrb[30].mxu1 }
 0x117   :  { %v686_v23 = vadd.f32 %v685_v11, %v633_v18  ;;  %v574_v25 = vadd.f32 %v573_v17, %v1460_v21  ;;  %v634_v26 = vmul.f32 %v1460_v21, %v1460_v21  ;;  %v1042_v27 = vpop.f32.mrb[31].mxu0  ;;  %v1098_v35 = vpop.f32.mrb[31].mxu1 }
 0x119   :  { %v687_v30 = vadd.f32 %v686_v23, %v634_v26 }
 0x11c   :  { %v1469_v37 = vpop.f32.mrb[32].mxu0  ;;  %v1479_v54 = vpop.f32.mrb[32].mxu1 }
 0x11d   :  { %v575_v39 = vadd.f32 %v574_v25, %v1469_v37  ;;  %v635_v42 = vmul.f32 %v1469_v37, %v1469_v37  ;;  %v1045_v43 = vpop.f32.mrb[33].mxu0  ;;  %v1101_v59 = vpop.f32.mrb[33].mxu1 }
 0x11e   :  { %v1474_v45 = vpop.f32.mrb[34].mxu0  ;;  %v1481_v62 = vpop.f32.mrb[34].mxu1 }
 0x11f   :  { %v688_v48 = vadd.f32 %v687_v30, %v635_v42  ;;  %v576_v49 = vadd.f32 %v575_v39, %v1474_v45  ;;  %v636_v51 = vmul.f32 %v1474_v45, %v1474_v45  ;;  %v1046_v52 = vpop.f32.mrb[35].mxu0  ;;  %v1102_v63 = vpop.f32.mrb[35].mxu1 }
 0x121   :  { %v689_v56 = vadd.f32 %v688_v48, %v636_v51 }
 0x124   :  { %v1483_v1 = vpop.f32.mrb[36].mxu0  ;;  %v1493_v18 = vpop.f32.mrb[36].mxu1 }
 0x125   :  { %v577_v3 = vadd.f32 %v576_v49, %v1483_v1  ;;  %v637_v4 = vmul.f32 %v1483_v1, %v1483_v1  ;;  %v1049_v6 = vpop.f32.mrb[37].mxu0  ;;  %2040 = vst [vmem:[#allocation2_spill] sm:$0xff] %v1493_v18  ;;  %v1105_v23 = vpop.f32.mrb[37].mxu1 }
 0x126   :  { %v1488_v7 = vpop.f32.mrb[38].mxu0  ;;  %v1495_v25 = vpop.f32.mrb[38].mxu1 }
 0x127   :  { %v690_v11 = vadd.f32 %v689_v56, %v637_v4  ;;  %v578_v12 = vadd.f32 %v577_v3, %v1488_v7  ;;  %v638_v15 = vmul.f32 %v1488_v7, %v1488_v7  ;;  %v1050_v17 = vpop.f32.mrb[39].mxu0  ;;  %2041 = vst [vmem:[#allocation3_spill] sm:$0xff] %v1495_v25  ;;  %v1106_v26 = vpop.f32.mrb[39].mxu1 }
 0x129   :  { %v691_v20 = vadd.f32 %v690_v11, %v638_v15 }
 0x12c   :  { %v1497_v27 = vpop.f32.mrb[40].mxu0  ;;  %v1507_v51 = vpop.f32.mrb[40].mxu1 }
 0x12d   :  { %v579_v30 = vadd.f32 %v578_v12, %v1497_v27  ;;  %v639_v31 = vmul.f32 %v1497_v27, %v1497_v27  ;;  %v1053_v35 = vpop.f32.mrb[41].mxu0  ;;  %2042 = vst [vmem:[#allocation4_spill] sm:$0xff] %v1507_v51  ;;  %v1109_v56 = vpop.f32.mrb[41].mxu1 }
 0x12e   :  { %v1502_v39 = vpop.f32.mrb[42].mxu0  ;;  %v1509_v59 = vpop.f32.mrb[42].mxu1 }
 0x12f   :  { %v692_v42 = vadd.f32 %v691_v20, %v639_v31  ;;  %v580_v43 = vadd.f32 %v579_v30, %v1502_v39  ;;  %v640_v48 = vmul.f32 %v1502_v39, %v1502_v39  ;;  %v1054_v49 = vpop.f32.mrb[43].mxu0  ;;  %2043 = vst [vmem:[#allocation5_spill] sm:$0xff] %v1509_v59  ;;  %v1110_v63 = vpop.f32.mrb[43].mxu1 }
 0x131   :  { %v693_v52 = vadd.f32 %v692_v42, %v640_v48 }
 0x134   :  { %v1511_v3 = vpop.f32.mrb[44].mxu0  ;;  %v1521_v26 = vpop.f32.mrb[44].mxu1 }
 0x135   :  { %v581_v4 = vadd.f32 %v580_v43, %v1511_v3  ;;  %v641_v6 = vmul.f32 %v1511_v3, %v1511_v3  ;;  %v1057_v11 = vpop.f32.mrb[45].mxu0  ;;  %2045 = vst [vmem:[#allocation7_spill] sm:$0xff] %v1521_v26  ;;  %v1113_v31 = vpop.f32.mrb[45].mxu1 }
 0x136   :  { %v1516_v12 = vpop.f32.mrb[46].mxu0  ;;  %v1523_v35 = vpop.f32.mrb[46].mxu1 }
 0x137   :  { %2044 = vst [vmem:[#allocation6_spill] sm:$0xff] %v1516_v12  ;;  %v694_v15 = vadd.f32 %v693_v52, %v641_v6  ;;  %v582_v17 = vadd.f32 %v581_v4, %v1516_v12  ;;  %v642_v20 = vmul.f32 %v1516_v12, %v1516_v12  ;;  %v1058_v23 = vpop.f32.mrb[47].mxu0  ;;  %2046 = vst [vmem:[#allocation8_spill] sm:$0xff] %v1523_v35  ;;  %v1114_v42 = vpop.f32.mrb[47].mxu1 }
 0x139   :  { %v695_v30 = vadd.f32 %v694_v15, %v642_v20 }
 0x13c   :  { %v1525_v43 = vpop.f32.mrb[48].mxu0  ;;  %v1535_v15 = vpop.f32.mrb[48].mxu1 }
 0x13d   :  { %2047 = vst [vmem:[#allocation9_spill] sm:$0xff] %v1525_v43  ;;  %v583_v48 = vadd.f32 %v582_v17, %v1525_v43  ;;  %v643_v49 = vmul.f32 %v1525_v43, %v1525_v43  ;;  %v1061_v52 = vpop.f32.mrb[49].mxu0  ;;  %2049 = vst [vmem:[#allocation11_spill] sm:$0xff] %v1535_v15  ;;  %v1117_v23 = vpop.f32.mrb[49].mxu1 }
 0x13e   :  { %v1530_v56 = vpop.f32.mrb[50].mxu0  ;;  %v1537_v31 = vpop.f32.mrb[50].mxu1  ;;  %v647_v23 = vmul.f32 %v1367_v41, %v1367_v41 }
 0x13f   :  { %2048 = vst [vmem:[#allocation10_spill] sm:$0xff] %v1530_v56  ;;  %v696_v63 = vadd.f32 %v695_v30, %v643_v49  ;;  %v584_v4 = vadd.f32 %v583_v48, %v1530_v56  ;;  %v644_v6 = vmul.f32 %v1530_v56, %v1530_v56  ;;  %v1062_v11 = vpop.f32.mrb[51].mxu0  ;;  %2050 = vst [vmem:[#allocation12_spill] sm:$0xff] %v1537_v31  ;;  %v1118_v17 = vpop.f32.mrb[51].mxu1 }
 0x141   :  { %v697_v20 = vadd.f32 %v696_v63, %v644_v6 }
 0x144   :  { %v1539_v42 = vpop.f32.mrb[52].mxu0 }
 0x145   :  { %2051 = vst [vmem:[#allocation13_spill] sm:$0xff] %v1539_v42  ;;  %v585_v52 = vadd.f32 %v584_v4, %v1539_v42  ;;  %v645_v30 = vmul.f32 %v1539_v42, %v1539_v42  ;;  %v1065_v49 = vpop.f32.mrb[53].mxu0  ;;  %v648_v4 = vmul.f32 %v1369_v44, %v1369_v44 }
 0x146   :  { %v1544_v48 = vpop.f32.mrb[54].mxu0 }
 0x147   :  { %2052 = vst [vmem:[#allocation14_spill] sm:$0xff] %v1544_v48  ;;  %v698_v43 = vadd.f32 %v697_v20, %v645_v30  ;;  %v586_v11 = vadd.f32 %v585_v52, %v1544_v48  ;;  %v646_v63 = vmul.f32 %v1544_v48, %v1544_v48  ;;  %v1066_v6 = vpop.f32.mrb[55].mxu0  ;;  %v649_v20 = vmul.f32 %v1381_v55, %v1381_v55 }
 0x148   :  { %v650_v6 = vmul.f32 %v1383_v58, %v1383_v58 }
 0x149   :  { %v587_v17 = vadd.f32 %v586_v11, %v1367_v41  ;;  %v699_v56 = vadd.f32 %v698_v43, %v646_v63  ;;  %v651_v43 = vmul.f32 %v1395_v5, %v1395_v5 }
 0x14b   :  { %v588_v49 = vadd.f32 %v587_v17, %v1369_v44  ;;  %v700_v42 = vadd.f32 %v699_v56, %v647_v23  ;;  %v652_v56 = vmul.f32 %v1397_v8, %v1397_v8 }
 0x14d   :  { %v589_v52 = vadd.f32 %v588_v49, %v1381_v55  ;;  %v701_v30 = vadd.f32 %v700_v42, %v648_v4  ;;  %v653_v42 = vmul.f32 %v1409_v19, %v1409_v19 }
 0x14f   :  { %v590_v48 = vadd.f32 %v589_v52, %v1383_v58  ;;  %v702_v12 = vadd.f32 %v701_v30, %v649_v20  ;;  %v654_v20 = vmul.f32 %v1411_v22, %v1411_v22 }
 0x151   :  { %v591_v11 = vadd.f32 %v590_v48, %v1395_v5  ;;  %v703_v63 = vadd.f32 %v702_v12, %v650_v6  ;;  %v655_v12 = vmul.f32 %v1423_v33, %v1423_v33 }
 0x153   :  { %v592_v23 = vadd.f32 %v591_v11, %v1397_v8  ;;  %v704_v17 = vadd.f32 %v703_v63, %v651_v43  ;;  %v656_v43 = vmul.f32 %v1425_v38, %v1425_v38 }
 0x155   :  { %v705_v4 = vadd.f32 %v704_v17, %v652_v56  ;;  %v593_v49 = vadd.f32 %v592_v23, %v1409_v19  ;;  %v657_v56 = vmul.f32 %v1437_v53, %v1437_v53 }
 0x157   :  { %v594_v52 = vadd.f32 %v593_v49, %v1411_v22  ;;  %v706_v30 = vadd.f32 %v705_v4, %v653_v42  ;;  %v658_v42 = vmul.f32 %v1439_v57, %v1439_v57 }
 0x159   :  { %v595_v48 = vadd.f32 %v594_v52, %v1423_v33  ;;  %v707_v6 = vadd.f32 %v706_v30, %v654_v20  ;;  %v659_v20 = vmul.f32 %v1451_v9, %v1451_v9 }
 0x15b   :  { %v596_v11 = vadd.f32 %v595_v48, %v1425_v38  ;;  %v708_v63 = vadd.f32 %v707_v6, %v655_v12  ;;  %v660_v48 = vmul.f32 %v1453_v13, %v1453_v13 }
 0x15d   :  { %v597_v23 = vadd.f32 %v596_v11, %v1437_v53  ;;  %v709_v17 = vadd.f32 %v708_v63, %v656_v43  ;;  %v661_v63 = vmul.f32 %v1465_v29, %v1465_v29 }
 0x15f   :  { %v598_v4 = vadd.f32 %v597_v23, %v1439_v57  ;;  %v710_v49 = vadd.f32 %v709_v17, %v657_v56  ;;  %v662_v17 = vmul.f32 %v1467_v32, %v1467_v32 }
 0x161   :  { %v599_v52 = vadd.f32 %v598_v4, %v1451_v9  ;;  %v711_v30 = vadd.f32 %v710_v49, %v658_v42  ;;  %v663_v49 = vmul.f32 %v1479_v54, %v1479_v54 }
 0x163   :  { %v600_v12 = vadd.f32 %v599_v52, %v1453_v13  ;;  %v712_v6 = vadd.f32 %v711_v30, %v659_v20  ;;  %v664_v30 = vmul.f32 %v1481_v62, %v1481_v62 }
 0x165   :  { %v713_v11 = vadd.f32 %v712_v6, %v660_v48  ;;  %v601_v43 = vadd.f32 %v600_v12, %v1465_v29  ;;  %v665_v6 = vmul.f32 %v1493_v18, %v1493_v18 }
 0x167   :  { %v714_v23 = vadd.f32 %v713_v11, %v661_v63  ;;  %v602_v56 = vadd.f32 %v601_v43, %v1467_v32  ;;  %v666_v63 = vmul.f32 %v1495_v25, %v1495_v25 }
 0x169   :  { %v715_v4 = vadd.f32 %v714_v23, %v662_v17  ;;  %v603_v42 = vadd.f32 %v602_v56, %v1479_v54  ;;  %v667_v17 = vmul.f32 %v1507_v51, %v1507_v51 }
 0x16b   :  { %v716_v52 = vadd.f32 %v715_v4, %v663_v49  ;;  %v604_v20 = vadd.f32 %v603_v42, %v1481_v62  ;;  %v668_v49 = vmul.f32 %v1509_v59, %v1509_v59 }
 0x16d   :  { %v717_v12 = vadd.f32 %v716_v52, %v664_v30  ;;  %v605_v48 = vadd.f32 %v604_v20, %v1493_v18  ;;  %v669_v30 = vmul.f32 %v1521_v26, %v1521_v26 }
 0x16f   :  { %v718_v11 = vadd.f32 %v717_v12, %v665_v6  ;;  %v606_v43 = vadd.f32 %v605_v48, %v1495_v25  ;;  %v670_v6 = vmul.f32 %v1523_v35, %v1523_v35 }
 0x171   :  { %v719_v23 = vadd.f32 %v718_v11, %v666_v63  ;;  %v607_v56 = vadd.f32 %v606_v43, %v1507_v51  ;;  %v671_v11 = vmul.f32 %v1535_v15, %v1535_v15 }
 0x173   :  { %v720_v4 = vadd.f32 %v719_v23, %v667_v17  ;;  %v608_v42 = vadd.f32 %v607_v56, %v1509_v59  ;;  %v672_v17 = vmul.f32 %v1537_v31, %v1537_v31 }
 0x175   :  { %v721_v52 = vadd.f32 %v720_v4, %v668_v49  ;;  %v609_v20 = vadd.f32 %v608_v42, %v1521_v26 }
 0x177   :  { %v722_v12 = vadd.f32 %v721_v52, %v669_v30  ;;  %v610_v48 = vadd.f32 %v609_v20, %v1523_v35 }
 0x179   :  { %v723_v43 = vadd.f32 %v722_v12, %v670_v6  ;;  %v611_v63 = vadd.f32 %v610_v48, %v1535_v15 }
 0x17b   :  { %v724_v23 = vadd.f32 %v723_v43, %v671_v11  ;;  %v612_v56 = vadd.f32 %v611_v63, %v1537_v31  ;;  %v745_v31 = vlaneseq }
 0x17d   :  { %v613_v4 = vrot.slane %v612_v56, 4  ;;  %v725_v42 = vadd.f32 %v724_v23, %v672_v17  ;;  %v1627_v23 = vshrl.u32 %v745_v31, 7 }
 0x17f   :  { %v614_v49 = vadd.f32 %v613_v4, %v612_v56  ;;  %v726_v52 = vrot.slane %v725_v42, 4  ;;  %v737_v56 = vld [vmem:[%s2024_s2] sm:$0x1]  ;;  %v747_v17 = vsub.s32 0, %v1627_v23 }
 0x181   :  { %v615_v20 = vrot.slane %v614_v49, 2  ;;  %v727_v30 = vadd.f32 %v726_v52, %v725_v42 }
 0x183   :  { %v616_v26 = vadd.f32 %v615_v20, %v614_v49  ;;  %v728_v35 = vrot.slane %v727_v30, 2 }
 0x185   :  { %v617_v59 = vrot.slane %v616_v26, 1  ;;  %v729_v51 = vadd.f32 %v728_v35, %v727_v30 }
 0x187   :  { %v618_v25 = vadd.f32 %v617_v59, %v616_v26  ;;  %v730_v12 = vrot.slane %v729_v51, 1 }
 0x189   :  { %v731_v6 = vadd.f32 %v730_v12, %v729_v51  ;;  %v732_v48 = vmul.f32 0.0023148148, %v618_v25  ;;  %v741_v25 = vld [vmem:[%s2025_s3] sm:$0x1] }
 0x18b   :  { %v733_v11 = vmul.f32 0.0023148148, %v731_v6  ;;  %v734_v43 = vmul.f32 %v732_v48, %v732_v48 }
 0x18d   :  { %v735_v63 = vsub.f32 %v733_v11, %v734_v43 }
 0x18f   :  { %v736_v15 = vmax.f32 %v735_v63, 0.0 }
 0x191   :  { %v738_v18 = vadd.f32 1e-05, %v736_v15 }
 0x193   :  { %1155 = vrsqrt.f32 %v738_v18 }
 0x19d   :  { %v1156_v35 = vpop.eup %1155 }
 0x19e   :  { %v740_v59 = vmul.f32 %v1156_v35, %v737_v56 }
 0x1a0   :  { %v742_v51 = vmul.f32 %v740_v59, %v732_v48  ;;  %v748_v26 = vrot.slane %v740_v59, %v747_v17 }
 0x1a2   :  { %v743_v4 = vsub.f32 %v741_v25, %v742_v51  ;;  %v750_v18 = vmul.f32 %v748_v26, %v1357_v34  ;;  %v751_v15 = vmul.f32 %v748_v26, %v1359_v36  ;;  %v752_v31 = vmul.f32 %v748_v26, %v1371_v46 }
 0x1a3   :  { %v753_v42 = vmul.f32 %v748_v26, %v1376_v50  ;;  %v754_v49 = vmul.f32 %v748_v26, %v1385_v60  ;;  %v755_v52 = vmul.f32 %v748_v26, %v1390_v0  ;;  %v756_v20 = vmul.f32 %v748_v26, %v1399_v10 }
 0x1a4   :  { %v757_v30 = vmul.f32 %v748_v26, %v1404_v14  ;;  %v758_v12 = vmul.f32 %v748_v26, %v1413_v24  ;;  %v759_v6 = vmul.f32 %v748_v26, %v1418_v28  ;;  %v760_v34 = vmul.f32 %v748_v26, %v1427_v40 }
 0x1a5   :  { %v761_v36 = vmul.f32 %v748_v26, %v1432_v47  ;;  %v762_v46 = vmul.f32 %v748_v26, %v1441_v61  ;;  %v763_v50 = vmul.f32 %v748_v26, %v1446_v2  ;;  %v764_v60 = vmul.f32 %v748_v26, %v1455_v16  ;;  %v2053_v2 = vld [vmem:[#allocation6_spill] sm:$0xff] }
 0x1a6   :  { %v765_v0 = vmul.f32 %v748_v26, %v1460_v21  ;;  %v1653_v10 = vmul.f32 %v748_v26, %v1469_v37  ;;  %v1656_v14 = vmul.f32 %v748_v26, %v1474_v45  ;;  %v1659_v24 = vmul.f32 %v748_v26, %v1483_v1  ;;  %v2054_v21 = vld [vmem:[#allocation9_spill] sm:$0xff]  ;;  %v2055_v45 = vld [vmem:[#allocation10_spill] sm:$0xff] }
 0x1a7   :  { %v1662_v28 = vmul.f32 %v748_v26, %v1488_v7  ;;  %v1665_v40 = vmul.f32 %v748_v26, %v1497_v27  ;;  %v1668_v47 = vmul.f32 %v748_v26, %v1502_v39  ;;  %v1671_v61 = vmul.f32 %v748_v26, %v1511_v3  ;;  %v2056_v7 = vld [vmem:[#allocation13_spill] sm:$0xff]  ;;  %v2057_v27 = vld [vmem:[#allocation14_spill] sm:$0xff] }
 0x1a8   :  { %v1674_v16 = vmul.f32 %v748_v26, %v2053_v2  ;;  %v1677_v37 = vmul.f32 %v748_v26, %v2054_v21  ;;  %v1680_v1 = vmul.f32 %v748_v26, %v2055_v45  ;;  %v1683_v48 = vmul.f32 %v748_v26, %v2056_v7 }
 0x1a9   :  { %v1686_v11 = vmul.f32 %v748_v26, %v2057_v27  ;;  %v1689_v39 = vmul.f32 %v748_v26, %v1367_v41  ;;  %v1692_v3 = vmul.f32 %v748_v26, %v1369_v44  ;;  %v1695_v43 = vmul.f32 %v748_v26, %v1381_v55  ;;  %v2068_v27 = vld [vmem:[#allocation12_spill] sm:$0xff] }
 0x1aa   :  { %v1698_v63 = vmul.f32 %v748_v26, %v1383_v58  ;;  %v1701_v23 = vmul.f32 %v748_v26, %v1395_v5  ;;  %v1704_v56 = vmul.f32 %v748_v26, %v1397_v8  ;;  %v1707_v35 = vmul.f32 %v748_v26, %v1409_v19 }
 0x1ab   :  { %v1710_v41 = vmul.f32 %v748_v26, %v1411_v22  ;;  %v1713_v44 = vmul.f32 %v748_v26, %v1423_v33  ;;  %v1716_v55 = vmul.f32 %v748_v26, %v1425_v38  ;;  %v1719_v58 = vmul.f32 %v748_v26, %v1437_v53 }
 0x1ac   :  { %v1722_v5 = vmul.f32 %v748_v26, %v1439_v57  ;;  %v1725_v8 = vmul.f32 %v748_v26, %v1451_v9  ;;  %v1728_v19 = vmul.f32 %v748_v26, %v1453_v13  ;;  %v1731_v22 = vmul.f32 %v748_v26, %v1465_v29  ;;  %v2058_v57 = vld [vmem:[#allocation2_spill] sm:$0xff]  ;;  %v2059_v9 = vld [vmem:[#allocation3_spill] sm:$0xff]  ;;  %v2060_v13 = vld [vmem:[#allocation4_spill] sm:$0xff] }
 0x1ad   :  { %v1734_v33 = vmul.f32 %v748_v26, %v1467_v32  ;;  %v1737_v38 = vmul.f32 %v748_v26, %v1479_v54  ;;  %v1740_v53 = vmul.f32 %v748_v26, %v1481_v62  ;;  %v1743_v59 = vmul.f32 %v748_v26, %v2058_v57  ;;  %v2062_v29 = vld [vmem:[#allocation5_spill] sm:$0xff]  ;;  %v2063_v32 = vld [vmem:[#allocation7_spill] sm:$0xff]  ;;  %v2065_v54 = vld [vmem:[#allocation8_spill] sm:$0xff] }
 0x1ae   :  { %v1746_v25 = vmul.f32 %v748_v26, %v2059_v9  ;;  %v1749_v51 = vmul.f32 %v748_v26, %v2060_v13  ;;  %v1752_v2 = vmul.f32 %v748_v26, %v2062_v29  ;;  %v1755_v21 = vmul.f32 %v748_v26, %v2063_v32  ;;  %v2066_v62 = vld [vmem:[#allocation11_spill] sm:$0xff] }
 0x1af   :  { %v1758_v45 = vmul.f32 %v748_v26, %v2065_v54  ;;  %v1761_v7 = vmul.f32 %v748_v26, %v2066_v62  ;;  %v1764_v57 = vmul.f32 %v748_v26, %v2068_v27  ;;  %v1766_v9 = vrot.slane %v743_v4, %v747_v17 }
 0x1b0   :  { %2061 = vst [vmem:[#allocation6_spill] sm:$0xff] %v1749_v51  ;;  %2064 = vst [vmem:[#allocation9_spill] sm:$0xff] %v1755_v21 }
 0x1b1   :  { %2067 = vst [vmem:[#allocation10_spill] sm:$0xff] %v1761_v7  ;;  %v810_v13 = vadd.f32 %v1766_v9, %v750_v18  ;;  %v811_v51 = vadd.f32 %v1766_v9, %v751_v15  ;;  %v812_v29 = vadd.f32 %v1766_v9, %v752_v31  ;;  %v813_v32 = vadd.f32 %v1766_v9, %v753_v42 }
 0x1b2   :  { %v814_v21 = vadd.f32 %v1766_v9, %v754_v49  ;;  %v815_v54 = vadd.f32 %v1766_v9, %v755_v52  ;;  %v816_v62 = vadd.f32 %v1766_v9, %v756_v20  ;;  %v817_v7 = vadd.f32 %v1766_v9, %v757_v30 }
 0x1b3   :  { %v818_v26 = vadd.f32 %v1766_v9, %v758_v12  ;;  %v819_v17 = vadd.f32 %v1766_v9, %v759_v6  ;;  %v820_v4 = vadd.f32 %v1766_v9, %v760_v34  ;;  %v821_v18 = vadd.f32 %v1766_v9, %v761_v36  ;;  %864 = vst [vmem:[%s2026_s4] sm:$0xff] %v810_v13 }
 0x1b4   :  { %865 = vst [vmem:[%s2026_s4 + $0x8] sm:$0xff] %v811_v51  ;;  %866 = vst [vmem:[%s2026_s4 + $0x10] sm:$0xff] %v812_v29  ;;  %v822_v15 = vadd.f32 %v1766_v9, %v762_v46  ;;  %v823_v31 = vadd.f32 %v1766_v9, %v763_v50  ;;  %v824_v42 = vadd.f32 %v1766_v9, %v764_v60 }
 0x1b5   :  { %867 = vst [vmem:[%s2026_s4 + $0x18] sm:$0xff] %v813_v32  ;;  %v825_v49 = vadd.f32 %v1766_v9, %v765_v0  ;;  %868 = vst [vmem:[%s2026_s4 + $0x20] sm:$0xff] %v814_v21  ;;  %v826_v52 = vadd.f32 %v1766_v9, %v1653_v10  ;;  %v827_v20 = vadd.f32 %v1766_v9, %v1656_v14 }
 0x1b6   :  { %869 = vst [vmem:[%s2026_s4 + $0x28] sm:$0xff] %v815_v54  ;;  %870 = vst [vmem:[%s2026_s4 + $0x30] sm:$0xff] %v816_v62  ;;  %v828_v30 = vadd.f32 %v1766_v9, %v1659_v24  ;;  %v829_v12 = vadd.f32 %v1766_v9, %v1662_v28  ;;  %v830_v6 = vadd.f32 %v1766_v9, %v1665_v40 }
 0x1b7   :  { %871 = vst [vmem:[%s2026_s4 + $0x38] sm:$0xff] %v817_v7  ;;  %872 = vst [vmem:[%s2026_s4 + $0x40] sm:$0xff] %v818_v26  ;;  %v831_v34 = vadd.f32 %v1766_v9, %v1668_v47  ;;  %v832_v36 = vadd.f32 %v1766_v9, %v1671_v61  ;;  %v833_v46 = vadd.f32 %v1766_v9, %v1674_v16 }
 0x1b8   :  { %873 = vst [vmem:[%s2026_s4 + $0x48] sm:$0xff] %v819_v17  ;;  %874 = vst [vmem:[%s2026_s4 + $0x50] sm:$0xff] %v820_v4  ;;  %v834_v50 = vadd.f32 %v1766_v9, %v1677_v37  ;;  %v835_v60 = vadd.f32 %v1766_v9, %v1680_v1  ;;  %v836_v0 = vadd.f32 %v1766_v9, %v1683_v48 }
 0x1b9   :  { %875 = vst [vmem:[%s2026_s4 + $0x58] sm:$0xff] %v821_v18  ;;  %876 = vst [vmem:[%s2026_s4 + $0x60] sm:$0xff] %v822_v15  ;;  %v837_v10 = vadd.f32 %v1766_v9, %v1686_v11  ;;  %v838_v14 = vadd.f32 %v1766_v9, %v1689_v39  ;;  %v839_v24 = vadd.f32 %v1766_v9, %v1692_v3 }
 0x1ba   :  { %877 = vst [vmem:[%s2026_s4 + $0x68] sm:$0xff] %v823_v31  ;;  %878 = vst [vmem:[%s2026_s4 + $0x70] sm:$0xff] %v824_v42  ;;  %v840_v28 = vadd.f32 %v1766_v9, %v1695_v43  ;;  %v841_v40 = vadd.f32 %v1766_v9, %v1698_v63  ;;  %v842_v47 = vadd.f32 %v1766_v9, %v1701_v23 }
 0x1bb   :  { %879 = vst [vmem:[%s2026_s4 + $0x78] sm:$0xff] %v825_v49  ;;  %880 = vst [vmem:[%s2026_s4 + $0x80] sm:$0xff] %v826_v52  ;;  %v843_v61 = vadd.f32 %v1766_v9, %v1704_v56  ;;  %v844_v16 = vadd.f32 %v1766_v9, %v1707_v35  ;;  %v845_v37 = vadd.f32 %v1766_v9, %v1710_v41 }
 0x1bc   :  { %881 = vst [vmem:[%s2026_s4 + $0x88] sm:$0xff] %v827_v20  ;;  %882 = vst [vmem:[%s2026_s4 + $0x90] sm:$0xff] %v828_v30  ;;  %v846_v1 = vadd.f32 %v1766_v9, %v1713_v44  ;;  %v847_v48 = vadd.f32 %v1766_v9, %v1716_v55  ;;  %v848_v11 = vadd.f32 %v1766_v9, %v1719_v58  ;;  %v2069_v55 = vld [vmem:[#allocation6_spill] sm:$0xff] }
 0x1bd   :  { %883 = vst [vmem:[%s2026_s4 + $0x98] sm:$0xff] %v829_v12  ;;  %884 = vst [vmem:[%s2026_s4 + $0xa0] sm:$0xff] %v830_v6  ;;  %v849_v39 = vadd.f32 %v1766_v9, %v1722_v5  ;;  %v850_v3 = vadd.f32 %v1766_v9, %v1725_v8  ;;  %v851_v43 = vadd.f32 %v1766_v9, %v1728_v19  ;;  %v2070_v8 = vld [vmem:[#allocation9_spill] sm:$0xff] }
 0x1be   :  { %885 = vst [vmem:[%s2026_s4 + $0xa8] sm:$0xff] %v831_v34  ;;  %886 = vst [vmem:[%s2026_s4 + $0xb0] sm:$0xff] %v832_v36  ;;  %v852_v63 = vadd.f32 %v1766_v9, %v1731_v22  ;;  %v853_v23 = vadd.f32 %v1766_v9, %v1734_v33  ;;  %v854_v56 = vadd.f32 %v1766_v9, %v1737_v38  ;;  %v2071_v33 = vld [vmem:[#allocation10_spill] sm:$0xff] }
 0x1bf   :  { %887 = vst [vmem:[%s2026_s4 + $0xb8] sm:$0xff] %v833_v46  ;;  %888 = vst [vmem:[%s2026_s4 + $0xc0] sm:$0xff] %v834_v50  ;;  %v855_v35 = vadd.f32 %v1766_v9, %v1740_v53  ;;  %v856_v41 = vadd.f32 %v1766_v9, %v1743_v59  ;;  %v857_v44 = vadd.f32 %v1766_v9, %v1746_v25 }
 0x1c0   :  { %889 = vst [vmem:[%s2026_s4 + $0xc8] sm:$0xff] %v835_v60  ;;  %890 = vst [vmem:[%s2026_s4 + $0xd0] sm:$0xff] %v836_v0  ;;  %v858_v58 = vadd.f32 %v1766_v9, %v2069_v55  ;;  %v859_v5 = vadd.f32 %v1766_v9, %v1752_v2  ;;  %v860_v19 = vadd.f32 %v1766_v9, %v2070_v8 }
 0x1c1   :  { %891 = vst [vmem:[%s2026_s4 + $0xd8] sm:$0xff] %v837_v10  ;;  %892 = vst [vmem:[%s2026_s4 + $0xe0] sm:$0xff] %v838_v14  ;;  %v861_v22 = vadd.f32 %v1766_v9, %v1758_v45  ;;  %v862_v38 = vadd.f32 %v1766_v9, %v2071_v33  ;;  %v863_v53 = vadd.f32 %v1766_v9, %v1764_v57 }
 0x1c2   :  { %893 = vst [vmem:[%s2026_s4 + $0xe8] sm:$0xff] %v839_v24  ;;  %894 = vst [vmem:[%s2026_s4 + $0xf0] sm:$0xff] %v840_v28 }
 0x1c3   :  { %895 = vst [vmem:[%s2026_s4 + $0xf8] sm:$0xff] %v841_v40  ;;  %896 = vst [vmem:[%s2026_s4 + $0x100] sm:$0xff] %v842_v47 }
 0x1c4   :  { %897 = vst [vmem:[%s2026_s4 + $0x108] sm:$0xff] %v843_v61  ;;  %898 = vst [vmem:[%s2026_s4 + $0x110] sm:$0xff] %v844_v16 }
 0x1c5   :  { %899 = vst [vmem:[%s2026_s4 + $0x118] sm:$0xff] %v845_v37  ;;  %900 = vst [vmem:[%s2026_s4 + $0x120] sm:$0xff] %v846_v1 }
 0x1c6   :  { %901 = vst [vmem:[%s2026_s4 + $0x128] sm:$0xff] %v847_v48  ;;  %902 = vst [vmem:[%s2026_s4 + $0x130] sm:$0xff] %v848_v11 }
 0x1c7   :  { %903 = vst [vmem:[%s2026_s4 + $0x138] sm:$0xff] %v849_v39  ;;  %904 = vst [vmem:[%s2026_s4 + $0x140] sm:$0xff] %v850_v3 }
 0x1c8   :  { %905 = vst [vmem:[%s2026_s4 + $0x148] sm:$0xff] %v851_v43  ;;  %906 = vst [vmem:[%s2026_s4 + $0x150] sm:$0xff] %v852_v63 }
 0x1c9   :  { %907 = vst [vmem:[%s2026_s4 + $0x158] sm:$0xff] %v853_v23  ;;  %908 = vst [vmem:[%s2026_s4 + $0x160] sm:$0xff] %v854_v56 }
 0x1ca   :  { %909 = vst [vmem:[%s2026_s4 + $0x168] sm:$0xff] %v855_v35  ;;  %910 = vst [vmem:[%s2026_s4 + $0x170] sm:$0xff] %v856_v41 }
 0x1cb   :  { %911 = vst [vmem:[%s2026_s4 + $0x178] sm:$0xff] %v857_v44  ;;  %912 = vst [vmem:[%s2026_s4 + $0x180] sm:$0xff] %v858_v58 }
 0x1cc   :  { %913 = vst [vmem:[%s2026_s4 + $0x188] sm:$0xff] %v859_v5  ;;  %914 = vst [vmem:[%s2026_s4 + $0x190] sm:$0xff] %v860_v19 }
 0x1cd   :  { %915 = vst [vmem:[%s2026_s4 + $0x198] sm:$0xff] %v861_v22  ;;  %916 = vst [vmem:[%s2026_s4 + $0x1a0] sm:$0xff] %v862_v38 }
 0x1ce   :  { %917 = vst [vmem:[%s2026_s4 + $0x1a8] sm:$0xff] %v863_v53 }

// kernel: cnn_autoencoder_forward.9
= control target key start
LH: loop header
LB: loop body
LE: loop exit
PB: predicated region body
PF: predicated region fallthrough
CT: control target
= control target key end

     0   :  { %v144_v1 = vmov 0   ;;  %vm37_vm0 = vcmask 130048   ;;  %s187_s1 = inlined_call_operand.vmem [shape: bf16[16,512], index: 1, kind: input, shape index: {}]   ;;  %s188_s0 = inlined_call_operand.vmem [shape: bf16[8,16], index: 0, kind: input, shape index: {}]   ;;  %s189_s2 = inlined_call_operand.vmem [shape: f32[8,512], index: 2, kind: output, shape index: {}]  }
   0x1   :  { %v138_v0 = vld [vmem:[%s187_s1 + $0x4] ss:$16 sps:$4 sm:$0xff]   ;;  %73 = vmatprep.mubr.bf16.mxu0 %v144_v1  ;;  %114 = vmatprep.mubr.bf16.mxu1 %v144_v1  ;;  %v140_v2 = vld [vmem:[%s187_s1 + $0xc] ss:$16 sps:$4 sm:$0xff]   ;;  %v142_v3 = vld [vmem:[%s187_s1] ss:$16 sps:$4 sm:$0xff]  }
   0x2   :  { %41 = vmatprep.subr.bf16.mxu0 %v138_v0  ;;  %v143_v4 = vld [vmem:[%s187_s1 + $0x8] ss:$16 sps:$4 sm:$0xff]   ;;  %82 = vmatprep.subr.bf16.mxu1 %v140_v2  ;;  %v12_v5 = vld [vmem:[%s188_s0] sm:$0xf] }
   0x3   :  { %42 = vmatpush1.bf16.msra.mxu0 %v142_v3  ;;  %83 = vmatpush1.bf16.msra.mxu1 %v143_v4 }
   0x6   :  { %135 = vmatmul.mubr.msk.bf16.vlgmr.msra.gmra.mrb[0].mxu0 %vm37_vm0, %v12_v5  ;;  %136 = vmatmul.mubr.msk.bf16.vlgmr.msra.gmra.mrb[0].mxu1 %vm37_vm0, %v12_v5 }
  0xd9   :  { %v75_v6 = vpop.f32.mrb[0].mxu0  ;;  %v116_v7 = vpop.f32.mrb[0].mxu1 }
  0xda   :  { %123 = vst [vmem:[%s189_s2] sm:$0xff] %v75_v6  ;;  %125 = vst [vmem:[%s189_s2 + $0x10] sm:$0xff] %v116_v7  ;;  %v77_v8 = vpop.f32.mrb[1].mxu0  ;;  %v118_v9 = vpop.f32.mrb[1].mxu1 }
  0xdb   :  { %124 = vst [vmem:[%s189_s2 + $0x8] sm:$0xff] %v77_v8  ;;  %126 = vst [vmem:[%s189_s2 + $0x18] sm:$0xff] %v118_v9  ;;  %v79_v10 = vpop.f32.mrb[2].mxu0  ;;  %v120_v11 = vpop.f32.mrb[2].mxu1 }
  0xdc   :  { %v80_v12 = vpop.f32.mrb[3].mxu0  ;;  %v121_v13 = vpop.f32.mrb[3].mxu1 }

// kernel: cnn_autoencoder_forward.8
= control target key start
LH: loop header
LB: loop body
LE: loop exit
PB: predicated region body
PF: predicated region fallthrough
CT: control target
= control target key end

     0   :  { %v483_v0 = vmov 0   ;;  %vm257_vm0 = vcmask 392192   ;;  %s625_s1 = inlined_call_operand.vmem [shape: bf16[432,128], index: 1, kind: input, shape index: {}]   ;;  %s626_s0 = inlined_call_operand.vmem [shape: bf16[16,432], index: 0, kind: input, shape index: {}]   ;;  %s627_s2 = inlined_call_operand.vmem [shape: f32[1,128], index: 2, kind: input, shape index: {}]   ;;  %s628_s3 = inlined_call_operand.vmem [shape: f32[1,128], index: 3, kind: input, shape index: {}]   ;;  %s629_s4 = inlined_call_operand.vmem [shape: f32[16,128], index: 4, kind: output, shape index: {}]  }
   0x1   :  { %302 = vmatprep.subr.bf16.mxu1 %v483_v0  ;;  %v448_v1 = vld [vmem:[%s625_s1 + $0x80] sm:$0xff]   ;;  %v449_v2 = vld [vmem:[%s625_s1 + $0x88] sm:$0xff]   ;;  %v452_v5 = vld [vmem:[%s625_s1 + $0x90] sm:$0xff]  }
   0x2   :  { %303 = vmatpush1.bf16.msra.mxu1 %v448_v1  ;;  %v450_v3 = vld [vmem:[%s625_s1 + $0x40] sm:$0xff]   ;;  %v453_v6 = vld [vmem:[%s625_s1 + $0x48] sm:$0xff]   ;;  %v456_v8 = vld [vmem:[%s625_s1 + $0x50] sm:$0xff]  }
   0x3   :  { %304 = vmatprep.subr.bf16.mxu1 %v483_v0  ;;  %v451_v4 = vld [vmem:[%s625_s1] sm:$0xff]   ;;  %425 = vmatprep.subr.bf16.mxu0 %v450_v3  ;;  %v454_v7 = vld [vmem:[%s625_s1 + $0x8] sm:$0xff]   ;;  %v457_v9 = vld [vmem:[%s625_s1 + $0x10] sm:$0xff]  }
   0x4   :  { %426 = vmatpush3.bf16.msra.mxu0 %v451_v4  ;;  %v455_v10 = vld [vmem:[%s625_s1 + $0x98] sm:$0xff]   ;;  %v458_v12 = vld [vmem:[%s625_s1 + $0xa0] sm:$0xff]   ;;  %v461_v15 = vld [vmem:[%s625_s1 + $0xa8] sm:$0xff]  }
   0x5   :  { %427 = vmatprep.subr.bf16.mxu0 %v453_v6  ;;  %v459_v11 = vld [vmem:[%s625_s1 + $0x58] sm:$0xff]   ;;  %v462_v14 = vld [vmem:[%s625_s1 + $0x60] sm:$0xff]   ;;  %v465_v17 = vld [vmem:[%s625_s1 + $0x68] sm:$0xff]  }
   0x6   :  { %305 = vmatpush1.bf16.msra.mxu1 %v449_v2  ;;  %v460_v13 = vld [vmem:[%s625_s1 + $0x18] sm:$0xff]   ;;  %v463_v16 = vld [vmem:[%s625_s1 + $0x20] sm:$0xff]   ;;  %v464_v18 = vld [vmem:[%s625_s1 + $0xb0] sm:$0xff]   ;;  %v372_v2 = vlaneseq }
   0x7   :  { %306 = vmatprep.subr.bf16.mxu1 %v483_v0  ;;  %v466_v19 = vld [vmem:[%s625_s1 + $0x28] sm:$0xff]   ;;  %v468_v20 = vld [vmem:[%s625_s1 + $0x70] sm:$0xff]   ;;  %v467_v21 = vld [vmem:[%s625_s1 + $0xb8] sm:$0xff]  }
   0x8   :  { %428 = vmatpush3.bf16.msra.mxu0 %v454_v7  ;;  %v469_v22 = vld [vmem:[%s625_s1 + $0x30] sm:$0xff]   ;;  %v471_v23 = vld [vmem:[%s625_s1 + $0x78] sm:$0xff]   ;;  %v470_v27 = vld [vmem:[%s625_s1 + $0xc0] sm:$0xff]   ;;  %v373_v3 = vshrl.u32 %v372_v2, 7 }
   0x9   :  { %429 = vmatprep.subr.bf16.mxu0 %v456_v8  ;;  %v475_v24 = vld [vmem:[%s626_s0 + $0x4] ss:$16 sps:$4 sm:$0xff]   ;;  %v472_v25 = vld [vmem:[%s625_s1 + $0x38] sm:$0xff]   ;;  %v473_v28 = vld [vmem:[%s626_s0] ss:$16 sps:$4 sm:$0xff]  }
   0xa   :  { %307 = vmatpush1.bf16.msra.mxu1 %v452_v5  ;;  %293 = vmatprep.mubr.bf16.mxu0 %v475_v24  ;;  %v480_v26 = vld [vmem:[%s626_s0 + $0xc] ss:$16 sps:$4 sm:$0xff]   ;;  %v477_v30 = vld [vmem:[%s625_s1 + $0xd0] sm:$0xff]   ;;  %v478_v31 = vld [vmem:[%s626_s0 + $0x8] ss:$16 sps:$4 sm:$0xff]   ;;  %v374_v5 = vsub.s32 0, %v373_v3 }
   0xb   :  { %308 = vmatprep.subr.bf16.mxu1 %v483_v0  ;;  %424 = vmatprep.mubr.msk.bf16.mxu1 %vm257_vm0, %v480_v26  ;;  %v476_v29 = vld [vmem:[%s625_s1 + $0xc8] sm:$0xff]   ;;  %v364_v4 = vld [vmem:[%s627_s2] sm:$0x1] }
   0xc   :  { %430 = vmatpush3.bf16.msra.mxu0 %v457_v9  ;;  %v368_v8 = vld [vmem:[%s628_s3] sm:$0x1] }
   0xd   :  { %431 = vmatprep.subr.bf16.mxu0 %v459_v11 }
   0xe   :  { %309 = vmatpush1.bf16.msra.mxu1 %v455_v10 }
   0xf   :  { %310 = vmatprep.subr.bf16.mxu1 %v483_v0 }
  0x10   :  { %432 = vmatpush3.bf16.msra.mxu0 %v460_v13 }
  0x11   :  { %433 = vmatprep.subr.bf16.mxu0 %v462_v14 }
  0x12   :  { %311 = vmatpush1.bf16.msra.mxu1 %v458_v12 }
  0x13   :  { %312 = vmatprep.subr.bf16.mxu1 %v483_v0 }
  0x14   :  { %434 = vmatpush3.bf16.msra.mxu0 %v463_v16 }
  0x15   :  { %435 = vmatprep.subr.bf16.mxu0 %v465_v17 }
  0x16   :  { %313 = vmatpush1.bf16.msra.mxu1 %v461_v15 }
  0x17   :  { %314 = vmatprep.subr.bf16.mxu1 %v483_v0 }
  0x18   :  { %436 = vmatpush3.bf16.msra.mxu0 %v466_v19 }
  0x19   :  { %437 = vmatprep.subr.bf16.mxu0 %v468_v20 }
  0x1a   :  { %315 = vmatpush1.bf16.msra.mxu1 %v464_v18 }
  0x1b   :  { %316 = vmatprep.subr.bf16.mxu1 %v483_v0 }
  0x1c   :  { %438 = vmatpush3.bf16.msra.mxu0 %v469_v22 }
  0x1d   :  { %439 = vmatprep.subr.bf16.mxu0 %v471_v23 }
  0x1e   :  { %317 = vmatpush1.bf16.msra.mxu1 %v467_v21 }
  0x1f   :  { %318 = vmatprep.subr.bf16.mxu1 %v483_v0 }
  0x20   :  { %440 = vmatpush3.bf16.msra.mxu0 %v472_v25 }
  0x22   :  { %319 = vmatpush1.bf16.msra.mxu1 %v470_v27 }
  0x23   :  { %320 = vmatprep.subr.bf16.mxu1 %v483_v0  ;;  %294 = vmatmul.mubr.bf16.vlgmr.msra.gmra.mrb[0].mxu0 %v473_v28 }
  0x26   :  { %321 = vmatpush1.bf16.msra.mxu1 %v476_v29 }
  0x27   :  { %322 = vmatprep.subr.bf16.mxu1 %v483_v0 }
  0x2a   :  { %323 = vmatpush1.bf16.msra.mxu1 %v477_v30 }
  0x2d   :  { %335 = vmatmul.mubr.bf16.vlgmr.msra.gmra.mrb[0].mxu1 %v478_v31 }
  0xf6   :  { %v441_v32 = vpop.f32.mrb[0].mxu0 }
  0xf7   :  { %v442_v33 = vpop.f32.mrb[1].mxu0 }
  0xf8   :  { %v443_v34 = vadd.f32 %v442_v33, %v441_v32  ;;  %v444_v35 = vpop.f32.mrb[2].mxu0 }
  0xf9   :  { %v445_v36 = vpop.f32.mrb[3].mxu0 }
  0xfa   :  { %v446_v37 = vadd.f32 %v445_v36, %v444_v35 }
 0x100   :  { %v336_v38 = vpop.f32.mrb[0].mxu1 }
 0x101   :  { %v337_v39 = vadd.f32 %v443_v34, %v336_v38  ;;  %v338_v40 = vpop.f32.mrb[1].mxu1 }
 0x102   :  { %v339_v41 = vpop.f32.mrb[2].mxu1 }
 0x103   :  { %v340_v42 = vadd.f32 %v446_v37, %v339_v41  ;;  %v341_v43 = vpop.f32.mrb[3].mxu1  ;;  %v350_v44 = vmul.f32 %v337_v39, %v337_v39 }
 0x105   :  { %v343_v45 = vadd.f32 %v340_v42, %v337_v39  ;;  %v351_v46 = vmul.f32 %v340_v42, %v340_v42 }
 0x107   :  { %v344_v47 = vrot.slane %v343_v45, 4  ;;  %v352_v48 = vadd.f32 %v351_v46, %v350_v44 }
 0x109   :  { %v345_v49 = vadd.f32 %v344_v47, %v343_v45  ;;  %v353_v50 = vrot.slane %v352_v48, 4 }
 0x10b   :  { %v346_v51 = vrot.slane %v345_v49, 2  ;;  %v354_v52 = vadd.f32 %v353_v50, %v352_v48 }
 0x10d   :  { %v347_v53 = vadd.f32 %v346_v51, %v345_v49  ;;  %v355_v54 = vrot.slane %v354_v52, 2 }
 0x10f   :  { %v348_v55 = vrot.slane %v347_v53, 1  ;;  %v356_v56 = vadd.f32 %v355_v54, %v354_v52 }
 0x111   :  { %v349_v57 = vadd.f32 %v348_v55, %v347_v53  ;;  %v357_v58 = vrot.slane %v356_v56, 1 }
 0x113   :  { %v358_v59 = vadd.f32 %v357_v58, %v356_v56  ;;  %v359_v60 = vmul.f32 0.0625, %v349_v57 }
 0x115   :  { %v360_v61 = vmul.f32 0.0625, %v358_v59  ;;  %v361_v62 = vmul.f32 %v359_v60, %v359_v60 }
 0x117   :  { %v362_v63 = vsub.f32 %v360_v61, %v361_v62 }
 0x119   :  { %v363_v0 = vmax.f32 %v362_v63, 0.0 }
 0x11b   :  { %v365_v1 = vadd.f32 1e-05, %v363_v0 }
 0x11d   :  { %481 = vrsqrt.f32 %v365_v1 }
 0x127   :  { %v482_v6 = vpop.eup %481 }
 0x128   :  { %v367_v7 = vmul.f32 %v482_v6, %v364_v4 }
 0x12a   :  { %v369_v9 = vmul.f32 %v367_v7, %v359_v60  ;;  %v375_v10 = vrot.slane %v367_v7, %v374_v5 }
 0x12c   :  { %v370_v11 = vsub.f32 %v368_v8, %v369_v9  ;;  %v377_v12 = vmul.f32 %v375_v10, %v337_v39  ;;  %v378_v13 = vmul.f32 %v375_v10, %v340_v42 }
 0x12e   :  { %v383_v14 = vrot.slane %v370_v11, %v374_v5 }
 0x130   :  { %v385_v15 = vadd.f32 %v383_v14, %v377_v12  ;;  %v386_v16 = vadd.f32 %v383_v14, %v378_v13 }
 0x132   :  { %387 = vst [vmem:[%s629_s4] sm:$0xff] %v385_v15  ;;  %388 = vst [vmem:[%s629_s4 + $0x8] sm:$0xff] %v386_v16 }

// kernel: cnn_autoencoder_forward.10
= control target key start
LH: loop header
LB: loop body
LE: loop exit
PB: predicated region body
PF: predicated region fallthrough
CT: control target
= control target key end

     0   :  { %vm16_vm0 = vcmask 441344   ;;  %v92_v8 = vmov 0   ;;  %s143_s0 = inlined_call_operand.vmem [shape: f32[16,54], index: 0, kind: input, shape index: {}]   ;;  %s144_s1 = inlined_call_operand.vmem [shape: f32[16,1], index: 1, kind: input, shape index: {}]   ;;  %s145_s2 = inlined_call_operand.vmem [shape: f32[16,1], index: 2, kind: input, shape index: {}]   ;;  %s146_s3 = inlined_call_operand.vmem [shape: f32[16,54], index: 3, kind: output, shape index: {}]  }
   0x1   :  { %v14_v0 = vld [vmem:[%s143_s0] sm:$0xff]  ;;  %v15_v1 = vld [vmem:[%s143_s0 + $0x8] sm:$0xff]  ;;  %86 = vset.pattern.permute.xlu0 %v92_v8  ;;  %87 = vset.pattern.permute.xlu1 %v92_v8 }
   0x2   :  { %v17_v2 = vsel %vm16_vm0, %v14_v0, 0.0  ;;  %v23_v3 = vmul.f32 %v14_v0, %v14_v0  ;;  %v24_v4 = vmul.f32 %v15_v1, %v15_v1  ;;  %v20_v6 = vsel %vm16_vm0, %v15_v1, 0.0  ;;  %v41_v25 = vld [vmem:[%s144_s1] sm:$0xff]  ;;  %v42_v28 = vld [vmem:[%s144_s1 + $0x8] sm:$0xff] }
   0x3   :  { %18 = vadd.xlane.f32.xlu0 %v17_v2  ;;  %v49_v32 = vld [vmem:[%s145_s2] sm:$0xff]  ;;  %v50_v35 = vld [vmem:[%s145_s2 + $0x8] sm:$0xff] }
   0x4   :  { %v25_v5 = vsel %vm16_vm0, %v23_v3, 0.0  ;;  %v28_v7 = vsel %vm16_vm0, %v24_v4, 0.0 }
   0x5   :  { %26 = vadd.xlane.f32.xlu1 %v25_v5 }
   0x7   :  { %21 = vadd.xlane.f32.xlu0 %v20_v6 }
   0x9   :  { %29 = vadd.xlane.f32.xlu1 %v28_v7 }
  0x90   :  { %v19_v9 = vpop.xlane.xlu0 %18 }
  0x91   :  { %v31_v10 = vmul.f32 0.018518519, %v19_v9 }
  0x92   :  { %v27_v11 = vpop.xlane.xlu1 %26 }
  0x93   :  { %v35_v12 = vmul.f32 %v31_v10, %v31_v10  ;;  %v33_v13 = vmul.f32 0.018518519, %v27_v11 }
  0x94   :  { %v22_v14 = vpop.xlane.xlu0 %21 }
  0x95   :  { %v37_v15 = vsub.f32 %v33_v13, %v35_v12  ;;  %v32_v16 = vmul.f32 0.018518519, %v22_v14 }
  0x96   :  { %v30_v17 = vpop.xlane.xlu1 %29 }
  0x97   :  { %v39_v18 = vmax.f32 %v37_v15, 0.0  ;;  %v36_v19 = vmul.f32 %v32_v16, %v32_v16  ;;  %v34_v20 = vmul.f32 0.018518519, %v30_v17 }
  0x99   :  { %v43_v21 = vadd.f32 1e-05, %v39_v18  ;;  %v38_v22 = vsub.f32 %v34_v20, %v36_v19 }
  0x9b   :  { %88 = vrsqrt.f32 %v43_v21  ;;  %v40_v23 = vmax.f32 %v38_v22, 0.0 }
  0x9d   :  { %v44_v24 = vadd.f32 1e-05, %v40_v23 }
  0x9f   :  { %90 = vrsqrt.f32 %v44_v24 }
  0xa5   :  { %v89_v26 = vpop.eup %88 }
  0xa6   :  { %v47_v27 = vmul.f32 %v89_v26, %v41_v25 }
  0xa8   :  { %57 = vperm.xlu0 %86, %v47_v27   ;;  %v51_v31 = vmul.f32 %v47_v27, %v31_v10 }
  0xa9   :  { %v91_v29 = vpop.eup %90 }
  0xaa   :  { %v48_v30 = vmul.f32 %v91_v29, %v42_v28  ;;  %v53_v33 = vsub.f32 %v49_v32, %v51_v31 }
  0xac   :  { %62 = vperm.xlu1 %87, %v48_v30   ;;  %v52_v34 = vmul.f32 %v48_v30, %v32_v16 }
  0xae   :  { %v54_v36 = vsub.f32 %v50_v35, %v52_v34 }
  0xb0   :  { %69 = vperm.xlu1 %87, %v53_v33  }
  0xb4   :  { %74 = vperm.xlu1 %87, %v54_v36  }
 0x127   :  { %v58_v37 = vpop.permute.xlu0 %57 }
 0x128   :  { %v65_v39 = vmul.f32 %v58_v37, %v14_v0 }
 0x12b   :  { %v63_v38 = vpop.permute.xlu1 %62 }
 0x12c   :  { %v66_v42 = vmul.f32 %v63_v38, %v15_v1 }
 0x12f   :  { %v70_v40 = vpop.permute.xlu1 %69 }
 0x130   :  { %v77_v41 = vadd.f32 %v70_v40, %v65_v39 }
 0x132   :  { %79 = vst.msk [vmem:[%s146_s3] sm:$0xff] %vm16_vm0, %v77_v41 }
 0x133   :  { %v75_v43 = vpop.permute.xlu1 %74 }
 0x134   :  { %v78_v44 = vadd.f32 %v75_v43, %v66_v42 }
 0x136   :  { %80 = vst.msk [vmem:[%s146_s3 + $0x8] sm:$0xff] %vm16_vm0, %v78_v44 }

// kernel: cnn_autoencoder_forward.11
= control target key start
LH: loop header
LB: loop body
LE: loop exit
PB: predicated region body
PF: predicated region fallthrough
CT: control target
= control target key end

     0   :  { %v475_v3 = vmov 0   ;;  %vm85_vm0 = vcmask 130048   ;;  %s711_s1 = inlined_call_operand.vmem [shape: bf16[16,1024], index: 1, kind: input, shape index: {}]   ;;  %s712_s0 = inlined_call_operand.vmem [shape: bf16[56,16], index: 0, kind: input, shape index: {}]   ;;  %s713_s2 = inlined_call_operand.vmem [shape: f32[56,1024], index: 2, kind: output, shape index: {}]  }
   0x1   :  { %v19_v0 = vld [vmem:[%s711_s1] sm:$0xff]  ;;  %v20_v2 = vld [vmem:[%s711_s1 + $0x8] sm:$0xff]  ;;  %130 = vmatprep.mubr.bf16.mxu0 %v475_v3  ;;  %201 = vmatprep.mubr.bf16.mxu1 %v475_v3  ;;  %v21_v10 = vld [vmem:[%s711_s1 + $0x10] sm:$0xff] }
   0x2   :  { %v23_v1 = vld [vmem:[%s711_s1 + $0x20] sm:$0xff]  ;;  %v24_v5 = vld [vmem:[%s711_s1 + $0x28] sm:$0xff]  ;;  %v25_v11 = vld [vmem:[%s711_s1 + $0x30] sm:$0xff] }
   0x3   :  { %v447_v4 = vcombine.high %v19_v0, %v23_v1  ;;  %v446_v6 = vcombine.low %v19_v0, %v23_v1  ;;  %v449_v7 = vcombine.high %v20_v2, %v24_v5  ;;  %v448_v8 = vcombine.low %v20_v2, %v24_v5  ;;  %v471_v9 = vld [vmem:[%s712_s0] sm:$0xff]   ;;  %v22_v13 = vld [vmem:[%s711_s1 + $0x18] sm:$0xff]  ;;  %v472_v18 = vld [vmem:[%s712_s0 + $0x8] sm:$0xff]  }
   0x4   :  { %v451_v12 = vcombine.high %v21_v10, %v25_v11  ;;  %v26_v14 = vld [vmem:[%s711_s1 + $0x38] sm:$0xff]  ;;  %v450_v15 = vcombine.low %v21_v10, %v25_v11  ;;  %v473_v19 = vld [vmem:[%s712_s0 + $0x10] sm:$0xff]  }
   0x5   :  { %98 = vmatprep.subr.bf16.mxu0 %v447_v4  ;;  %169 = vmatprep.subr.bf16.mxu1 %v449_v7  ;;  %v453_v16 = vcombine.high %v22_v13, %v26_v14  ;;  %v452_v17 = vcombine.low %v22_v13, %v26_v14  ;;  %v474_v20 = vld [vmem:[%s712_s0 + $0x18] ss:$0 sps:$4 sm:$0xff]  }
   0x6   :  { %99 = vmatpush1.bf16.msra.mxu0 %v446_v6  ;;  %170 = vmatpush1.bf16.msra.mxu1 %v448_v8 }
   0x7   :  { %240 = vmatprep.subr.bf16.mxu0 %v451_v12  ;;  %311 = vmatprep.subr.bf16.mxu1 %v453_v16 }
   0x9   :  { %454 = vmatmul.mubr.msk.bf16.vlgmr.msra.gmra.mrb[0].mxu0 %vm85_vm0, %v471_v9  ;;  %458 = vmatmul.mubr.msk.bf16.vlgmr.msra.gmra.mrb[0].mxu1 %vm85_vm0, %v471_v9 }
   0xa   :  { %241 = vmatpush1.bf16.msra.mxu0 %v450_v15  ;;  %312 = vmatpush1.bf16.msra.mxu1 %v452_v17 }
   0xb   :  { %140 = vmatprep.mubr.bf16.mxu0 %v475_v3  ;;  %211 = vmatprep.mubr.bf16.mxu1 %v475_v3 }
  0x11   :  { %455 = vmatmul.mubr.msk.bf16.gmra.mrb[4].mxu0 %vm85_vm0, %v472_v18  ;;  %459 = vmatmul.mubr.msk.bf16.gmra.mrb[4].mxu1 %vm85_vm0, %v472_v18 }
  0x12   :  { %150 = vmatprep.mubr.bf16.mxu0 %v475_v3  ;;  %221 = vmatprep.mubr.bf16.mxu1 %v475_v3 }
  0x19   :  { %456 = vmatmul.mubr.msk.bf16.gmra.mrb[8].mxu0 %vm85_vm0, %v473_v19  ;;  %460 = vmatmul.mubr.msk.bf16.gmra.mrb[8].mxu1 %vm85_vm0, %v473_v19 }
  0x1a   :  { %160 = vmatprep.mubr.bf16.mxu0 %v475_v3  ;;  %231 = vmatprep.mubr.bf16.mxu1 %v475_v3 }
  0x21   :  { %457 = vmatmul.mubr.msk.bf16.gmra.mrb[12].mxu0 %vm85_vm0, %v474_v20  ;;  %461 = vmatmul.mubr.msk.bf16.gmra.mrb[12].mxu1 %vm85_vm0, %v474_v20 }
  0x22   :  { %272 = vmatprep.mubr.bf16.mxu0 %v475_v3  ;;  %343 = vmatprep.mubr.bf16.mxu1 %v475_v3 }
  0x29   :  { %462 = vmatmul.mubr.msk.bf16.vlgmr.msra.gmra.mrb[16].mxu0 %vm85_vm0, %v471_v9  ;;  %466 = vmatmul.mubr.msk.bf16.vlgmr.msra.gmra.mrb[16].mxu1 %vm85_vm0, %v471_v9 }
  0x2a   :  { %282 = vmatprep.mubr.bf16.mxu0 %v475_v3  ;;  %353 = vmatprep.mubr.bf16.mxu1 %v475_v3 }
  0x31   :  { %463 = vmatmul.mubr.msk.bf16.gmra.mrb[20].mxu0 %vm85_vm0, %v472_v18  ;;  %467 = vmatmul.mubr.msk.bf16.gmra.mrb[20].mxu1 %vm85_vm0, %v472_v18 }
  0x32   :  { %292 = vmatprep.mubr.bf16.mxu0 %v475_v3  ;;  %363 = vmatprep.mubr.bf16.mxu1 %v475_v3 }
  0x39   :  { %464 = vmatmul.mubr.msk.bf16.gmra.mrb[24].mxu0 %vm85_vm0, %v473_v19  ;;  %468 = vmatmul.mubr.msk.bf16.gmra.mrb[24].mxu1 %vm85_vm0, %v473_v19 }
  0x3a   :  { %302 = vmatprep.mubr.bf16.mxu0 %v475_v3  ;;  %373 = vmatprep.mubr.bf16.mxu1 %v475_v3 }
  0x41   :  { %465 = vmatmul.mubr.msk.bf16.gmra.mrb[28].mxu0 %vm85_vm0, %v474_v20  ;;  %469 = vmatmul.mubr.msk.bf16.gmra.mrb[28].mxu1 %vm85_vm0, %v474_v20 }
  0xdc   :  { %v132_v21 = vpop.f32.mrb[0].mxu0  ;;  %v203_v22 = vpop.f32.mrb[0].mxu1 }
  0xdd   :  { %382 = vst [vmem:[%s713_s2] sm:$0xff] %v132_v21  ;;  %v134_v23 = vpop.f32.mrb[1].mxu0  ;;  %384 = vst [vmem:[%s713_s2 + $0x10] sm:$0xff] %v203_v22  ;;  %v205_v24 = vpop.f32.mrb[1].mxu1 }
  0xde   :  { %383 = vst [vmem:[%s713_s2 + $0x8] sm:$0xff] %v134_v23  ;;  %v136_v25 = vpop.f32.mrb[2].mxu0  ;;  %385 = vst [vmem:[%s713_s2 + $0x18] sm:$0xff] %v205_v24  ;;  %v207_v26 = vpop.f32.mrb[2].mxu1 }
  0xdf   :  { %390 = vst [vmem:[%s713_s2 + $0x40] sm:$0xff] %v136_v25  ;;  %v138_v27 = vpop.f32.mrb[3].mxu0  ;;  %392 = vst [vmem:[%s713_s2 + $0x50] sm:$0xff] %v207_v26  ;;  %v209_v28 = vpop.f32.mrb[3].mxu1 }
  0xe0   :  { %391 = vst [vmem:[%s713_s2 + $0x48] sm:$0xff] %v138_v27  ;;  %393 = vst [vmem:[%s713_s2 + $0x58] sm:$0xff] %v209_v28 }
  0xe4   :  { %v142_v29 = vpop.f32.mrb[4].mxu0  ;;  %v213_v30 = vpop.f32.mrb[4].mxu1 }
  0xe5   :  { %398 = vst [vmem:[%s713_s2 + $0x80] sm:$0xff] %v142_v29  ;;  %v144_v31 = vpop.f32.mrb[5].mxu0  ;;  %400 = vst [vmem:[%s713_s2 + $0x90] sm:$0xff] %v213_v30  ;;  %v215_v32 = vpop.f32.mrb[5].mxu1 }
  0xe6   :  { %399 = vst [vmem:[%s713_s2 + $0x88] sm:$0xff] %v144_v31  ;;  %v146_v33 = vpop.f32.mrb[6].mxu0  ;;  %401 = vst [vmem:[%s713_s2 + $0x98] sm:$0xff] %v215_v32  ;;  %v217_v34 = vpop.f32.mrb[6].mxu1 }
  0xe7   :  { %406 = vst [vmem:[%s713_s2 + $0xc0] sm:$0xff] %v146_v33  ;;  %v148_v35 = vpop.f32.mrb[7].mxu0  ;;  %408 = vst [vmem:[%s713_s2 + $0xd0] sm:$0xff] %v217_v34  ;;  %v219_v36 = vpop.f32.mrb[7].mxu1 }
  0xe8   :  { %407 = vst [vmem:[%s713_s2 + $0xc8] sm:$0xff] %v148_v35  ;;  %409 = vst [vmem:[%s713_s2 + $0xd8] sm:$0xff] %v219_v36 }
  0xec   :  { %v152_v37 = vpop.f32.mrb[8].mxu0  ;;  %v223_v38 = vpop.f32.mrb[8].mxu1 }
  0xed   :  { %414 = vst [vmem:[%s713_s2 + $0x100] sm:$0xff] %v152_v37  ;;  %v154_v39 = vpop.f32.mrb[9].mxu0  ;;  %416 = vst [vmem:[%s713_s2 + $0x110] sm:$0xff] %v223_v38  ;;  %v225_v40 = vpop.f32.mrb[9].mxu1 }
  0xee   :  { %415 = vst [vmem:[%s713_s2 + $0x108] sm:$0xff] %v154_v39  ;;  %v156_v41 = vpop.f32.mrb[10].mxu0  ;;  %417 = vst [vmem:[%s713_s2 + $0x118] sm:$0xff] %v225_v40  ;;  %v227_v42 = vpop.f32.mrb[10].mxu1 }
  0xef   :  { %422 = vst [vmem:[%s713_s2 + $0x140] sm:$0xff] %v156_v41  ;;  %v158_v43 = vpop.f32.mrb[11].mxu0  ;;  %424 = vst [vmem:[%s713_s2 + $0x150] sm:$0xff] %v227_v42  ;;  %v229_v44 = vpop.f32.mrb[11].mxu1 }
  0xf0   :  { %423 = vst [vmem:[%s713_s2 + $0x148] sm:$0xff] %v158_v43  ;;  %425 = vst [vmem:[%s713_s2 + $0x158] sm:$0xff] %v229_v44 }
  0xf4   :  { %v162_v45 = vpop.f32.mrb[12].mxu0  ;;  %v233_v46 = vpop.f32.mrb[12].mxu1 }
  0xf5   :  { %430 = vst [vmem:[%s713_s2 + $0x180] sm:$0xff] %v162_v45  ;;  %v164_v47 = vpop.f32.mrb[13].mxu0  ;;  %432 = vst [vmem:[%s713_s2 + $0x190] sm:$0xff] %v233_v46  ;;  %v235_v48 = vpop.f32.mrb[13].mxu1 }
  0xf6   :  { %431 = vst [vmem:[%s713_s2 + $0x188] sm:$0xff] %v164_v47  ;;  %v166_v49 = vpop.f32.mrb[14].mxu0  ;;  %433 = vst [vmem:[%s713_s2 + $0x198] sm:$0xff] %v235_v48  ;;  %v237_v50 = vpop.f32.mrb[14].mxu1 }
  0xf7   :  { %v167_v51 = vpop.f32.mrb[15].mxu0  ;;  %v238_v52 = vpop.f32.mrb[15].mxu1 }
  0xfc   :  { %v274_v53 = vpop.f32.mrb[16].mxu0  ;;  %v345_v54 = vpop.f32.mrb[16].mxu1 }
  0xfd   :  { %386 = vst [vmem:[%s713_s2 + $0x20] sm:$0xff] %v274_v53  ;;  %v276_v55 = vpop.f32.mrb[17].mxu0  ;;  %388 = vst [vmem:[%s713_s2 + $0x30] sm:$0xff] %v345_v54  ;;  %v347_v56 = vpop.f32.mrb[17].mxu1 }
  0xfe   :  { %387 = vst [vmem:[%s713_s2 + $0x28] sm:$0xff] %v276_v55  ;;  %v278_v57 = vpop.f32.mrb[18].mxu0  ;;  %389 = vst [vmem:[%s713_s2 + $0x38] sm:$0xff] %v347_v56  ;;  %v349_v58 = vpop.f32.mrb[18].mxu1 }
  0xff   :  { %394 = vst [vmem:[%s713_s2 + $0x60] sm:$0xff] %v278_v57  ;;  %v280_v59 = vpop.f32.mrb[19].mxu0  ;;  %396 = vst [vmem:[%s713_s2 + $0x70] sm:$0xff] %v349_v58  ;;  %v351_v60 = vpop.f32.mrb[19].mxu1 }
 0x100   :  { %395 = vst [vmem:[%s713_s2 + $0x68] sm:$0xff] %v280_v59  ;;  %397 = vst [vmem:[%s713_s2 + $0x78] sm:$0xff] %v351_v60 }
 0x104   :  { %v284_v61 = vpop.f32.mrb[20].mxu0  ;;  %v355_v62 = vpop.f32.mrb[20].mxu1 }
 0x105   :  { %402 = vst [vmem:[%s713_s2 + $0xa0] sm:$0xff] %v284_v61  ;;  %v286_v63 = vpop.f32.mrb[21].mxu0  ;;  %404 = vst [vmem:[%s713_s2 + $0xb0] sm:$0xff] %v355_v62  ;;  %v357_v0 = vpop.f32.mrb[21].mxu1 }
 0x106   :  { %403 = vst [vmem:[%s713_s2 + $0xa8] sm:$0xff] %v286_v63  ;;  %v288_v1 = vpop.f32.mrb[22].mxu0  ;;  %405 = vst [vmem:[%s713_s2 + $0xb8] sm:$0xff] %v357_v0  ;;  %v359_v2 = vpop.f32.mrb[22].mxu1 }
 0x107   :  { %410 = vst [vmem:[%s713_s2 + $0xe0] sm:$0xff] %v288_v1  ;;  %v290_v3 = vpop.f32.mrb[23].mxu0  ;;  %412 = vst [vmem:[%s713_s2 + $0xf0] sm:$0xff] %v359_v2  ;;  %v361_v4 = vpop.f32.mrb[23].mxu1 }
 0x108   :  { %411 = vst [vmem:[%s713_s2 + $0xe8] sm:$0xff] %v290_v3  ;;  %413 = vst [vmem:[%s713_s2 + $0xf8] sm:$0xff] %v361_v4 }
 0x10c   :  { %v294_v5 = vpop.f32.mrb[24].mxu0  ;;  %v365_v6 = vpop.f32.mrb[24].mxu1 }
 0x10d   :  { %418 = vst [vmem:[%s713_s2 + $0x120] sm:$0xff] %v294_v5  ;;  %v296_v7 = vpop.f32.mrb[25].mxu0  ;;  %420 = vst [vmem:[%s713_s2 + $0x130] sm:$0xff] %v365_v6  ;;  %v367_v8 = vpop.f32.mrb[25].mxu1 }
 0x10e   :  { %419 = vst [vmem:[%s713_s2 + $0x128] sm:$0xff] %v296_v7  ;;  %v298_v9 = vpop.f32.mrb[26].mxu0  ;;  %421 = vst [vmem:[%s713_s2 + $0x138] sm:$0xff] %v367_v8  ;;  %v369_v10 = vpop.f32.mrb[26].mxu1 }
 0x10f   :  { %426 = vst [vmem:[%s713_s2 + $0x160] sm:$0xff] %v298_v9  ;;  %v300_v11 = vpop.f32.mrb[27].mxu0  ;;  %428 = vst [vmem:[%s713_s2 + $0x170] sm:$0xff] %v369_v10  ;;  %v371_v12 = vpop.f32.mrb[27].mxu1 }
 0x110   :  { %427 = vst [vmem:[%s713_s2 + $0x168] sm:$0xff] %v300_v11  ;;  %429 = vst [vmem:[%s713_s2 + $0x178] sm:$0xff] %v371_v12 }
 0x114   :  { %v304_v13 = vpop.f32.mrb[28].mxu0  ;;  %v375_v14 = vpop.f32.mrb[28].mxu1 }
 0x115   :  { %434 = vst [vmem:[%s713_s2 + $0x1a0] sm:$0xff] %v304_v13  ;;  %v306_v15 = vpop.f32.mrb[29].mxu0  ;;  %436 = vst [vmem:[%s713_s2 + $0x1b0] sm:$0xff] %v375_v14  ;;  %v377_v16 = vpop.f32.mrb[29].mxu1 }
 0x116   :  { %435 = vst [vmem:[%s713_s2 + $0x1a8] sm:$0xff] %v306_v15  ;;  %v308_v17 = vpop.f32.mrb[30].mxu0  ;;  %437 = vst [vmem:[%s713_s2 + $0x1b8] sm:$0xff] %v377_v16  ;;  %v379_v18 = vpop.f32.mrb[30].mxu1 }
 0x117   :  { %v309_v19 = vpop.f32.mrb[31].mxu0  ;;  %v380_v20 = vpop.f32.mrb[31].mxu1 }

// kernel: cnn_autoencoder_forward.12
= control target key start
LH: loop header
LB: loop body
LE: loop exit
PB: predicated region body
PF: predicated region fallthrough
CT: control target
= control target key end

     0   :  { %vm36_vm0 = vcmask 408576   ;;  %v134_v48 = vmov 0   ;;  %s278_s0 = inlined_call_operand.vmem [shape: f32[8,1458], index: 0, kind: input, shape index: {}]   ;;  %s279_s1 = inlined_call_operand.vmem [shape: f32[8,1], index: 1, kind: input, shape index: {}]   ;;  %s280_s2 = inlined_call_operand.vmem [shape: f32[8,1], index: 2, kind: input, shape index: {}]   ;;  %s281_s3 = inlined_call_operand.vmem [shape: f32[8,1458], index: 3, kind: output, shape index: {}]  }
   0x1   :  { %v158_v0 = vld [vmem:[%s278_s0] sm:$0xff]  ;;  %v163_v1 = vld [vmem:[%s278_s0 + $0x8] sm:$0xff]  ;;  %v168_v2 = vld [vmem:[%s278_s0 + $0x10] sm:$0xff]  ;;  %130 = vset.pattern.permute.xlu1 %v134_v48  ;;  %131 = vset.pattern.permute.xlu0 %v134_v48 }
   0x2   :  { %v26_v3 = vadd.f32 %v163_v1, %v158_v0  ;;  %v41_v4 = vmul.f32 %v158_v0, %v158_v0  ;;  %v42_v5 = vmul.f32 %v163_v1, %v163_v1  ;;  %v179_v6 = vld [vmem:[%s278_s0 + $0x18] sm:$0xff]  ;;  %v43_v8 = vmul.f32 %v168_v2, %v168_v2  ;;  %v187_v9 = vld [vmem:[%s278_s0 + $0x20] sm:$0xff]  ;;  %v195_v13 = vld [vmem:[%s278_s0 + $0x28] sm:$0xff] }
   0x3   :  { %v44_v11 = vmul.f32 %v179_v6, %v179_v6  ;;  %v45_v15 = vmul.f32 %v187_v9, %v187_v9  ;;  %v203_v17 = vld [vmem:[%s278_s0 + $0x30] sm:$0xff]  ;;  %v46_v19 = vmul.f32 %v195_v13, %v195_v13  ;;  %v21_v21 = vld [vmem:[%s278_s0 + $0x38] sm:$0xff]  ;;  %v22_v25 = vld [vmem:[%s278_s0 + $0x40] sm:$0xff] }
   0x4   :  { %v27_v7 = vadd.f32 %v26_v3, %v168_v2  ;;  %v53_v12 = vadd.f32 %v42_v5, %v41_v4  ;;  %v47_v23 = vmul.f32 %v203_v17, %v203_v17  ;;  %v48_v27 = vmul.f32 %v21_v21, %v21_v21  ;;  %v23_v29 = vld [vmem:[%s278_s0 + $0x48] sm:$0xff]  ;;  %v25_v30 = vld [vmem:[%s278_s0 + $0x58] sm:$0xff]  ;;  %v24_v34 = vld [vmem:[%s278_s0 + $0x50] sm:$0xff] }
   0x5   :  { %v49_v32 = vmul.f32 %v22_v25, %v22_v25  ;;  %v50_v36 = vmul.f32 %v23_v29, %v23_v29  ;;  %v37_v38 = vsel %vm36_vm0, %v25_v30, 0.0  ;;  %v52_v39 = vmul.f32 %v25_v30, %v25_v30  ;;  %v72_v57 = vld [vmem:[%s279_s1] sm:$0xff] }
   0x6   :  { %v28_v10 = vadd.f32 %v27_v7, %v179_v6  ;;  %v54_v16 = vadd.f32 %v53_v12, %v43_v8  ;;  %v51_v41 = vmul.f32 %v24_v34, %v24_v34  ;;  %v76_v60 = vld [vmem:[%s280_s2] sm:$0xff] }
   0x7   :  { %v63_v45 = vsel %vm36_vm0, %v52_v39, 0.0 }
   0x8   :  { %v29_v14 = vadd.f32 %v28_v10, %v187_v9  ;;  %v55_v20 = vadd.f32 %v54_v16, %v44_v11 }
   0xa   :  { %v30_v18 = vadd.f32 %v29_v14, %v195_v13  ;;  %v56_v24 = vadd.f32 %v55_v20, %v45_v15 }
   0xc   :  { %v31_v22 = vadd.f32 %v30_v18, %v203_v17  ;;  %v57_v28 = vadd.f32 %v56_v24, %v46_v19 }
   0xe   :  { %v32_v26 = vadd.f32 %v31_v22, %v21_v21  ;;  %v58_v33 = vadd.f32 %v57_v28, %v47_v23 }
  0x10   :  { %v33_v31 = vadd.f32 %v32_v26, %v22_v25  ;;  %v59_v37 = vadd.f32 %v58_v33, %v48_v27 }
  0x12   :  { %v34_v35 = vadd.f32 %v33_v31, %v23_v29  ;;  %v60_v42 = vadd.f32 %v59_v37, %v49_v32 }
  0x14   :  { %v35_v40 = vadd.f32 %v34_v35, %v24_v34  ;;  %v61_v44 = vadd.f32 %v60_v42, %v50_v36 }
  0x16   :  { %v38_v43 = vadd.f32 %v37_v38, %v35_v40  ;;  %v62_v46 = vadd.f32 %v61_v44, %v51_v41 }
  0x18   :  { %39 = vadd.xlane.f32.xlu0 %v38_v43  ;;  %v64_v47 = vadd.f32 %v63_v45, %v62_v46 }
  0x1c   :  { %65 = vadd.xlane.f32.xlu0 %v64_v47 }
  0xa5   :  { %v40_v49 = vpop.xlane.xlu0 %39 }
  0xa6   :  { %v67_v50 = vmul.f32 0.00068587105, %v40_v49 }
  0xa8   :  { %v69_v52 = vmul.f32 %v67_v50, %v67_v50 }
  0xa9   :  { %v66_v51 = vpop.xlane.xlu0 %65 }
  0xaa   :  { %v68_v53 = vmul.f32 0.00068587105, %v66_v51 }
  0xac   :  { %v70_v54 = vsub.f32 %v68_v53, %v69_v52 }
  0xae   :  { %v71_v55 = vmax.f32 %v70_v54, 0.0 }
  0xb0   :  { %v73_v56 = vadd.f32 1e-05, %v71_v55 }
  0xb2   :  { %132 = vrsqrt.f32 %v73_v56 }
  0xbc   :  { %v133_v58 = vpop.eup %132 }
  0xbd   :  { %v75_v59 = vmul.f32 %v133_v58, %v72_v57 }
  0xbf   :  { %81 = vperm.xlu1 %130, %v75_v59   ;;  %v77_v61 = vmul.f32 %v75_v59, %v67_v50 }
  0xc1   :  { %v78_v62 = vsub.f32 %v76_v60, %v77_v61 }
  0xc3   :  { %98 = vperm.xlu1 %130, %v78_v62  }
 0x13e   :  { %v82_v63 = vpop.permute.xlu1 %81 }
 0x13f   :  { %v84_v3 = vmul.f32 %v82_v63, %v158_v0  ;;  %v85_v4 = vmul.f32 %v82_v63, %v163_v1  ;;  %v86_v5 = vmul.f32 %v82_v63, %v168_v2  ;;  %v87_v7 = vmul.f32 %v82_v63, %v179_v6 }
 0x140   :  { %v88_v8 = vmul.f32 %v82_v63, %v187_v9  ;;  %v89_v10 = vmul.f32 %v82_v63, %v195_v13  ;;  %v90_v11 = vmul.f32 %v82_v63, %v203_v17  ;;  %v91_v12 = vmul.f32 %v82_v63, %v21_v21 }
 0x141   :  { %v92_v14 = vmul.f32 %v82_v63, %v22_v25  ;;  %v93_v15 = vmul.f32 %v82_v63, %v23_v29  ;;  %v94_v16 = vmul.f32 %v82_v63, %v24_v34  ;;  %v95_v18 = vmul.f32 %v82_v63, %v25_v30 }
 0x142   :  { %v99_v19 = vpop.permute.xlu1 %98 }
 0x143   :  { %v101_v20 = vadd.f32 %v99_v19, %v84_v3  ;;  %v102_v0 = vadd.f32 %v99_v19, %v85_v4  ;;  %v103_v22 = vadd.f32 %v99_v19, %v86_v5  ;;  %v104_v1 = vadd.f32 %v99_v19, %v87_v7 }
 0x144   :  { %v105_v23 = vadd.f32 %v99_v19, %v88_v8  ;;  %v106_v2 = vadd.f32 %v99_v19, %v89_v10  ;;  %v107_v24 = vadd.f32 %v99_v19, %v90_v11  ;;  %v108_v6 = vadd.f32 %v99_v19, %v91_v12 }
 0x145   :  { %v109_v26 = vadd.f32 %v99_v19, %v92_v14  ;;  %v110_v9 = vadd.f32 %v99_v19, %v93_v15  ;;  %v111_v27 = vadd.f32 %v99_v19, %v94_v16  ;;  %v112_v13 = vadd.f32 %v99_v19, %v95_v18  ;;  %113 = vst [vmem:[%s281_s3] sm:$0xff] %v101_v20 }
 0x146   :  { %114 = vst [vmem:[%s281_s3 + $0x8] sm:$0xff] %v102_v0  ;;  %115 = vst [vmem:[%s281_s3 + $0x10] sm:$0xff] %v103_v22 }
 0x147   :  { %116 = vst [vmem:[%s281_s3 + $0x18] sm:$0xff] %v104_v1  ;;  %117 = vst [vmem:[%s281_s3 + $0x20] sm:$0xff] %v105_v23 }
 0x148   :  { %118 = vst [vmem:[%s281_s3 + $0x28] sm:$0xff] %v106_v2  ;;  %119 = vst [vmem:[%s281_s3 + $0x30] sm:$0xff] %v107_v24 }
 0x149   :  { %120 = vst [vmem:[%s281_s3 + $0x38] sm:$0xff] %v108_v6  ;;  %121 = vst [vmem:[%s281_s3 + $0x40] sm:$0xff] %v109_v26 }
 0x14a   :  { %122 = vst [vmem:[%s281_s3 + $0x48] sm:$0xff] %v110_v9  ;;  %123 = vst [vmem:[%s281_s3 + $0x50] sm:$0xff] %v111_v27 }
 0x14b   :  { %124 = vst.msk [vmem:[%s281_s3 + $0x58] sm:$0xff] %vm36_vm0, %v112_v13 }

// kernel: cnn_autoencoder_forward.13
= control target key start
LH: loop header
LB: loop body
LE: loop exit
PB: predicated region body
PF: predicated region fallthrough
CT: control target
= control target key end

     0   :  { %v34_v0 = vlaneseq  ;;  %vm354_vm0 = vcmask 1040384   ;;  %s2046_s0 = inlined_call_operand.vmem [shape: f32[1,8192], index: 0, kind: input, shape index: {}]   ;;  %s2047_s1 = inlined_call_operand.<no memory space> [shape: f32[1,1], index: 1, kind: input, shape index: {}]   ;;  %s2048_s2 = inlined_call_operand.<no memory space> [shape: f32[1,1], index: 2, kind: input, shape index: {}]   ;;  %s2049_s3 = inlined_call_operand.vmem [shape: f32[1,8192], index: 3, kind: output, shape index: {}]  }
   0x1   :  { %v1064_v4 = vld [vmem:[%s2046_s0] sm:$0xff]  ;;  %v1077_v9 = vld [vmem:[%s2046_s0 + $0x8] sm:$0xff]  ;;  %v1082_v10 = vld [vmem:[%s2046_s0 + $0x10] sm:$0xff] }
   0x2   :  { %v35_v1 = vshrl.u32 %v34_v0, 7  ;;  %2065 = vst [vmem:[#allocation4_spill] sm:$0xff] %v1064_v4  ;;  %2066 = vst [vmem:[#allocation5_spill] sm:$0xff] %v1077_v9  ;;  %v1087_v11 = vld [vmem:[%s2046_s0 + $0x18] sm:$0xff]  ;;  %v1096_v14 = vld [vmem:[%s2046_s0 + $0x20] sm:$0xff]  ;;  %v1105_v16 = vmul.f32 %v1064_v4, %v1064_v4  ;;  %v1109_v17 = vmul.f32 %v1077_v9, %v1077_v9  ;;  %v1113_v18 = vmul.f32 %v1082_v10, %v1082_v10 }
   0x3   :  { %2067 = vst [vmem:[#allocation6_spill] sm:$0xff] %v1082_v10  ;;  %2068 = vst [vmem:[#allocation7_spill] sm:$0xff] %v1087_v11  ;;  %v1101_v15 = vld [vmem:[%s2046_s0 + $0x28] sm:$0xff]  ;;  %v1117_v19 = vmul.f32 %v1087_v11, %v1087_v11  ;;  %v1125_v22 = vmul.f32 %v1096_v14, %v1096_v14  ;;  %v1222_v52 = vld [vmem:[%s2046_s0 + $0x30] sm:$0xff] }
   0x4   :  { %v1057_v2 = vsub.s32 0, %v35_v1  ;;  %v1059_v3 = vsub.s32 1, %v35_v1  ;;  %v1066_v5 = vsub.s32 2, %v35_v1  ;;  %v1068_v6 = vsub.s32 3, %v35_v1  ;;  %2069 = vst [vmem:[#allocation8_spill] sm:$0xff] %v1096_v14  ;;  %2070 = vst [vmem:[#allocation9_spill] sm:$0xff] %v1101_v15 }
   0x5   :  { %v1070_v7 = vsub.s32 4, %v35_v1  ;;  %v1072_v8 = vsub.s32 5, %v35_v1  ;;  %v1089_v12 = vsub.s32 6, %v35_v1  ;;  %v1091_v13 = vsub.s32 7, %v35_v1  ;;  %2071 = vst [vmem:[#allocation10_spill] sm:$0xff] %v1117_v19  ;;  %2072 = vst [vmem:[#allocation11_spill] sm:$0xff] %v1125_v22 }
   0x6   :  { %v37_v20 = vrot.slane %v1064_v4, %v1057_v2  ;;  %v41_v21 = vrot.slane %v1064_v4, %v1059_v3  ;;  %v1129_v23 = vmul.f32 %v1101_v15, %v1101_v15  ;;  %v45_v24 = vrot.slane %v1064_v4, %v1066_v5  ;;  %2074 = vst [vmem:[#allocation13_spill] sm:$0xff] %v1222_v52  ;;  %v1238_v43 = vld [vmem:[%s2046_s0 + $0x38] sm:$0xff] }
   0x7   :  { %v49_v25 = vrot.slane %v1064_v4, %v1068_v6  ;;  %v53_v26 = vrot.slane %v1064_v4, %v1070_v7  ;;  %v57_v27 = vrot.slane %v1064_v4, %v1072_v8  ;;  %v61_v28 = vrot.slane %v1064_v4, %v1089_v12  ;;  %2075 = vst [vmem:[#allocation14_spill] sm:$0xff] %v1238_v43 }
   0x8   :  { %2073 = vst [vmem:[#allocation12_spill] sm:$0xff] %v1129_v23  ;;  %v65_v29 = vrot.slane %v1064_v4, %v1091_v13  ;;  %v69_v30 = vrot.slane %v1077_v9, %v1057_v2  ;;  %v73_v31 = vrot.slane %v1077_v9, %v1059_v3  ;;  %v77_v32 = vrot.slane %v1077_v9, %v1066_v5 }
   0x9   :  { %v81_v33 = vrot.slane %v1077_v9, %v1068_v6  ;;  %v169_v55 = vrot.slane %v1096_v14, %v1059_v3  ;;  %v173_v56 = vrot.slane %v1096_v14, %v1066_v5  ;;  %v177_v57 = vrot.slane %v1096_v14, %v1068_v6 }
   0xa   :  { %v181_v58 = vrot.slane %v1096_v14, %v1070_v7  ;;  %v185_v59 = vrot.slane %v1096_v14, %v1072_v8  ;;  %v189_v60 = vrot.slane %v1096_v14, %v1089_v12  ;;  %v193_v61 = vrot.slane %v1096_v14, %v1091_v13 }
   0xb   :  { %v201_v62 = vrot.slane %v1101_v15, %v1059_v3  ;;  %v205_v63 = vrot.slane %v1101_v15, %v1066_v5  ;;  %v209_v0 = vrot.slane %v1101_v15, %v1068_v6  ;;  %v213_v1 = vrot.slane %v1101_v15, %v1070_v7 }
   0xc   :  { %v217_v54 = vrot.slane %v1101_v15, %v1072_v8  ;;  %v221_v53 = vrot.slane %v1101_v15, %v1089_v12  ;;  %v225_v51 = vrot.slane %v1101_v15, %v1091_v13  ;;  %v355_v50 = vsel %vm354_vm0, %v37_v20, 0.0 }
   0xd   :  { %v356_v49 = vsel %vm354_vm0, %v41_v21, 0.0  ;;  %v358_v48 = vsel %vm354_vm0, %v45_v24, 0.0  ;;  %v233_v47 = vrot.slane %v1222_v52, %v1059_v3  ;;  %v237_v46 = vrot.slane %v1222_v52, %v1066_v5 }
   0xe   :  { %v241_v45 = vrot.slane %v1222_v52, %v1068_v6  ;;  %v357_v44 = vadd.f32 %v356_v49, %v355_v50  ;;  %v245_v20 = vrot.slane %v1222_v52, %v1070_v7  ;;  %v249_v21 = vrot.slane %v1222_v52, %v1072_v8 }
   0xf   :  { %v253_v24 = vrot.slane %v1222_v52, %v1089_v12  ;;  %v360_v42 = vsel %vm354_vm0, %v49_v25, 0.0  ;;  %v257_v41 = vrot.slane %v1222_v52, %v1091_v13  ;;  %v265_v49 = vrot.slane %v1238_v43, %v1059_v3 }
  0x10   :  { %v269_v50 = vrot.slane %v1238_v43, %v1066_v5  ;;  %v359_v40 = vadd.f32 %v358_v48, %v357_v44  ;;  %v273_v39 = vrot.slane %v1238_v43, %v1068_v6  ;;  %v277_v38 = vrot.slane %v1238_v43, %v1070_v7 }
  0x11   :  { %v281_v37 = vrot.slane %v1238_v43, %v1072_v8  ;;  %v362_v25 = vsel %vm354_vm0, %v53_v26, 0.0  ;;  %v285_v36 = vrot.slane %v1238_v43, %v1089_v12  ;;  %v289_v44 = vrot.slane %v1238_v43, %v1091_v13 }
  0x12   :  { %v361_v48 = vadd.f32 %v360_v42, %v359_v40  ;;  %v364_v35 = vsel %vm354_vm0, %v57_v27, 0.0  ;;  %v366_v34 = vsel %vm354_vm0, %v61_v28, 0.0  ;;  %v368_v26 = vsel %vm354_vm0, %v65_v29, 0.0 }
  0x13   :  { %v370_v40 = vsel %vm354_vm0, %v69_v30, 0.0  ;;  %v372_v27 = vsel %vm354_vm0, %v73_v31, 0.0  ;;  %v374_v28 = vsel %vm354_vm0, %v77_v32, 0.0  ;;  %v376_v29 = vsel %vm354_vm0, %v81_v33, 0.0 }
  0x14   :  { %v363_v42 = vadd.f32 %v362_v25, %v361_v48  ;;  %v2076_v4 = vrot.slane %v1077_v9, %v1070_v7  ;;  %v2077_v15 = vrot.slane %v1077_v9, %v1072_v8  ;;  %v2078_v25 = vrot.slane %v1077_v9, %v1089_v12 }
  0x15   :  { %v2079_v33 = vrot.slane %v1077_v9, %v1091_v13  ;;  %v2081_v23 = vrot.slane %v1082_v10, %v1059_v3  ;;  %v1333_v9 = vsel %vm354_vm0, %v173_v56, 0.0  ;;  %v1339_v19 = vsel %vm354_vm0, %v181_v58, 0.0 }
  0x16   :  { %v378_v30 = vsel %vm354_vm0, %v2076_v4, 0.0  ;;  %v1303_v31 = vsel %vm354_vm0, %v2077_v15, 0.0  ;;  %v1309_v32 = vsel %vm354_vm0, %v2078_v25, 0.0  ;;  %v2080_v4 = vrot.slane %v1082_v10, %v1057_v2 }
  0x17   :  { %v1315_v48 = vsel %vm354_vm0, %v2079_v33, 0.0  ;;  %v365_v15 = vadd.f32 %v364_v35, %v363_v42  ;;  %v1327_v22 = vsel %vm354_vm0, %v2081_v23, 0.0  ;;  %v1330_v25 = vsel %vm354_vm0, %v169_v55, 0.0 }
  0x18   :  { %v1321_v14 = vsel %vm354_vm0, %v2080_v4, 0.0  ;;  %v1336_v33 = vsel %vm354_vm0, %v177_v57, 0.0  ;;  %v1342_v35 = vsel %vm354_vm0, %v185_v59, 0.0  ;;  %v1345_v42 = vsel %vm354_vm0, %v189_v60, 0.0 }
  0x19   :  { %v367_v23 = vadd.f32 %v366_v34, %v365_v15  ;;  %v2082_v55 = vrot.slane %v1082_v10, %v1066_v5  ;;  %v1354_v56 = vsel %vm354_vm0, %v193_v61, 0.0  ;;  %v1357_v57 = vsel %vm354_vm0, %v201_v62, 0.0 }
  0x1a   :  { %v1360_v58 = vsel %vm354_vm0, %v205_v63, 0.0  ;;  %v1363_v59 = vsel %vm354_vm0, %v209_v0, 0.0  ;;  %v1366_v34 = vsel %vm354_vm0, %v213_v1, 0.0  ;;  %v1369_v60 = vsel %vm354_vm0, %v217_v54, 0.0 }
  0x1b   :  { %v1351_v4 = vsel %vm354_vm0, %v2082_v55, 0.0  ;;  %2083 = vst [vmem:[#allocation15_spill] sm:$0xff] %v1369_v60  ;;  %v369_v15 = vadd.f32 %v368_v26, %v367_v23  ;;  %v2084_v61 = vrot.slane %v1082_v10, %v1068_v6  ;;  %v1378_v62 = vsel %vm354_vm0, %v221_v53, 0.0 }
  0x1c   :  { %2085 = vst [vmem:[#allocation16_spill] sm:$0xff] %v1378_v62  ;;  %v1381_v63 = vsel %vm354_vm0, %v225_v51, 0.0  ;;  %v1384_v0 = vsel %vm354_vm0, %v233_v47, 0.0  ;;  %v1387_v1 = vsel %vm354_vm0, %v237_v46, 0.0  ;;  %v1390_v54 = vsel %vm354_vm0, %v241_v45, 0.0 }
  0x1d   :  { %v1375_v55 = vsel %vm354_vm0, %v2084_v61, 0.0  ;;  %2086 = vst [vmem:[#allocation17_spill] sm:$0xff] %v1381_v63  ;;  %2087 = vst [vmem:[#allocation18_spill] sm:$0xff] %v1384_v0  ;;  %v1393_v26 = vsel %vm354_vm0, %v245_v20, 0.0  ;;  %v371_v23 = vadd.f32 %v370_v40, %v369_v15  ;;  %v1396_v61 = vsel %vm354_vm0, %v249_v21, 0.0 }
  0x1e   :  { %2088 = vst [vmem:[#allocation19_spill] sm:$0xff] %v1387_v1  ;;  %2089 = vst [vmem:[#allocation20_spill] sm:$0xff] %v1390_v54  ;;  %v1399_v53 = vsel %vm354_vm0, %v253_v24, 0.0  ;;  %v1402_v51 = vsel %vm354_vm0, %v257_v41, 0.0  ;;  %v2094_v46 = vrot.slane %v1082_v10, %v1070_v7  ;;  %v1411_v45 = vsel %vm354_vm0, %v265_v49, 0.0  ;;  %v2114_v1 = vld [vmem:[#allocation11_spill] sm:$0xff] }
  0x1f   :  { %2090 = vst [vmem:[#allocation21_spill] sm:$0xff] %v1393_v26  ;;  %2091 = vst [vmem:[#allocation22_spill] sm:$0xff] %v1396_v61  ;;  %v1414_v20 = vsel %vm354_vm0, %v269_v50, 0.0  ;;  %v1417_v21 = vsel %vm354_vm0, %v273_v39, 0.0  ;;  %v373_v24 = vadd.f32 %v372_v27, %v371_v23  ;;  %v1420_v40 = vsel %vm354_vm0, %v277_v38, 0.0 }
  0x20   :  { %2092 = vst [vmem:[#allocation23_spill] sm:$0xff] %v1399_v53  ;;  %2093 = vst [vmem:[#allocation24_spill] sm:$0xff] %v1402_v51  ;;  %v1408_v47 = vsel %vm354_vm0, %v2094_v46, 0.0  ;;  %v1423_v41 = vsel %vm354_vm0, %v281_v37, 0.0  ;;  %v1426_v15 = vsel %vm354_vm0, %v285_v36, 0.0  ;;  %v1429_v46 = vsel %vm354_vm0, %v289_v44, 0.0 }
  0x21   :  { %2095 = vst [vmem:[#allocation25_spill] sm:$0xff] %v1411_v45  ;;  %2096 = vst [vmem:[#allocation26_spill] sm:$0xff] %v1414_v20  ;;  %v503_v49 = vrot.slane %v1105_v16, %v1057_v2  ;;  %v507_v39 = vrot.slane %v1105_v16, %v1059_v3  ;;  %v511_v50 = vrot.slane %v1105_v16, %v1066_v5 }
  0x22   :  { %2097 = vst [vmem:[#allocation27_spill] sm:$0xff] %v1417_v21  ;;  %2098 = vst [vmem:[#allocation28_spill] sm:$0xff] %v1420_v40  ;;  %v375_v38 = vadd.f32 %v374_v28, %v373_v24  ;;  %v2102_v37 = vrot.slane %v1082_v10, %v1072_v8  ;;  %v2103_v36 = vrot.slane %v1082_v10, %v1089_v12 }
  0x23   :  { %2099 = vst [vmem:[#allocation29_spill] sm:$0xff] %v1423_v41  ;;  %2100 = vst [vmem:[#allocation30_spill] sm:$0xff] %v1426_v15  ;;  %v2104_v23 = vrot.slane %v1082_v10, %v1091_v13  ;;  %v2105_v28 = vrot.slane %v1087_v11, %v1057_v2  ;;  %v820_v15 = vsel %vm354_vm0, %v503_v49, 0.0  ;;  %v519_v10 = vrot.slane %v1105_v16, %v1070_v7 }
  0x24   :  { %2101 = vst [vmem:[#allocation31_spill] sm:$0xff] %v1429_v46  ;;  %v1441_v27 = vsel %vm354_vm0, %v2102_v37, 0.0  ;;  %v1447_v44 = vsel %vm354_vm0, %v2103_v36, 0.0  ;;  %v515_v37 = vrot.slane %v1105_v16, %v1068_v6  ;;  %v821_v36 = vsel %vm354_vm0, %v507_v39, 0.0 }
  0x25   :  { %v1453_v46 = vsel %vm354_vm0, %v2104_v23, 0.0  ;;  %v1459_v24 = vsel %vm354_vm0, %v2105_v28, 0.0  ;;  %v377_v41 = vadd.f32 %v376_v29, %v375_v38  ;;  %v822_v40 = vadd.f32 %v821_v36, %v820_v15 }
  0x26   :  { %v823_v23 = vsel %vm354_vm0, %v511_v50, 0.0  ;;  %v2106_v21 = vrot.slane %v1087_v11, %v1059_v3  ;;  %v2107_v20 = vrot.slane %v1087_v11, %v1066_v5  ;;  %v2108_v29 = vrot.slane %v1087_v11, %v1068_v6 }
  0x27   :  { %v2109_v15 = vrot.slane %v1087_v11, %v1070_v7  ;;  %v2110_v38 = vrot.slane %v1087_v11, %v1072_v8  ;;  %v1519_v61 = vmul.f32 %v1222_v52, %v1222_v52  ;;  %v635_v0 = vrot.slane %v2114_v1, %v1059_v3  ;;  %v2115_v52 = vld [vmem:[#allocation12_spill] sm:$0xff] }
  0x28   :  { %v1472_v28 = vsel %vm354_vm0, %v2106_v21, 0.0  ;;  %v1478_v49 = vsel %vm354_vm0, %v2107_v20, 0.0  ;;  %v1484_v39 = vsel %vm354_vm0, %v2108_v29, 0.0  ;;  %v379_v21 = vadd.f32 %v378_v30, %v377_v41 }
  0x29   :  { %v1490_v50 = vsel %vm354_vm0, %v2109_v15, 0.0  ;;  %v1496_v36 = vsel %vm354_vm0, %v2110_v38, 0.0  ;;  %v2111_v20 = vrot.slane %v1087_v11, %v1089_v12  ;;  %v2112_v29 = vrot.slane %v1087_v11, %v1091_v13 }
  0x2a   :  { %v824_v15 = vadd.f32 %v823_v23, %v822_v40  ;;  %v825_v38 = vsel %vm354_vm0, %v515_v37, 0.0  ;;  %v381_v53 = vadd.f32 %v1303_v31, %v379_v21  ;;  %v575_v21 = vrot.slane %v1113_v18, %v1066_v5  ;;  %v2113_v40 = vld [vmem:[#allocation10_spill] sm:$0xff] }
  0x2b   :  { %v1502_v45 = vsel %vm354_vm0, %v2111_v20, 0.0  ;;  %v1508_v51 = vsel %vm354_vm0, %v2112_v29, 0.0  ;;  %v827_v20 = vsel %vm354_vm0, %v519_v10, 0.0  ;;  %v1523_v29 = vmul.f32 %v1238_v43, %v1238_v43 }
  0x2c   :  { %v383_v31 = vadd.f32 %v1309_v32, %v381_v53  ;;  %v826_v41 = vadd.f32 %v825_v38, %v824_v15  ;;  %v571_v53 = vrot.slane %v1113_v18, %v1059_v3  ;;  %v579_v15 = vrot.slane %v1113_v18, %v1068_v6 }
  0x2d   :  { %v583_v38 = vrot.slane %v1113_v18, %v1070_v7  ;;  %v587_v37 = vrot.slane %v1113_v18, %v1072_v8  ;;  %v591_v10 = vrot.slane %v1113_v18, %v1089_v12  ;;  %v603_v30 = vrot.slane %v2113_v40, %v1059_v3 }
  0x2e   :  { %v385_v32 = vadd.f32 %v1315_v48, %v383_v31  ;;  %v595_v48 = vrot.slane %v1113_v18, %v1091_v13  ;;  %v607_v23 = vrot.slane %v2113_v40, %v1066_v5  ;;  %v611_v11 = vrot.slane %v2113_v40, %v1068_v6 }
  0x2f   :  { %v615_v43 = vrot.slane %v2113_v40, %v1070_v7  ;;  %v619_v26 = vrot.slane %v2113_v40, %v1072_v8  ;;  %v828_v62 = vadd.f32 %v827_v20, %v826_v41  ;;  %v2116_v54 = vrot.slane %v1105_v16, %v1072_v8 }
  0x30   :  { %v387_v31 = vadd.f32 %v1321_v14, %v385_v32  ;;  %v1672_v63 = vsel %vm354_vm0, %v583_v38, 0.0  ;;  %v1689_v38 = vsel %vm354_vm0, %v603_v30, 0.0 }
  0x31   :  { %v829_v14 = vsel %vm354_vm0, %v2116_v54, 0.0  ;;  %v1666_v54 = vsel %vm354_vm0, %v575_v21, 0.0  ;;  %v2122_v21 = vrot.slane %v1109_v17, %v1068_v6 }
  0x32   :  { %v389_v32 = vadd.f32 %v1327_v22, %v387_v31  ;;  %v830_v22 = vadd.f32 %v829_v14, %v828_v62 }
  0x34   :  { %v391_v31 = vadd.f32 %v1351_v4, %v389_v32  ;;  %v2121_v4 = vrot.slane %v1109_v17, %v1066_v5 }
  0x36   :  { %v393_v32 = vadd.f32 %v1375_v55, %v391_v31  ;;  %v2118_v55 = vrot.slane %v1105_v16, %v1091_v13 }
  0x38   :  { %v395_v31 = vadd.f32 %v1408_v47, %v393_v32  ;;  %v2117_v47 = vrot.slane %v1105_v16, %v1089_v12  ;;  %v833_v60 = vsel %vm354_vm0, %v2118_v55, 0.0  ;;  %v839_v16 = vsel %vm354_vm0, %v2121_v4, 0.0 }
  0x39   :  { %v1663_v55 = vsel %vm354_vm0, %v571_v53, 0.0  ;;  %v1679_v4 = vsel %vm354_vm0, %v591_v10, 0.0  ;;  %v1682_v53 = vsel %vm354_vm0, %v595_v48, 0.0  ;;  %v1699_v48 = vsel %vm354_vm0, %v615_v43, 0.0 }
  0x3a   :  { %v831_v32 = vsel %vm354_vm0, %v2117_v47, 0.0  ;;  %v397_v41 = vadd.f32 %v1441_v27, %v395_v31  ;;  %v2119_v47 = vrot.slane %v1109_v17, %v1057_v2  ;;  %v2120_v31 = vrot.slane %v1109_v17, %v1059_v3 }
  0x3b   :  { %v832_v14 = vadd.f32 %v831_v32, %v830_v22 }
  0x3c   :  { %v835_v27 = vsel %vm354_vm0, %v2119_v47, 0.0  ;;  %v837_v20 = vsel %vm354_vm0, %v2120_v31, 0.0  ;;  %v399_v62 = vadd.f32 %v1447_v44, %v397_v41  ;;  %v1669_v47 = vsel %vm354_vm0, %v579_v15, 0.0 }
  0x3d   :  { %v1675_v44 = vsel %vm354_vm0, %v587_v37, 0.0  ;;  %v834_v32 = vadd.f32 %v833_v60, %v832_v14  ;;  %v841_v15 = vsel %vm354_vm0, %v2122_v21, 0.0  ;;  %v1692_v37 = vsel %vm354_vm0, %v607_v23, 0.0 }
  0x3e   :  { %v401_v22 = vadd.f32 %v1453_v46, %v399_v62  ;;  %v1695_v46 = vsel %vm354_vm0, %v611_v11, 0.0  ;;  %v1702_v41 = vsel %vm354_vm0, %v619_v26, 0.0  ;;  %v2123_v31 = vrot.slane %v1109_v17, %v1070_v7 }
  0x3f   :  { %v836_v10 = vadd.f32 %v835_v27, %v834_v32  ;;  %v2124_v23 = vrot.slane %v2113_v40, %v1089_v12  ;;  %v1721_v26 = vsel %vm354_vm0, %v635_v0, 0.0  ;;  %v2126_v14 = vrot.slane %v2114_v1, %v1066_v5 }
  0x40   :  { %v403_v60 = vadd.f32 %v1459_v24, %v401_v22  ;;  %v843_v30 = vsel %vm354_vm0, %v2123_v31, 0.0  ;;  %v2125_v24 = vrot.slane %v2113_v40, %v1091_v13  ;;  %v2127_v32 = vrot.slane %v2114_v1, %v1068_v6 }
  0x41   :  { %v1712_v11 = vsel %vm354_vm0, %v2124_v23, 0.0  ;;  %v838_v62 = vadd.f32 %v837_v20, %v836_v10  ;;  %v1728_v22 = vsel %vm354_vm0, %v2126_v14, 0.0  ;;  %v2128_v31 = vrot.slane %v2114_v1, %v1070_v7 }
  0x42   :  { %v1718_v43 = vsel %vm354_vm0, %v2125_v24, 0.0  ;;  %v405_v27 = vadd.f32 %v1472_v28, %v403_v60  ;;  %v1734_v21 = vsel %vm354_vm0, %v2127_v32, 0.0  ;;  %v2129_v28 = vrot.slane %v2114_v1, %v1072_v8 }
  0x43   :  { %v1740_v0 = vsel %vm354_vm0, %v2128_v31, 0.0  ;;  %v2131_v60 = vrot.slane %v2114_v1, %v1089_v12  ;;  %v2133_v23 = vrot.slane %v2114_v1, %v1091_v13  ;;  %v840_v32 = vadd.f32 %v839_v16, %v838_v62 }
  0x44   :  { %v1746_v20 = vsel %vm354_vm0, %v2129_v28, 0.0  ;;  %v407_v14 = vadd.f32 %v1478_v49, %v405_v27  ;;  %v2134_v31 = vrot.slane %v1109_v17, %v1072_v8  ;;  %v2139_v49 = vrot.slane %v2115_v52, %v1068_v6 }
  0x45   :  { %2130 = vst [vmem:[#allocation10_spill] sm:$0xff] %v1746_v20  ;;  %v1752_v10 = vsel %vm354_vm0, %v2131_v60, 0.0  ;;  %v1758_v24 = vsel %vm354_vm0, %v2133_v23, 0.0  ;;  %v2135_v20 = vrot.slane %v2115_v52, %v1059_v3  ;;  %v2141_v27 = vrot.slane %v2115_v52, %v1070_v7 }
  0x46   :  { %2132 = vst [vmem:[#allocation11_spill] sm:$0xff] %v1752_v10  ;;  %v845_v28 = vsel %vm354_vm0, %v2134_v31, 0.0  ;;  %v2137_v10 = vrot.slane %v2115_v52, %v1066_v5  ;;  %v1781_v16 = vsel %vm354_vm0, %v2139_v49, 0.0 }
  0x47   :  { %v1769_v60 = vsel %vm354_vm0, %v2135_v20, 0.0  ;;  %2140 = vst [vmem:[#allocation33_spill] sm:$0xff] %v1781_v16  ;;  %v1787_v62 = vsel %vm354_vm0, %v2141_v27, 0.0  ;;  %v2143_v20 = vrot.slane %v2115_v52, %v1072_v8  ;;  %v2146_v16 = vrot.slane %v2115_v52, %v1091_v13 }
  0x48   :  { %2136 = vst [vmem:[#allocation12_spill] sm:$0xff] %v1769_v60  ;;  %v1775_v23 = vsel %vm354_vm0, %v2137_v10, 0.0  ;;  %2142 = vst [vmem:[#allocation34_spill] sm:$0xff] %v1787_v62  ;;  %v409_v10 = vadd.f32 %v1484_v39, %v407_v14  ;;  %v2144_v60 = vrot.slane %v2115_v52, %v1089_v12  ;;  %v2148_v62 = vrot.slane %v1109_v17, %v1089_v12 }
  0x49   :  { %2138 = vst [vmem:[#allocation32_spill] sm:$0xff] %v1775_v23  ;;  %v1793_v31 = vsel %vm354_vm0, %v2143_v20, 0.0  ;;  %v842_v23 = vadd.f32 %v841_v15, %v840_v32  ;;  %v1806_v27 = vsel %vm354_vm0, %v2146_v16, 0.0  ;;  %v2149_v39 = vrot.slane %v1519_v61, %v1059_v3 }
  0x4a   :  { %v1800_v49 = vsel %vm354_vm0, %v2144_v60, 0.0  ;;  %2147 = vst [vmem:[#allocation36_spill] sm:$0xff] %v1806_v27  ;;  %v847_v20 = vsel %vm354_vm0, %v2148_v62, 0.0  ;;  %v2151_v14 = vrot.slane %v1519_v61, %v1066_v5  ;;  %v2153_v60 = vrot.slane %v1519_v61, %v1068_v6 }
  0x4b   :  { %2145 = vst [vmem:[#allocation35_spill] sm:$0xff] %v1800_v49  ;;  %v1816_v15 = vsel %vm354_vm0, %v2149_v39, 0.0  ;;  %v411_v62 = vadd.f32 %v1490_v50, %v409_v10  ;;  %v844_v27 = vadd.f32 %v843_v30, %v842_v23  ;;  %v2154_v49 = vrot.slane %v1519_v61, %v1070_v7 }
  0x4c   :  { %2150 = vst [vmem:[#allocation37_spill] sm:$0xff] %v1816_v15  ;;  %v1822_v32 = vsel %vm354_vm0, %v2151_v14, 0.0  ;;  %v1828_v16 = vsel %vm354_vm0, %v2153_v60, 0.0  ;;  %v2155_v15 = vrot.slane %v1519_v61, %v1072_v8  ;;  %v2158_v50 = vrot.slane %v1519_v61, %v1089_v12 }
  0x4d   :  { %2152 = vst [vmem:[#allocation38_spill] sm:$0xff] %v1822_v32  ;;  %v1835_v39 = vsel %vm354_vm0, %v2154_v49, 0.0  ;;  %v2157_v32 = vrot.slane %v1109_v17, %v1091_v13  ;;  %v2160_v23 = vrot.slane %v1519_v61, %v1091_v13  ;;  %v2161_v49 = vrot.slane %v1523_v29, %v1059_v3 }
  0x4e   :  { %v1841_v14 = vsel %vm354_vm0, %v2155_v15, 0.0  ;;  %v1851_v30 = vsel %vm354_vm0, %v2158_v50, 0.0  ;;  %v413_v17 = vadd.f32 %v1496_v36, %v411_v62  ;;  %v2164_v3 = vrot.slane %v1523_v29, %v1070_v7 }
  0x4f   :  { %2156 = vst [vmem:[#allocation39_spill] sm:$0xff] %v1841_v14  ;;  %v849_v60 = vsel %vm354_vm0, %v2157_v32, 0.0  ;;  %2159 = vst [vmem:[#allocation40_spill] sm:$0xff] %v1851_v30  ;;  %v1857_v10 = vsel %vm354_vm0, %v2160_v23, 0.0  ;;  %v1863_v15 = vsel %vm354_vm0, %v2161_v49, 0.0  ;;  %v846_v32 = vadd.f32 %v845_v28, %v844_v27 }
  0x50   :  { %v2162_v14 = vrot.slane %v1523_v29, %v1066_v5  ;;  %v2163_v30 = vrot.slane %v1523_v29, %v1068_v6  ;;  %v1882_v49 = vsel %vm354_vm0, %v2164_v3, 0.0  ;;  %v2165_v36 = vrot.slane %v1523_v29, %v1072_v8 }
  0x51   :  { %v2167_v28 = vrot.slane %v1523_v29, %v1089_v12  ;;  %v2169_v27 = vrot.slane %v1523_v29, %v1091_v13  ;;  %v415_v62 = vadd.f32 %v1502_v45, %v413_v17  ;;  %v2172_v12 = vrot.slane %v1113_v18, %v1057_v2 }
  0x52   :  { %v1870_v50 = vsel %vm354_vm0, %v2162_v14, 0.0  ;;  %v1876_v23 = vsel %vm354_vm0, %v2163_v30, 0.0  ;;  %v1888_v5 = vsel %vm354_vm0, %v2165_v36, 0.0  ;;  %v848_v14 = vadd.f32 %v847_v20, %v846_v32  ;;  %v2170_v30 = vld [vmem:[#allocation8_spill] sm:$0xff] }
  0x53   :  { %2166 = vst [vmem:[#allocation41_spill] sm:$0xff] %v1888_v5  ;;  %v1894_v6 = vsel %vm354_vm0, %v2167_v28, 0.0  ;;  %v1900_v7 = vsel %vm354_vm0, %v2169_v27, 0.0  ;;  %v2171_v8 = vrot.slane %v2170_v30, %v1057_v2  ;;  %v851_v36 = vsel %vm354_vm0, %v2172_v12, 0.0 }
  0x54   :  { %2168 = vst [vmem:[#allocation42_spill] sm:$0xff] %v1894_v6  ;;  %v417_v28 = vadd.f32 %v1508_v51, %v415_v62  ;;  %v850_v6 = vadd.f32 %v849_v60, %v848_v14  ;;  %v2173_v51 = vld [vmem:[#allocation9_spill] sm:$0xff] }
  0x55   :  { %v418_v3 = vsel %vm354_vm0, %v2171_v8, 0.0  ;;  %v197_v60 = vrot.slane %v2173_v51, %v1057_v2 }
  0x56   :  { %v419_v13 = vadd.f32 %v418_v3, %v417_v28  ;;  %v852_v5 = vadd.f32 %v851_v36, %v850_v6  ;;  %v2175_v28 = vld [vmem:[#allocation15_spill] sm:$0xff] }
  0x58   :  { %v421_v27 = vadd.f32 %v1330_v25, %v419_v13  ;;  %v854_v45 = vadd.f32 %v1663_v55, %v852_v5  ;;  %v599_v25 = vrot.slane %v2113_v40, %v1057_v2  ;;  %v2176_v13 = vld [vmem:[#allocation16_spill] sm:$0xff] }
  0x5a   :  { %v423_v20 = vadd.f32 %v1333_v9, %v421_v27  ;;  %v856_v17 = vadd.f32 %v1666_v54, %v854_v45  ;;  %v2177_v27 = vld [vmem:[#allocation17_spill] sm:$0xff] }
  0x5c   :  { %v425_v32 = vadd.f32 %v1336_v33, %v423_v20  ;;  %v858_v8 = vadd.f32 %v1669_v47, %v856_v17  ;;  %v434_v47 = vsel %vm354_vm0, %v197_v60, 0.0  ;;  %v2180_v60 = vld [vmem:[#allocation20_spill] sm:$0xff] }
  0x5e   :  { %v427_v18 = vadd.f32 %v1339_v19, %v425_v32  ;;  %v860_v12 = vadd.f32 %v1672_v63, %v858_v8  ;;  %v867_v19 = vsel %vm354_vm0, %v599_v25, 0.0  ;;  %v2178_v32 = vld [vmem:[#allocation18_spill] sm:$0xff] }
  0x60   :  { %v429_v55 = vadd.f32 %v1342_v35, %v427_v18  ;;  %v862_v9 = vadd.f32 %v1675_v44, %v860_v12  ;;  %v2179_v18 = vld [vmem:[#allocation19_spill] sm:$0xff] }
  0x62   :  { %v431_v54 = vadd.f32 %v1345_v42, %v429_v55  ;;  %v864_v33 = vadd.f32 %v1679_v4, %v862_v9  ;;  %v2181_v55 = vld [vmem:[#allocation21_spill] sm:$0xff] }
  0x64   :  { %v433_v63 = vadd.f32 %v1354_v56, %v431_v54  ;;  %v866_v5 = vadd.f32 %v1682_v53, %v864_v33  ;;  %v2174_v53 = vld [vmem:[#allocation13_spill] sm:$0xff] }
  0x65   :  { %v229_v36 = vrot.slane %v2174_v53, %v1057_v2 }
  0x66   :  { %v435_v6 = vadd.f32 %v434_v47, %v433_v63  ;;  %v868_v62 = vadd.f32 %v867_v19, %v866_v5  ;;  %v663_v47 = vrot.slane %v2115_v52, %v1057_v2  ;;  %v2183_v19 = vld [vmem:[#allocation22_spill] sm:$0xff] }
  0x67   :  { %v2184_v63 = vld [vmem:[#allocation10_spill] sm:$0xff] }
  0x68   :  { %v437_v40 = vadd.f32 %v1357_v57, %v435_v6  ;;  %v870_v35 = vadd.f32 %v1689_v38, %v868_v62  ;;  %v631_v57 = vrot.slane %v2114_v1, %v1057_v2  ;;  %v2185_v6 = vld [vmem:[#allocation23_spill] sm:$0xff] }
  0x69   :  { %v2186_v62 = vld [vmem:[#allocation11_spill] sm:$0xff] }
  0x6a   :  { %v439_v44 = vadd.f32 %v1360_v58, %v437_v40  ;;  %v872_v42 = vadd.f32 %v1692_v37, %v870_v35  ;;  %v899_v35 = vsel %vm354_vm0, %v663_v47, 0.0  ;;  %v2202_v47 = vld [vmem:[#allocation38_spill] sm:$0xff] }
  0x6c   :  { %v441_v4 = vadd.f32 %v1363_v59, %v439_v44  ;;  %v874_v14 = vadd.f32 %v1695_v46, %v872_v42  ;;  %v450_v46 = vsel %vm354_vm0, %v229_v36, 0.0  ;;  %v2187_v44 = vld [vmem:[#allocation24_spill] sm:$0xff] }
  0x6e   :  { %v443_v3 = vadd.f32 %v1366_v34, %v441_v4  ;;  %v876_v56 = vadd.f32 %v1699_v48, %v874_v14  ;;  %v883_v34 = vsel %vm354_vm0, %v631_v57, 0.0  ;;  %v2190_v57 = vld [vmem:[#allocation26_spill] sm:$0xff] }
  0x70   :  { %v445_v38 = vadd.f32 %v2175_v28, %v443_v3  ;;  %v878_v58 = vadd.f32 %v1702_v41, %v876_v56  ;;  %v2188_v3 = vld [vmem:[#allocation25_spill] sm:$0xff]  ;;  %v2189_v56 = vld [vmem:[#allocation12_spill] sm:$0xff] }
  0x72   :  { %v447_v37 = vadd.f32 %v2176_v13, %v445_v38  ;;  %v880_v59 = vadd.f32 %v1712_v11, %v878_v58  ;;  %v2191_v38 = vld [vmem:[#allocation32_spill] sm:$0xff]  ;;  %v2192_v13 = vld [vmem:[#allocation27_spill] sm:$0xff] }
  0x74   :  { %v449_v48 = vadd.f32 %v2177_v27, %v447_v37  ;;  %v882_v45 = vadd.f32 %v1718_v43, %v880_v59  ;;  %v2182_v43 = vld [vmem:[#allocation14_spill] sm:$0xff]  ;;  %v2193_v59 = vld [vmem:[#allocation33_spill] sm:$0xff] }
  0x75   :  { %v261_v33 = vrot.slane %v2182_v43, %v1057_v2 }
  0x76   :  { %v451_v20 = vadd.f32 %v450_v46, %v449_v48  ;;  %v884_v17 = vadd.f32 %v883_v34, %v882_v45  ;;  %v2194_v34 = vld [vmem:[#allocation28_spill] sm:$0xff]  ;;  %v2195_v48 = vld [vmem:[#allocation34_spill] sm:$0xff] }
  0x78   :  { %v453_v1 = vadd.f32 %v2178_v32, %v451_v20  ;;  %v886_v8 = vadd.f32 %v1721_v26, %v884_v17  ;;  %v2196_v20 = vld [vmem:[#allocation29_spill] sm:$0xff] }
  0x7a   :  { %v455_v41 = vadd.f32 %v2179_v18, %v453_v1  ;;  %v888_v12 = vadd.f32 %v1728_v22, %v886_v8  ;;  %v2197_v1 = vld [vmem:[#allocation30_spill] sm:$0xff]  ;;  %v2198_v18 = vld [vmem:[#allocation35_spill] sm:$0xff] }
  0x7c   :  { %v457_v11 = vadd.f32 %v2180_v60, %v455_v41  ;;  %v890_v25 = vadd.f32 %v1734_v21, %v888_v12  ;;  %v466_v21 = vsel %vm354_vm0, %v261_v33, 0.0  ;;  %v2199_v60 = vld [vmem:[#allocation31_spill] sm:$0xff] }
  0x7e   :  { %v459_v9 = vadd.f32 %v2181_v55, %v457_v11  ;;  %v892_v54 = vadd.f32 %v1740_v0, %v890_v25  ;;  %v2200_v25 = vld [vmem:[#allocation36_spill] sm:$0xff] }
  0x80   :  { %v461_v26 = vadd.f32 %v2183_v19, %v459_v9  ;;  %v894_v5 = vadd.f32 %v2184_v63, %v892_v54  ;;  %v2201_v54 = vld [vmem:[#allocation37_spill] sm:$0xff]  ;;  %v2203_v63 = vld [vmem:[#allocation39_spill] sm:$0xff] }
  0x82   :  { %v463_v22 = vadd.f32 %v2185_v6, %v461_v26  ;;  %v896_v40 = vadd.f32 %v2186_v62, %v894_v5  ;;  %v727_v26 = vrot.slane %v1523_v29, %v1057_v2  ;;  %v2204_v6 = vld [vmem:[#allocation40_spill] sm:$0xff]  ;;  %v2206_v29 = vld [vmem:[#allocation42_spill] sm:$0xff] }
  0x84   :  { %v465_v0 = vadd.f32 %v2187_v44, %v463_v22  ;;  %v898_v42 = vadd.f32 %v1758_v24, %v896_v40  ;;  %v695_v24 = vrot.slane %v1519_v61, %v1057_v2  ;;  %v931_v62 = vsel %vm354_vm0, %v727_v26, 0.0 }
  0x86   :  { %v467_v4 = vadd.f32 %v466_v21, %v465_v0  ;;  %v900_v14 = vadd.f32 %v899_v35, %v898_v42  ;;  %v915_v12 = vsel %vm354_vm0, %v695_v24, 0.0  ;;  %v2205_v0 = vld [vmem:[#allocation41_spill] sm:$0xff] }
  0x87   :  { %v2208_v24 = vld [vmem:[#allocation5_spill] sm:$0xff] }
  0x88   :  { %v469_v52 = vadd.f32 %v2188_v3, %v467_v4  ;;  %v902_v36 = vadd.f32 %v2189_v56, %v900_v14  ;;  %v1036_v3 = vmov 0  }
  0x89   :  { %1016 = vset.pattern.permute.xlu1 %v1036_v3  ;;  %1017 = vset.pattern.permute.xlu0 %v1036_v3 }
  0x8a   :  { %v471_v28 = vadd.f32 %v2190_v57, %v469_v52  ;;  %v904_v58 = vadd.f32 %v2191_v38, %v902_v36 }
  0x8c   :  { %v473_v37 = vadd.f32 %v2192_v13, %v471_v28  ;;  %v906_v46 = vadd.f32 %v2193_v59, %v904_v58 }
  0x8e   :  { %v475_v27 = vadd.f32 %v2194_v34, %v473_v37  ;;  %v908_v45 = vadd.f32 %v2195_v48, %v906_v46  ;;  %v2207_v48 = vld [vmem:[#allocation4_spill] sm:$0xff] }
  0x90   :  { %v477_v17 = vadd.f32 %v2196_v20, %v475_v27  ;;  %v910_v32 = vadd.f32 %v1793_v31, %v908_v45 }
  0x92   :  { %v479_v8 = vadd.f32 %v2197_v1, %v477_v17  ;;  %v912_v41 = vadd.f32 %v2198_v18, %v910_v32  ;;  %v2209_v17 = vld [vmem:[#allocation6_spill] sm:$0xff] }
  0x94   :  { %v481_v11 = vadd.f32 %v2199_v60, %v479_v8  ;;  %v914_v55 = vadd.f32 %v2200_v25, %v912_v41  ;;  %v2210_v8 = vld [vmem:[#allocation7_spill] sm:$0xff] }
  0x96   :  { %482 = vadd.xlane.f32.xlu0 %v481_v11  ;;  %v916_v9 = vadd.f32 %v915_v12, %v914_v55 }
  0x98   :  { %v918_v33 = vadd.f32 %v2201_v54, %v916_v9 }
  0x9a   :  { %v920_v61 = vadd.f32 %v2202_v47, %v918_v33 }
  0x9c   :  { %v922_v19 = vadd.f32 %v1828_v16, %v920_v61 }
  0x9e   :  { %v924_v31 = vadd.f32 %v1835_v39, %v922_v19 }
  0xa0   :  { %v926_v5 = vadd.f32 %v2203_v63, %v924_v31 }
  0xa2   :  { %v928_v22 = vadd.f32 %v2204_v6, %v926_v5 }
  0xa4   :  { %v930_v40 = vadd.f32 %v1857_v10, %v928_v22  ;;  %v8_v10 = vstv %s2047_s1 }
  0xa5   :  { %9 = vst [vmem:[#allocation2] sm:$0x1] %v8_v10 }
  0xa6   :  { %v932_v21 = vadd.f32 %v931_v62, %v930_v40 }
  0xa8   :  { %v934_v35 = vadd.f32 %v1863_v15, %v932_v21  ;;  %v10_v15 = vstv %s2048_s2 }
  0xa9   :  { %11 = vst [vmem:[#allocation3] sm:$0x1] %v10_v15 }
  0xaa   :  { %v936_v44 = vadd.f32 %v1870_v50, %v934_v35 }
  0xac   :  { %v938_v16 = vadd.f32 %v1876_v23, %v936_v44  ;;  %v954_v28 = vld [vmem:[#allocation2] sm:$0x1] }
  0xae   :  { %v940_v39 = vadd.f32 %v1882_v49, %v938_v16 }
  0xb0   :  { %v942_v42 = vadd.f32 %v2205_v0, %v940_v39  ;;  %v958_v13 = vld [vmem:[#allocation3] sm:$0x1] }
  0xb2   :  { %v944_v4 = vadd.f32 %v2206_v29, %v942_v42 }
  0xb4   :  { %v946_v14 = vadd.f32 %v1900_v7, %v944_v4 }
  0xb6   :  { %947 = vadd.xlane.f32.xlu0 %v946_v14 }
 0x123   :  { %v483_v50 = vpop.xlane.xlu0 %482 }
 0x124   :  { %v949_v23 = vmul.f32 0.00012207031, %v483_v50 }
 0x126   :  { %v951_v52 = vmul.f32 %v949_v23, %v949_v23 }
 0x143   :  { %v948_v49 = vpop.xlane.xlu0 %947 }
 0x144   :  { %v950_v56 = vmul.f32 0.00012207031, %v948_v49 }
 0x146   :  { %v952_v7 = vsub.f32 %v950_v56, %v951_v52 }
 0x148   :  { %v953_v36 = vmax.f32 %v952_v7, 0.0 }
 0x14a   :  { %v955_v57 = vadd.f32 1e-05, %v953_v36 }
 0x14c   :  { %1018 = vrsqrt.f32 %v955_v57 }
 0x156   :  { %v1019_v38 = vpop.eup %1018 }
 0x157   :  { %v957_v58 = vmul.f32 %v1019_v38, %v954_v28 }
 0x159   :  { %963 = vperm.xlu1 %1016, %v957_v58   ;;  %v959_v37 = vmul.f32 %v957_v58, %v949_v23 }
 0x15b   :  { %v960_v59 = vsub.f32 %v958_v13, %v959_v37 }
 0x15d   :  { %980 = vperm.xlu1 %1016, %v960_v59  }
 0x1d8   :  { %v964_v46 = vpop.permute.xlu1 %963 }
 0x1d9   :  { %v969_v34 = vrot.slane %v964_v46, %v1057_v2 }
 0x1db   :  { %v970_v45 = vmul.f32 %v969_v34, %v2207_v48  ;;  %v971_v20 = vmul.f32 %v969_v34, %v2208_v24  ;;  %v972_v32 = vmul.f32 %v969_v34, %v2209_v17  ;;  %v973_v18 = vmul.f32 %v969_v34, %v2210_v8 }
 0x1dc   :  { %v981_v27 = vpop.permute.xlu1 %980  ;;  %v974_v41 = vmul.f32 %v969_v34, %v2170_v30  ;;  %v975_v25 = vmul.f32 %v969_v34, %v2173_v51  ;;  %v976_v9 = vmul.f32 %v969_v34, %v2174_v53  ;;  %v977_v33 = vmul.f32 %v969_v34, %v2182_v43 }
 0x1dd   :  { %v986_v1 = vrot.slane %v981_v27, %v1057_v2 }
 0x1df   :  { %v987_v12 = vadd.f32 %v986_v1, %v970_v45  ;;  %v988_v60 = vadd.f32 %v986_v1, %v971_v20  ;;  %v989_v11 = vadd.f32 %v986_v1, %v972_v32  ;;  %v990_v55 = vadd.f32 %v986_v1, %v973_v18 }
 0x1e0   :  { %v991_v54 = vadd.f32 %v986_v1, %v974_v41  ;;  %v992_v47 = vadd.f32 %v986_v1, %v975_v25  ;;  %v993_v61 = vadd.f32 %v986_v1, %v976_v9  ;;  %v994_v2 = vadd.f32 %v986_v1, %v977_v33 }
 0x1e1   :  { %1020 = vtanh.f32 %v987_v12 }
 0x1e2   :  { %1022 = vtanh.f32 %v988_v60 }
 0x1e3   :  { %1024 = vtanh.f32 %v989_v11 }
 0x1e4   :  { %1026 = vtanh.f32 %v990_v55 }
 0x1e5   :  { %1028 = vtanh.f32 %v991_v54 }
 0x1e6   :  { %1030 = vtanh.f32 %v992_v47 }
 0x1e7   :  { %1032 = vtanh.f32 %v993_v61 }
 0x1e8   :  { %1034 = vtanh.f32 %v994_v2 }
 0x1eb   :  { %v1021_v30 = vpop.eup %1020 }
 0x1ec   :  { %v1023_v19 = vpop.eup %1022  ;;  %1003 = vst [vmem:[%s2049_s3] sm:$0xff] %v1021_v30 }
 0x1ed   :  { %v1025_v51 = vpop.eup %1024  ;;  %1004 = vst [vmem:[%s2049_s3 + $0x8] sm:$0xff] %v1023_v19 }
 0x1ee   :  { %v1027_v53 = vpop.eup %1026  ;;  %1005 = vst [vmem:[%s2049_s3 + $0x10] sm:$0xff] %v1025_v51 }
 0x1ef   :  { %v1029_v43 = vpop.eup %1028  ;;  %1006 = vst [vmem:[%s2049_s3 + $0x18] sm:$0xff] %v1027_v53 }
 0x1f0   :  { %v1031_v31 = vpop.eup %1030  ;;  %1007 = vst [vmem:[%s2049_s3 + $0x20] sm:$0xff] %v1029_v43 }
 0x1f1   :  { %v1033_v26 = vpop.eup %1032  ;;  %1008 = vst [vmem:[%s2049_s3 + $0x28] sm:$0xff] %v1031_v31 }
 0x1f2   :  { %v1035_v63 = vpop.eup %1034  ;;  %1009 = vst [vmem:[%s2049_s3 + $0x30] sm:$0xff] %v1033_v26 }
 0x1f3   :  { %1010 = vst [vmem:[%s2049_s3 + $0x38] sm:$0xff] %v1035_v63 }

</bundles_post_ra>
